<compile_context>
chip_gen: v6e
topology: v6e:2x2x1
jax: 0.10.0
libtpu: 0.0.40
codegen_flags: <defaults>
</compile_context>

<pallas_src>
import jax
import jax.numpy as jnp
from jax.experimental import pallas as pl
from jax.experimental.pallas import tpu as pltpu

GEM_P = 3.0
GEM_EPS = 1e-6
DROPOUT_P = 0.2


def siamese_kernel(x_ref, wc_ref, bc_ref, wh_ref, bh_ref, mask_ref, out_ref):
    # x_ref    : VMEM (TB, 2C, S)    both views folded onto one 8-sublane axis; spatial on lanes
    # wc_ref   : VMEM (F, C)         1x1 conv weight (PyTorch (F, C, 1, 1) squeezed)
    # bc_ref   : VMEM (F, 1)         conv bias
    # wh_ref   : VMEM (4, F)         head weight rows in concat order [add, sub, sq, mul]
    # bh_ref   : VMEM (1, 1)         head bias
    # mask_ref : VMEM (TB, 2, F)     dropout keep-mask, pre-scaled by 1/(1-p)
    # out_ref  : VMEM (1, 1, TB)     lane-dense output (batch on lanes)
    TB = x_ref.shape[0]
    S = x_ref.shape[2]
    F, C = wc_ref.shape

    mask = mask_ref[...]                                          # (TB, 2, F)

    # Hoist weight/bias broadcasts out of the per-view path (JAX does not CSE broadcast_in_dim).
    w_cols = [wc_ref[:, c:c + 1][None, :, :] for c in range(C)]   # each (1, F, 1)
    bias = bc_ref[...][None, :, :]                                # (1, F, 1)
    inv_s = 1.0 / S

    def extract_features(v):
        # Slice only this view from the ref -> second view's data is not live during the first.
        xv = x_ref[:, v * C:(v + 1) * C, :]                       # (TB, C, S)
        # 1x1 conv as C unrolled VPU broadcast-FMAs (K = C is far too small for the MXU).
        feat = w_cols[0] * xv[:, 0:1, :]                          # (TB, F, S)
        for c in range(1, C):
            feat = feat + w_cols[c] * xv[:, c:c + 1, :]
        # ReLU fused into the GeM clamp: max(relu(t), eps) == max(t, eps) since GEM_EPS > 0.
        feat = jnp.maximum(feat + bias, GEM_EPS)
        # GeM pooling: (mean_s feat^p)^(1/p), p = 3 — cube on VPU, lane reduction over S on XLU.
        cubed = feat * feat * feat
        pooled = jnp.sum(cubed, axis=-1) * inv_s                  # (TB, F)
        pooled = jnp.exp(jnp.log(pooled) * (1.0 / GEM_P))         # cube root; pooled >= eps^3 > 0
        # training-mode dropout (mask already scaled by 1/(1-p))
        return pooled * mask[:, v, :]                             # (TB, F)

    f1 = extract_features(0)
    f2 = extract_features(1)

    # head(concat([x+y, x-y, (x-y)^2, x*y], 1)) as VPU multiplies + one lane reduction over F
    # (keeps the tiny-N head entirely off the MXU).
    a = f1 + f2
    d = f1 - f2
    sq = d * d
    t = f1 * f2
    wh = wh_ref[...]                                              # (4, F)
    acc = a * wh[0:1, :] + d * wh[1:2, :] + sq * wh[2:3, :] + t * wh[3:4, :]
    out = jnp.sum(acc, axis=-1, keepdims=True) + bh_ref[...]      # (TB, 1)
    # Lane-dense store: batch on the 128-lane axis -> unmasked vst.
    out_ref[...] = jnp.transpose(out)[None, :, :]                 # (1, 1, TB)


def _choose_block_b(B, C, S, F, vmem_budget_bytes=8 << 20):
    """Largest divisor of B whose working set fits an ~8 MiB budget (portable to v5e's 16 MiB
    default scoped VMEM; v6e/v7x have 32 MiB), preferring nb = B/block_b even and >= 2 so the
    'parallel' grid axis can shard across v7x's two TensorCores."""
    per_b = (
        2 * (2 * C * S * 4)       # double-buffered folded input block
        + 3 * (F * S * 4)         # live feat/cubed intermediates (one view at a time)
        + 2 * (2 * F * 4)         # double-buffered dropout mask
    )
    cap = max(1, vmem_budget_bytes // per_b)
    divisors = [d for d in range(1, B + 1) if B % d == 0]
    for pred in (
        lambda d: d <= cap and (B // d) >= 2 and (B // d) % 2 == 0,  # fits + balanced 2-TC split
        lambda d: d <= cap and (B // d) >= 2,                        # fits + >=2 grid steps
        lambda d: d <= cap,                                          # fits
    ):
        cands = [d for d in divisors if pred(d)]
        if cands:
            return max(cands)
    return 1


def siamese_forward(x, wc, bc, wh, bh, keep_mask, *, block_b=None):
    """x: (B, 2, C, H, W) f32; wc: (F, C); bc: (F, 1); wh: (4, F); bh: (1, 1);
    keep_mask: (B, 2, F) pre-scaled dropout keep-mask  ->  (B,) f32."""
    B, two, C, H, W = x.shape
    assert two == 2
    S = H * W
    F = wc.shape[0]

    if block_b is None:
        block_b = _choose_block_b(B, C, S, F)
    # TODO(synk): ragged batches would need padding or a pl.when tail guard.
    assert B % block_b == 0, "batch must be divisible by the batch tile"
    nb = B // block_b

    # Free, contiguous reshape only (no HBM transpose pass): fold (2, C) -> 2C = 8 sublanes,
    # flatten NCHW spatial onto the 128-lane axis.
    x_r = x.reshape(B, 2 * C, S)

    out = pl.pallas_call(
        siamese_kernel,
        out_shape=jax.ShapeDtypeStruct((nb, 1, block_b), jnp.float32),
        grid=(nb,),
        in_specs=[
            pl.BlockSpec((block_b, 2 * C, S), lambda i: (i, 0, 0)),
            pl.BlockSpec((F, C), lambda i: (0, 0)),
            pl.BlockSpec((F, 1), lambda i: (0, 0)),
            pl.BlockSpec((4, F), lambda i: (0, 0)),
            pl.BlockSpec((1, 1), lambda i: (0, 0)),
            pl.BlockSpec((block_b, 2, F), lambda i: (i, 0, 0)),
        ],
        out_specs=pl.BlockSpec((1, 1, block_b), lambda i: (i, 0, 0)),
        compiler_params=pltpu.CompilerParams(
            # Batch tiles are independent -> shard grid across v7x's two TensorCores
            # (harmless on single-TC v5e/v6e).
            dimension_semantics=("parallel",),
        ),
    )(x_r, wc, bc, wh, bh, keep_mask)
    return out.reshape(B)


def _reference(x, wc, bc, wh, bh, keep_mask):
    """Pure-JAX reference with identical semantics (same dropout mask)."""
    B, _, C, H, W = x.shape
    S = H * W
    xf = x.reshape(B, 2, C, S)
    feat = jnp.einsum("bvcs,fc->bvfs", xf, wc) + bc.reshape(1, 1, -1, 1)
    feat = jnp.maximum(feat, 0.0)
    pooled = jnp.mean(jnp.maximum(feat, GEM_EPS) ** GEM_P, axis=-1) ** (1.0 / GEM_P)
    pooled = pooled * keep_mask
    f1, f2 = pooled[:, 0, :], pooled[:, 1, :]
    z = jnp.concatenate([f1 + f2, f1 - f2, (f1 - f2) ** 2, f1 * f2], axis=1)
    return z @ wh.reshape(-1) + bh[0, 0]


if __name__ == "__main__":
    B, C, H, W = 16, 4, 16, 16
    F = 32  # dim_feats of the synthetic backbone; head is Linear(4*F, 1)

    key = jax.random.PRNGKey(0)
    kx, kwc, kbc, kwh, kbh, kdrop = jax.random.split(key, 6)

    x = jax.random.normal(kx, (B, 2, C, H, W), dtype=jnp.float32)
    wc = jax.random.normal(kwc, (F, C), dtype=jnp.float32) * 0.1      # 1x1 conv weight
    bc = jax.random.normal(kbc, (F, 1), dtype=jnp.float32) * 0.01     # conv bias
    wh = jax.random.normal(kwh, (4, F), dtype=jnp.float32) * 0.1      # head weight rows [a,d,s,t]
    bh = jax.random.normal(kbh, (1, 1), dtype=jnp.float32) * 0.01     # head bias

    # TODO(synk): torch.nn.Dropout's exact RNG stream cannot be bit-reproduced; the training-mode
    # keep-mask is drawn here with jax.random (tiling-invariant) and applied inside the kernel.
    keep = jax.random.bernoulli(kdrop, 1.0 - DROPOUT_P, (B, 2, F))
    keep_mask = keep.astype(jnp.float32) * (1.0 / (1.0 - DROPOUT_P))

    out = siamese_forward(x, wc, bc, wh, bh, keep_mask)  # auto block_b (-> 8, nb = 2 here)
    jax.block_until_ready(out)
    assert out.shape == (B,)

    ref = _reference(x, wc, bc, wh, bh, keep_mask)
    assert jnp.allclose(out, ref, rtol=1e-3, atol=1e-4), (out, ref)
    print("KERNEL_OK")
</pallas_src>

<mosaic_0001>
module attributes {stable_mosaic.version = 11 : i64} {
  func.func @siamese_kernel(%arg0: i32, %arg1: memref<8x8x256xf32, #tpu.memory_space<vmem>>, %arg2: memref<32x4xf32, #tpu.memory_space<vmem>>, %arg3: memref<32x1xf32, #tpu.memory_space<vmem>>, %arg4: memref<4x32xf32, #tpu.memory_space<vmem>>, %arg5: memref<1x1xf32, #tpu.memory_space<vmem>>, %arg6: memref<8x2x32xf32, #tpu.memory_space<vmem>>, %arg7: memref<1x1x8xf32, #tpu.memory_space<vmem>>) attributes {dimension_semantics = [#tpu.dimension_semantics<parallel>], iteration_bounds = array<i64: 2>, scalar_prefetch = 0 : i64, scratch_operands = 0 : i64, tpu.core_type = #tpu.core_type<tc>, window_params = [{transform_indices = @transform_0, window_bounds = array<i64: 8, 8, 256>}, {pipeline_mode = #tpu.pipeline_mode<synchronous>, transform_indices = @transform_1, window_bounds = array<i64: 32, 4>}, {pipeline_mode = #tpu.pipeline_mode<synchronous>, transform_indices = @transform_2, window_bounds = array<i64: 32, 1>}, {pipeline_mode = #tpu.pipeline_mode<synchronous>, transform_indices = @transform_3, window_bounds = array<i64: 4, 32>}, {pipeline_mode = #tpu.pipeline_mode<synchronous>, transform_indices = @transform_4, window_bounds = array<i64: 1, 1>}, {transform_indices = @transform_5, window_bounds = array<i64: 8, 2, 32>}, {transform_indices = @transform_6, window_bounds = array<i64: 1, 1, 8>}]} {
    %c0 = arith.constant 0 : index
    %c0_0 = arith.constant 0 : index
    %c0_1 = arith.constant 0 : index
    %0 = vector.load %arg6[%c0, %c0_0, %c0_1] : memref<8x2x32xf32, #tpu.memory_space<vmem>>, vector<8x2x32xf32>
    %c0_2 = arith.constant 0 : index
    %c0_3 = arith.constant 0 : index
    %1 = vector.load %arg2[%c0_2, %c0_3] : memref<32x4xf32, #tpu.memory_space<vmem>>, vector<32x1xf32>
    %2 = vector.shape_cast %1 : vector<32x1xf32> to vector<1x32x1xf32>
    %c0_4 = arith.constant 0 : index
    %c1 = arith.constant 1 : index
    %3 = vector.load %arg2[%c0_4, %c1] : memref<32x4xf32, #tpu.memory_space<vmem>>, vector<32x1xf32>
    %4 = vector.shape_cast %3 : vector<32x1xf32> to vector<1x32x1xf32>
    %c0_5 = arith.constant 0 : index
    %c2 = arith.constant 2 : index
    %5 = vector.load %arg2[%c0_5, %c2] : memref<32x4xf32, #tpu.memory_space<vmem>>, vector<32x1xf32>
    %6 = vector.shape_cast %5 : vector<32x1xf32> to vector<1x32x1xf32>
    %c0_6 = arith.constant 0 : index
    %c3 = arith.constant 3 : index
    %7 = vector.load %arg2[%c0_6, %c3] : memref<32x4xf32, #tpu.memory_space<vmem>>, vector<32x1xf32>
    %8 = vector.shape_cast %7 : vector<32x1xf32> to vector<1x32x1xf32>
    %c0_7 = arith.constant 0 : index
    %c0_8 = arith.constant 0 : index
    %9 = vector.load %arg3[%c0_7, %c0_8] : memref<32x1xf32, #tpu.memory_space<vmem>>, vector<32x1xf32>
    %10 = vector.shape_cast %9 : vector<32x1xf32> to vector<1x32x1xf32>
    %c0_9 = arith.constant 0 : index
    %c0_10 = arith.constant 0 : index
    %c0_11 = arith.constant 0 : index
    %11 = vector.load %arg1[%c0_9, %c0_10, %c0_11] : memref<8x8x256xf32, #tpu.memory_space<vmem>>, vector<8x4x256xf32>
    %12 = vector.extract_strided_slice %11 {offsets = [0, 0, 0], sizes = [8, 1, 256], strides = [1, 1, 1]} : vector<8x4x256xf32> to vector<8x1x256xf32>
    %13 = vector.broadcast %2 : vector<1x32x1xf32> to vector<8x32x256xf32>
    %14 = vector.broadcast %12 : vector<8x1x256xf32> to vector<8x32x256xf32>
    %15 = arith.mulf %13, %14 : vector<8x32x256xf32>
    %16 = vector.extract_strided_slice %11 {offsets = [0, 1, 0], sizes = [8, 1, 256], strides = [1, 1, 1]} : vector<8x4x256xf32> to vector<8x1x256xf32>
    %17 = vector.broadcast %4 : vector<1x32x1xf32> to vector<8x32x256xf32>
    %18 = vector.broadcast %16 : vector<8x1x256xf32> to vector<8x32x256xf32>
    %19 = arith.mulf %17, %18 : vector<8x32x256xf32>
    %20 = arith.addf %15, %19 : vector<8x32x256xf32>
    %21 = vector.extract_strided_slice %11 {offsets = [0, 2, 0], sizes = [8, 1, 256], strides = [1, 1, 1]} : vector<8x4x256xf32> to vector<8x1x256xf32>
    %22 = vector.broadcast %6 : vector<1x32x1xf32> to vector<8x32x256xf32>
    %23 = vector.broadcast %21 : vector<8x1x256xf32> to vector<8x32x256xf32>
    %24 = arith.mulf %22, %23 : vector<8x32x256xf32>
    %25 = arith.addf %20, %24 : vector<8x32x256xf32>
    %26 = vector.extract_strided_slice %11 {offsets = [0, 3, 0], sizes = [8, 1, 256], strides = [1, 1, 1]} : vector<8x4x256xf32> to vector<8x1x256xf32>
    %27 = vector.broadcast %8 : vector<1x32x1xf32> to vector<8x32x256xf32>
    %28 = vector.broadcast %26 : vector<8x1x256xf32> to vector<8x32x256xf32>
    %29 = arith.mulf %27, %28 : vector<8x32x256xf32>
    %30 = arith.addf %25, %29 : vector<8x32x256xf32>
    %31 = vector.broadcast %10 : vector<1x32x1xf32> to vector<8x32x256xf32>
    %32 = arith.addf %30, %31 : vector<8x32x256xf32>
    %cst = arith.constant 9.99999997E-7 : f32
    %33 = vector.broadcast %cst : f32 to vector<8x32x256xf32>
    %34 = arith.maximumf %32, %33 : vector<8x32x256xf32>
    %35 = arith.mulf %34, %34 : vector<8x32x256xf32>
    %36 = arith.mulf %35, %34 : vector<8x32x256xf32>
    %cst_12 = arith.constant dense<0.000000e+00> : vector<8x32xf32>
    %37 = vector.multi_reduction <add>, %36, %cst_12 [2] : vector<8x32x256xf32> to vector<8x32xf32>
    %cst_13 = arith.constant 3.906250e-03 : f32
    %38 = vector.broadcast %cst_13 : f32 to vector<8x32xf32>
    %39 = arith.mulf %37, %38 : vector<8x32xf32>
    %40 = math.log %39 : vector<8x32xf32>
    %cst_14 = arith.constant 0.333333343 : f32
    %41 = vector.broadcast %cst_14 : f32 to vector<8x32xf32>
    %42 = arith.mulf %40, %41 : vector<8x32xf32>
    %43 = math.exp %42 : vector<8x32xf32>
    %44 = vector.extract_strided_slice %0 {offsets = [0, 0, 0], sizes = [8, 1, 32], strides = [1, 1, 1]} : vector<8x2x32xf32> to vector<8x1x32xf32>
    %45 = vector.shape_cast %44 : vector<8x1x32xf32> to vector<8x32xf32>
    %46 = arith.mulf %43, %45 : vector<8x32xf32>
    %c0_15 = arith.constant 0 : index
    %c4 = arith.constant 4 : index
    %c0_16 = arith.constant 0 : index
    %47 = vector.load %arg1[%c0_15, %c4, %c0_16] : memref<8x8x256xf32, #tpu.memory_space<vmem>>, vector<8x4x256xf32>
    %48 = vector.extract_strided_slice %47 {offsets = [0, 0, 0], sizes = [8, 1, 256], strides = [1, 1, 1]} : vector<8x4x256xf32> to vector<8x1x256xf32>
    %49 = vector.broadcast %2 : vector<1x32x1xf32> to vector<8x32x256xf32>
    %50 = vector.broadcast %48 : vector<8x1x256xf32> to vector<8x32x256xf32>
    %51 = arith.mulf %49, %50 : vector<8x32x256xf32>
    %52 = vector.extract_strided_slice %47 {offsets = [0, 1, 0], sizes = [8, 1, 256], strides = [1, 1, 1]} : vector<8x4x256xf32> to vector<8x1x256xf32>
    %53 = vector.broadcast %4 : vector<1x32x1xf32> to vector<8x32x256xf32>
    %54 = vector.broadcast %52 : vector<8x1x256xf32> to vector<8x32x256xf32>
    %55 = arith.mulf %53, %54 : vector<8x32x256xf32>
    %56 = arith.addf %51, %55 : vector<8x32x256xf32>
    %57 = vector.extract_strided_slice %47 {offsets = [0, 2, 0], sizes = [8, 1, 256], strides = [1, 1, 1]} : vector<8x4x256xf32> to vector<8x1x256xf32>
    %58 = vector.broadcast %6 : vector<1x32x1xf32> to vector<8x32x256xf32>
    %59 = vector.broadcast %57 : vector<8x1x256xf32> to vector<8x32x256xf32>
    %60 = arith.mulf %58, %59 : vector<8x32x256xf32>
    %61 = arith.addf %56, %60 : vector<8x32x256xf32>
    %62 = vector.extract_strided_slice %47 {offsets = [0, 3, 0], sizes = [8, 1, 256], strides = [1, 1, 1]} : vector<8x4x256xf32> to vector<8x1x256xf32>
    %63 = vector.broadcast %8 : vector<1x32x1xf32> to vector<8x32x256xf32>
    %64 = vector.broadcast %62 : vector<8x1x256xf32> to vector<8x32x256xf32>
    %65 = arith.mulf %63, %64 : vector<8x32x256xf32>
    %66 = arith.addf %61, %65 : vector<8x32x256xf32>
    %67 = vector.broadcast %10 : vector<1x32x1xf32> to vector<8x32x256xf32>
    %68 = arith.addf %66, %67 : vector<8x32x256xf32>
    %cst_17 = arith.constant 9.99999997E-7 : f32
    %69 = vector.broadcast %cst_17 : f32 to vector<8x32x256xf32>
    %70 = arith.maximumf %68, %69 : vector<8x32x256xf32>
    %71 = arith.mulf %70, %70 : vector<8x32x256xf32>
    %72 = arith.mulf %71, %70 : vector<8x32x256xf32>
    %cst_18 = arith.constant dense<0.000000e+00> : vector<8x32xf32>
    %73 = vector.multi_reduction <add>, %72, %cst_18 [2] : vector<8x32x256xf32> to vector<8x32xf32>
    %cst_19 = arith.constant 3.906250e-03 : f32
    %74 = vector.broadcast %cst_19 : f32 to vector<8x32xf32>
    %75 = arith.mulf %73, %74 : vector<8x32xf32>
    %76 = math.log %75 : vector<8x32xf32>
    %cst_20 = arith.constant 0.333333343 : f32
    %77 = vector.broadcast %cst_20 : f32 to vector<8x32xf32>
    %78 = arith.mulf %76, %77 : vector<8x32xf32>
    %79 = math.exp %78 : vector<8x32xf32>
    %80 = vector.extract_strided_slice %0 {offsets = [0, 1, 0], sizes = [8, 1, 32], strides = [1, 1, 1]} : vector<8x2x32xf32> to vector<8x1x32xf32>
    %81 = vector.shape_cast %80 : vector<8x1x32xf32> to vector<8x32xf32>
    %82 = arith.mulf %79, %81 : vector<8x32xf32>
    %83 = arith.addf %46, %82 : vector<8x32xf32>
    %84 = arith.subf %46, %82 : vector<8x32xf32>
    %85 = arith.mulf %84, %84 : vector<8x32xf32>
    %86 = arith.mulf %46, %82 : vector<8x32xf32>
    %c0_21 = arith.constant 0 : index
    %c0_22 = arith.constant 0 : index
    %87 = vector.load %arg4[%c0_21, %c0_22] : memref<4x32xf32, #tpu.memory_space<vmem>>, vector<4x32xf32>
    %88 = vector.extract_strided_slice %87 {offsets = [0, 0], sizes = [1, 32], strides = [1, 1]} : vector<4x32xf32> to vector<1x32xf32>
    %89 = vector.broadcast %88 : vector<1x32xf32> to vector<8x32xf32>
    %90 = arith.mulf %83, %89 : vector<8x32xf32>
    %91 = vector.extract_strided_slice %87 {offsets = [1, 0], sizes = [1, 32], strides = [1, 1]} : vector<4x32xf32> to vector<1x32xf32>
    %92 = vector.broadcast %91 : vector<1x32xf32> to vector<8x32xf32>
    %93 = arith.mulf %84, %92 : vector<8x32xf32>
    %94 = arith.addf %90, %93 : vector<8x32xf32>
    %95 = vector.extract_strided_slice %87 {offsets = [2, 0], sizes = [1, 32], strides = [1, 1]} : vector<4x32xf32> to vector<1x32xf32>
    %96 = vector.broadcast %95 : vector<1x32xf32> to vector<8x32xf32>
    %97 = arith.mulf %85, %96 : vector<8x32xf32>
    %98 = arith.addf %94, %97 : vector<8x32xf32>
    %99 = vector.extract_strided_slice %87 {offsets = [3, 0], sizes = [1, 32], strides = [1, 1]} : vector<4x32xf32> to vector<1x32xf32>
    %100 = vector.broadcast %99 : vector<1x32xf32> to vector<8x32xf32>
    %101 = arith.mulf %86, %100 : vector<8x32xf32>
    %102 = arith.addf %98, %101 : vector<8x32xf32>
    %cst_23 = arith.constant dense<0.000000e+00> : vector<8xf32>
    %103 = vector.multi_reduction <add>, %102, %cst_23 [1] : vector<8x32xf32> to vector<8xf32>
    %104 = vector.shape_cast %103 : vector<8xf32> to vector<8x1xf32>
    %c0_24 = arith.constant 0 : index
    %c0_25 = arith.constant 0 : index
    %105 = vector.load %arg5[%c0_24, %c0_25] : memref<1x1xf32, #tpu.memory_space<vmem>>, vector<1x1xf32>
    %106 = vector.broadcast %105 : vector<1x1xf32> to vector<8x1xf32>
    %107 = arith.addf %104, %106 : vector<8x1xf32>
    %108 = tpu.transpose %107, [1, 0] : vector<8x1xf32> -> vector<1x8xf32>
    %109 = vector.shape_cast %108 : vector<1x8xf32> to vector<1x1x8xf32>
    %c0_26 = arith.constant 0 : index
    %c0_27 = arith.constant 0 : index
    %c0_28 = arith.constant 0 : index
    %110 = vector.load %arg7[%c0_26, %c0_27, %c0_28] : memref<1x1x8xf32, #tpu.memory_space<vmem>>, vector<1x1x8xf32>
    tpu.vector_store %arg7[%c0_26, %c0_27, %c0_28], %109 {strides = array<i32>} : memref<1x1x8xf32, #tpu.memory_space<vmem>>, vector<1x1x8xf32>,
    return
  }
  func.func @transform_0(%arg0: i32) -> (i32, i32, i32) {
    %c0_i32 = arith.constant 0 : i32
    %c0_i32_0 = arith.constant 0 : i32
    %c0_i32_1 = arith.constant 0 : i32
    return %arg0, %c0_i32, %c0_i32_0 : i32, i32, i32
  }
  func.func @transform_1(%arg0: i32) -> (i32, i32) {
    %c0_i32 = arith.constant 0 : i32
    %c0_i32_0 = arith.constant 0 : i32
    %c0_i32_1 = arith.constant 0 : i32
    return %c0_i32, %c0_i32_0 : i32, i32
  }
  func.func @transform_2(%arg0: i32) -> (i32, i32) {
    %c0_i32 = arith.constant 0 : i32
    %c0_i32_0 = arith.constant 0 : i32
    %c0_i32_1 = arith.constant 0 : i32
    return %c0_i32, %c0_i32_0 : i32, i32
  }
  func.func @transform_3(%arg0: i32) -> (i32, i32) {
    %c0_i32 = arith.constant 0 : i32
    %c0_i32_0 = arith.constant 0 : i32
    %c0_i32_1 = arith.constant 0 : i32
    return %c0_i32, %c0_i32_0 : i32, i32
  }
  func.func @transform_4(%arg0: i32) -> (i32, i32) {
    %c0_i32 = arith.constant 0 : i32
    %c0_i32_0 = arith.constant 0 : i32
    %c0_i32_1 = arith.constant 0 : i32
    return %c0_i32, %c0_i32_0 : i32, i32
  }
  func.func @transform_5(%arg0: i32) -> (i32, i32, i32) {
    %c0_i32 = arith.constant 0 : i32
    %c0_i32_0 = arith.constant 0 : i32
    %c0_i32_1 = arith.constant 0 : i32
    return %arg0, %c0_i32, %c0_i32_0 : i32, i32, i32
  }
  func.func @transform_6(%arg0: i32) -> (i32, i32, i32) {
    %c0_i32 = arith.constant 0 : i32
    %c0_i32_0 = arith.constant 0 : i32
    %c0_i32_1 = arith.constant 0 : i32
    return %arg0, %c0_i32, %c0_i32_0 : i32, i32, i32
  }
}

</mosaic_0001>

<bundles_post_ra>
// kernel: tpu_custom_call.1
= control target key start
LH: loop header
LB: loop body
LE: loop exit
PB: predicated region body
PF: predicated region fallthrough
CT: control target
= control target key end

     0   :  { %s8311_s0 = inlined_call_operand.hbm [shape: f32[16,8,256], index: 0, kind: input, shape index: {}]   ;;  %s8312_s1 = inlined_call_operand.vmem [shape: f32[32,4], index: 1, kind: input, shape index: {}]   ;;  %s8313_s2 = inlined_call_operand.vmem [shape: f32[32,1], index: 2, kind: input, shape index: {}]   ;;  %s8314_s3 = inlined_call_operand.vmem [shape: f32[4,32], index: 3, kind: input, shape index: {}]   ;;  %s8315_s4 = inlined_call_operand.<no memory space> [shape: f32[1,1], index: 4, kind: input, shape index: {}]   ;;  %s8316_s5 = inlined_call_operand.vmem [shape: f32[16,2,32], index: 5, kind: input, shape index: {}]   ;;  %s8317_s6 = inlined_call_operand.hbm [shape: f32[2,1,8], index: 6, kind: output, shape index: {}]  }
   0x1   :  { %v11_v0 = vstv %s8315_s4 }
   0x2   :  { %12 = vst [vmem:[#allocation2] sm:$0x1] %v11_v0 }
   0x3   :  { %13 = vsyncpa [#allocation4], 0 }
   0x4   :  { %15 = vsyncpa [#allocation4 + $0x1], 0 }
   0x5   :  { %16 = vsyncpa [#allocation5], 0 }
   0x6   :  { %18 = vsyncpa [#allocation5 + $0x1], 0  ;;  %s4741_s23 = smov 0   ;;  %s4743_s24 = smov 0  }
   0x7   :  { %s4745_s25 = smov 0   ;;  %s4747_s26 = smov 0  }
   0x8 LB: > { %s4762_s4 = sadd.s32 4294967295, %s4693_s26   ;;  %s4256_s27 = sadd.s32 4294967294, %s4693_s26   ;;  %s4693_s26 = sphi %s4747_s26, %s8976_s26   ;;  %s4689_s25 = sphi %s4745_s25, %s8975_s25   ;;  %s4685_s24 = sphi %s4743_s24, %s8974_s24   ;;  %s4681_s23 = sphi %s4741_s23, %s8973_s23  }
   0x9   : > { %s4766_s28 = sadd.s32 1, %s4693_s26   ;;  %s31_s29 = sadd.s32 1, %s4689_s25 }
   0xa   : > { %s28_s30 = ssub.s32 %s4693_s26, %s4766_s28  ;;  %p38_p0 = scmp.ne.s32.totalorder %s4689_s25, %s4685_s24 }
   0xb   : > { %p29_p1 = scmp.eq.s32.totalorder %s28_s30, 0  ;;  %p39_p2 = scmp.eq.s32.totalorder %s4693_s26, 0 }
   0xc   : > { %p44_p3 = scmp.ne.s32.totalorder %s4685_s24, %s4681_s23  ;;  %p45_p4 = scmp.eq.s32.totalorder %s4762_s4, 0 }
   0xd   : > { %s4778_s7 = scalar_select %p29_p1, %s4689_s25, %s31_s29  }
   0xe   : > { %p4780_p5 = por %p39_p2, %p38_p0  ;;  %p4784_p6 = por %p45_p4, %p44_p3 }
   0xf   : > { %p178_p7 = scmp.eq.s32.totalorder %s4762_s4, 1  ;;  %p184_p8 = scmp.eq.s32.totalorder %s4256_s27, 1 }
  0x10   : > { %s8474_s9 = scalar_select %p4784_p6, 1, 0 }
  0x11   : > { %p4285_p10 = scmp.lt.s32.totalorder %s4693_s26, 2  ;;  %p4791_p11 = por %p178_p7, %p38_p0 }
  0x12   : > { %p4795_p12 = por %p184_p8, %p44_p3  ;;  %s216_s12 = sand.u32 1, %s4689_s25  }
  0x13   : > { %s8475_s10 = scalar_select %p4791_p11, 1, 0 }
  0x14   : > { %s8476_s11 = scalar_select %p4795_p12, 1, 0 }
  0x15   : > { %s4272_s13 = sshll.u32 %s4693_s26, 11  ;;  %s4259_s14 = sshll.u32 %s216_s12, 7 }
  0x16   : > { %s4804_s17 = scalar_lea.hbm %s8311_s0, %s4272_s13  ;;  %s220_s18 = scalar_lea.vmem [#allocation3], %s4259_s14 }
  0x17   : > { %s228_s19 = sshll.u32 %s220_s18, 4  ;;  %p4808_p13 = pnand %p4285_p10, %p4780_p5  ;;  %s4812_s19 = int_to_ptr.vmem [resolvable:$true] %s228_s19 }
  0x18   : > { %s4814_s21 = scalar_lea.sflag [#allocation4], %s216_s12  ;;  %s4601_s22 = scalar_lea.hbm %s4804_s17, 2048 }
  0x19   : > { %p4602_p0 = scmp.ne.s32.totalorder %s4804_s17, %s4601_s22  ;;  %p4603_p1 = pneg %p4808_p13 }
  0x1a   : > { %s4606_s30 = scalar_lea.hbm %s8311_s0, 4096  ;;  %p4607_p4 = scmp.lt.s32.totalorder %s4804_s17, %s8311_s0 }
  0x1b   : > { %p4604_p2 = pnand %p4603_p1, %p4602_p0  ;;  %p4608_p5 = scmp.lt.s32.totalorder %s4606_s30, %s4601_s22 }
  0x1d   : > { %p4605_p3 = pneg %p4604_p2  ;;  %p4609_p7 = por %p4608_p5, %p4607_p4 }
  0x1f   : > { %p4610_p8 = pnand %p4609_p7, %p4605_p3 }
  0x21   : > { %4613 = shalt.err (!%p4610_p8)
}
  0x22   : > { %s4614_s12 = scalar_lea.vmem %s4812_s19, 2048  ;;  %s4695_s14 = smov [#allocation3]  }
  0x23   : > { %p4615_p10 = scmp.ne.s32.totalorder %s4812_s19, %s4614_s12  ;;  %s4619_s15 = sshll.u32 %s4695_s14, 4  ;;  %s4620_s15 = int_to_ptr.vmem [resolvable:$false] %s4619_s15 }
  0x24   : > { %s4621_s16 = scalar_lea.vmem %s4620_s15, 4096  ;;  %p4622_p2 = scmp.lt.s32.totalorder %s4812_s19, %s4620_s15 }
  0x25   : > { %p4617_p9 = pnand %p4615_p10, %p4603_p1  ;;  %p4623_p12 = scmp.lt.s32.totalorder %s4621_s16, %s4614_s12 }
  0x27   : > { %p4618_p0 = pneg %p4617_p9  ;;  %p4624_p11 = por %p4623_p12, %p4622_p2 }
  0x29   : > { %p4625_p6 = pnand %p4624_p11, %p4618_p0 }
  0x2b   : > { %4628 = shalt.err (!%p4625_p6)
}
  0x2c   : > { %s4696_s18 = smov 256   ;;  %s4697_s22 = smov 16  }
  0x2d   : > { %4280 = dma.hbm_to_vmem [thread:$0]  (!%p4808_p13), %s4804_s17, 2048, %s4812_s19, %s4814_s21, %s4696_s18, %s4696_s18, %s4697_s22  }
  0x2e   : > { %p4263_p9 = scmp.ge.s32.totalorder %s4693_s26, 1  ;;  %p245_p1 = scmp.lt.s32.totalorder %s4693_s26, 3 }
  0x30   : > { %p246_p3 = pnand %p4263_p9, %p245_p1 }
  0x32   : > { %249 = sbr.rel (%p246_p3) target bundleno = 1328 (0x530), region = 44 }
  0x37   : > { %s4838_s27 = sand.u32 1, %s4685_s24   ;;  %p8478_p6 = scmp.ne.s32.totalorder %s8474_s9, 0 }
  0x38   : > { %s4264_s29 = sshll.u32 %s4838_s27, 7  ;;  %s252_s30 = scalar_lea.sflag [#allocation4], %s4838_s27 }
  0x39   : > { %s4842_s8 = scalar_lea.vmem [#allocation3], %s4264_s29 }
  0x3a   : > { %4672 = dma.done.wait (%p8478_p6), %s252_s30, 2048  }
  0x3b   : > { %4674 = vsyncadd (%p8478_p6), %s252_s30, 4294965248  ;;  %v4698_v1 = vmov 1   ;;  %v4699_v2 = vmov 0   ;;  %v305_v3 = vld [vmem:[%s8312_s1 + $0x10] sm:$0xff]  ;;  %v303_v4 = vld [vmem:[%s8312_s1] sm:$0xff]  ;;  %v4700_v7 = vmov 2   ;;  %v8320_v13 = vlaneseq }
  0x3c   : > { %4327 = vset.pattern.permute.xlu0 %v4698_v1  ;;  %4326 = vset.pattern.permute.xlu1 %v4699_v2  ;;  %v306_v5 = vld [vmem:[%s8312_s1 + $0x18] sm:$0xff]  ;;  %v304_v6 = vld [vmem:[%s8312_s1 + $0x8] sm:$0xff]  ;;  %v4701_v8 = vmov 3   ;;  %v307_v10 = vld [vmem:[%s8313_s2] sm:$0xff]  ;;  %s4265_s20 = sshll.u32 %s4762_s4, 3  ;;  %vm3955_vm0 = vcmask 130112  }
  0x3d   : > { %339 = vperm.xlu1 %4326, %v305_v3   ;;  %476 = vperm.xlu0 %4327, %v303_v4   ;;  %v308_v9 = vld [vmem:[%s8313_s2 + $0x8] sm:$0xff]  ;;  %v309_v11 = vld [vmem:[%s8313_s2 + $0x10] sm:$0xff]  ;;  %v310_v12 = vld [vmem:[%s8313_s2 + $0x18] sm:$0xff]  ;;  %v4873_v14 = vshrl.u32 %v8320_v13, 7  ;;  %p5868_p11 = scmp.lt.s32.totalorder %s4265_s20, 15  ;;  %vm3962_vm1 = vcmask 195712  }
  0x3e   : > { %v311_v16 = vld [vmem:[%s4842_s8] sm:$0xf]  ;;  %v312_v18 = vld [vmem:[%s4842_s8 + $0x8] sm:$0xf]  ;;  %v313_v19 = vld [vmem:[%s4842_s8 + $0x10] sm:$0xf] }
  0x3f   : > { %8479 = vst [vmem:[#allocation9_spill] sm:$0xff] %v4873_v14  ;;  %v4876_v15 = vsub.s32 0, %v4873_v14  ;;  %v4880_v17 = vsub.s32 1, %v4873_v14  ;;  %v314_v20 = vld [vmem:[%s4842_s8 + $0x18] sm:$0xf]  ;;  %v4889_v22 = vsub.s32 2, %v4873_v14 }
  0x40   : > { %v315_v23 = vld [vmem:[%s4842_s8 + $0x20] sm:$0xf]  ;;  %v316_v24 = vld [vmem:[%s4842_s8 + $0x28] sm:$0xf]  ;;  %v4903_v28 = vsub.s32 3, %v4873_v14  ;;  %s8978_s20 = smov (!%p5868_p11, %s4265_s20), 15 }
  0x41   : > { %344 = vperm.xlu1 %4326, %v306_v5   ;;  %488 = vperm.xlu0 %4327, %v306_v5   ;;  %8480 = vst [vmem:[#allocation10_spill] sm:$0xff] %v4876_v15  ;;  %8481 = vst [vmem:[#allocation11_spill] sm:$0xff] %v4880_v17  ;;  %v4886_v21 = vrot.slane %v311_v16, %v4876_v15  ;;  %v4894_v25 = vrot.slane %v312_v18, %v4876_v15  ;;  %v317_v41 = vld [vmem:[%s4842_s8 + $0x30] sm:$0xf]  ;;  %v318_v42 = vld [vmem:[%s4842_s8 + $0x38] sm:$0xf] }
  0x42   : > { %8482 = vst [vmem:[#allocation12_spill] sm:$0xff] %v4889_v22  ;;  %v4897_v26 = vrot.slane %v311_v16, %v4880_v17  ;;  %v4900_v27 = vrot.slane %v312_v18, %v4880_v17  ;;  %8483 = vst [vmem:[#allocation13_spill] sm:$0xff] %v4903_v28  ;;  %v4906_v29 = vrot.slane %v313_v19, %v4876_v15  ;;  %v319_v51 = vld [vmem:[%s4842_s8 + $0x40] sm:$0xf]  ;;  %v320_v52 = vld [vmem:[%s4842_s8 + $0x48] sm:$0xf] }
  0x43   : > { %v4909_v30 = vrot.slane %v314_v20, %v4876_v15  ;;  %v4912_v31 = vrot.slane %v313_v19, %v4880_v17  ;;  %v4915_v32 = vrot.slane %v314_v20, %v4880_v17  ;;  %v4918_v33 = vrot.slane %v315_v23, %v4876_v15  ;;  %v321_v61 = vld [vmem:[%s4842_s8 + $0x50] sm:$0xf]  ;;  %v322_v62 = vld [vmem:[%s4842_s8 + $0x58] sm:$0xf]  ;;  %s4266_s13 = sshll.u32 %s8978_s20, 1  ;;  %s4268_s16 = sshll.u32 %s4762_s4, 4 }
  0x44   : > { %v4921_v34 = vrot.slane %v316_v24, %v4876_v15  ;;  %v4924_v35 = vrot.slane %v315_v23, %v4880_v17  ;;  %v4927_v36 = vrot.slane %v316_v24, %v4880_v17  ;;  %v4930_v37 = vrot.slane %v311_v16, %v4889_v22  ;;  %s5902_s14 = scalar_lea.vmem %s8316_s5, %s4266_s13  ;;  %s287_s18 = scalar_lea.vmem [#allocation6], %s4838_s27 }
  0x45   : > { %4328 = vset.pattern.permute.xlu1 %v4698_v1  ;;  %4330 = vset.pattern.permute.xlu0 %v4700_v7  ;;  %v4933_v38 = vrot.slane %v312_v18, %v4889_v22  ;;  %v4936_v39 = vrot.slane %v313_v19, %v4889_v22  ;;  %v4939_v40 = vrot.slane %v314_v20, %v4889_v22  ;;  %vm3969_vm2 = vcmask 261312   ;;  %s4178_s22 = sshll.u32 %s287_s18, 4  ;;  %s8274_s17 = scalar_lea.hbm %s8317_s6, %s4268_s16  ;;  %s4179_s22 = int_to_ptr.vmem [resolvable:$true] %s4178_s22 }
  0x46   : > { %480 = vperm.xlu1 %4328, %v304_v6   ;;  %688 = vperm.xlu0 %4330, %v304_v6   ;;  %v4944_v43 = vrot.slane %v311_v16, %v4903_v28  ;;  %v4947_v44 = vrot.slane %v312_v18, %v4903_v28  ;;  %v4950_v45 = vrot.slane %v313_v19, %v4903_v28  ;;  %vm4104_vm3 = vcmask 1041409   ;;  %s4166_s19 = scalar_lea.sflag [#allocation5], %s4838_s27  ;;  %s4629_s20 = scalar_lea.vmem %s4179_s22, 16 }
  0x47   : > { %8484 = vst [vmem:[#allocation14_spill] sm:$0xff] %v4936_v39  ;;  %8485 = vst [vmem:[#allocation15_spill] sm:$0xff] %v4939_v40  ;;  %v4953_v46 = vrot.slane %v314_v20, %v4903_v28  ;;  %v4956_v47 = vrot.slane %v315_v23, %v4889_v22  ;;  %v4959_v48 = vrot.slane %v316_v24, %v4889_v22  ;;  %vm4106_vm4 = vcmask 1042434   ;;  %p4630_p12 = scmp.ne.s32.totalorder %s4179_s22, %s4629_s20  ;;  %p8970_p13 = scmp.ne.s32.totalorder %s8475_s10, 0 }
  0x48   : > { %v4962_v49 = vrot.slane %v315_v23, %v4903_v28  ;;  %v4965_v50 = vrot.slane %v316_v24, %v4903_v28  ;;  %v4970_v53 = vrot.slane %v317_v41, %v4876_v15  ;;  %v4973_v54 = vrot.slane %v318_v42, %v4876_v15  ;;  %s4702_s21 = smov [#allocation6]  }
  0x49   : > { %8486 = vst [vmem:[#allocation16_spill] sm:$0xff] %v4956_v47  ;;  %8487 = vst [vmem:[#allocation17_spill] sm:$0xff] %v4959_v48  ;;  %v4976_v55 = vrot.slane %v317_v41, %v4880_v17  ;;  %v4979_v56 = vrot.slane %v318_v42, %v4880_v17  ;;  %v4982_v57 = vrot.slane %v317_v41, %v4889_v22  ;;  %vm4108_vm5 = vcmask 1043459   ;;  %p4631_p4 = pnand %p4630_p12, %p8970_p13  ;;  %s4633_s13 = sshll.u32 %s4702_s21, 4  ;;  %s4634_s13 = int_to_ptr.vmem [resolvable:$false] %s4633_s13 }
  0x4a   : > { %484 = vperm.xlu1 %4328, %v305_v3   ;;  %4331 = vset.pattern.permute.xlu0 %v4701_v8  ;;  %8488 = vst [vmem:[#allocation18_spill] sm:$0xff] %v4962_v49  ;;  %8489 = vst [vmem:[#allocation19_spill] sm:$0xff] %v4965_v50  ;;  %v4985_v58 = vrot.slane %v318_v42, %v4889_v22  ;;  %v4988_v59 = vrot.slane %v317_v41, %v4903_v28  ;;  %vm4110_vm6 = vcmask 1044484   ;;  %vm4112_vm7 = vcmask 1045509   ;;  %s4635_s4 = scalar_lea.vmem %s4634_s13, 32  ;;  %p4636_p7 = scmp.lt.s32.totalorder %s4179_s22, %s4634_s13 }
  0x4b   : > { %892 = vperm.xlu0 %4331, %v303_v4   ;;  %8490 = vst [vmem:[#allocation20_spill] sm:$0xff] %v4970_v53  ;;  %8491 = vst [vmem:[#allocation21_spill] sm:$0xff] %v4973_v54  ;;  %v4991_v60 = vrot.slane %v318_v42, %v4903_v28  ;;  %v4996_v63 = vrot.slane %v319_v51, %v4876_v15  ;;  %v4999_v0 = vrot.slane %v320_v52, %v4876_v15  ;;  %vm4114_vm8 = vcmask 1046534   ;;  %p4632_p5 = pneg %p4631_p4  ;;  %p4637_p8 = scmp.lt.s32.totalorder %s4635_s4, %s4629_s20 }
  0x4c   : > { %8492 = vst [vmem:[#allocation22_spill] sm:$0xff] %v4976_v55  ;;  %8493 = vst [vmem:[#allocation23_spill] sm:$0xff] %v4979_v56  ;;  %v5002_v1 = vrot.slane %v319_v51, %v4880_v17  ;;  %v5034_v16 = vrot.slane %v321_v61, %v4889_v22  ;;  %v5037_v18 = vrot.slane %v322_v62, %v4889_v22  ;;  %vm4116_vm9 = vcmask 1047559  }
  0x4d   : > { %8494 = vst [vmem:[#allocation24_spill] sm:$0xff] %v4982_v57  ;;  %8495 = vst [vmem:[#allocation25_spill] sm:$0xff] %v4985_v58  ;;  %v5050_v41 = vrot.slane %v321_v61, %v4903_v28  ;;  %v5053_v42 = vrot.slane %v322_v62, %v4903_v28  ;;  %vm4119_vm10 = vcmask 261120   ;;  %vm4163_vm11 = vcmask 57344   ;;  %p4638_p10 = por %p4637_p8, %p4636_p7 }
  0x4e   : > { %4329 = vset.pattern.permute.xlu1 %v4700_v7  ;;  %8496 = vst [vmem:[#allocation26_spill] sm:$0xff] %v4988_v59  ;;  %8497 = vst [vmem:[#allocation27_spill] sm:$0xff] %v4991_v60  ;;  %v5016_v7 = vrot.slane %v319_v51, %v4903_v28 }
  0x4f   : > { %684 = vperm.xlu1 %4329, %v303_v4   ;;  %904 = vperm.xlu0 %4331, %v306_v5   ;;  %8498 = vst [vmem:[#allocation28_spill] sm:$0xff] %v4996_v63  ;;  %8499 = vst [vmem:[#allocation29_spill] sm:$0xff] %v4999_v0  ;;  %p4639_p0 = pnand %p4638_p10, %p4632_p5 }
  0x50   : > { %8500 = vst [vmem:[#allocation30_spill] sm:$0xff] %v5002_v1  ;;  %8504 = vst [vmem:[#allocation34_spill] sm:$0xff] %v5016_v7 }
  0x51   : > { %8510 = vst [vmem:[#allocation40_spill] sm:$0xff] %v5034_v16  ;;  %8511 = vst [vmem:[#allocation41_spill] sm:$0xff] %v5037_v18 }
  0x52   : > { %8516 = vst [vmem:[#allocation46_spill] sm:$0xff] %v5050_v41  ;;  %8517 = vst [vmem:[#allocation47_spill] sm:$0xff] %v5053_v42 }
  0x53   : > { %692 = vperm.xlu1 %4329, %v305_v3   ;;  %4333 = vset.pattern.permute.xlu0 %v4699_v2 }
  0x54   : > { %329 = vperm.xlu0 %4333, %v303_v4   ;;  %v324_v4 = vld [vmem:[%s4842_s8 + $0x68] sm:$0xf] }
  0x55   : > { %v5043_v20 = vrot.slane %v324_v4, %v4876_v15 }
  0x57   : > { %696 = vperm.xlu1 %4329, %v306_v5   ;;  %v5010_v5 = vrot.slane %v319_v51, %v4889_v22  ;;  %8513 = vst [vmem:[#allocation43_spill] sm:$0xff] %v5043_v20 }
  0x58   : > { %334 = vperm.xlu0 %4333, %v304_v6  }
  0x59   : > { %8502 = vst [vmem:[#allocation32_spill] sm:$0xff] %v5010_v5 }
  0x5b   : > { %4332 = vset.pattern.permute.xlu1 %v4701_v8  ;;  %v5019_v8 = vrot.slane %v320_v52, %v4903_v28 }
  0x5c   : > { %896 = vperm.xlu1 %4332, %v304_v6   ;;  %1106 = vperm.xlu0 %4333, %v308_v9   ;;  %v5013_v6 = vrot.slane %v320_v52, %v4889_v22  ;;  %v5022_v9 = vrot.slane %v321_v61, %v4876_v15 }
  0x5d   : > { %8505 = vst [vmem:[#allocation35_spill] sm:$0xff] %v5019_v8 }
  0x5e   : > { %8503 = vst [vmem:[#allocation33_spill] sm:$0xff] %v5013_v6  ;;  %8506 = vst [vmem:[#allocation36_spill] sm:$0xff] %v5022_v9 }
  0x60   : > { %900 = vperm.xlu1 %4332, %v305_v3   ;;  %v323_v3 = vld [vmem:[%s4842_s8 + $0x60] sm:$0xf] }
  0x61   : > { %v5040_v19 = vrot.slane %v323_v3, %v4876_v15  ;;  %v5056_v51 = vrot.slane %v323_v3, %v4880_v17 }
  0x63   : > { %8512 = vst [vmem:[#allocation42_spill] sm:$0xff] %v5040_v19  ;;  %8518 = vst [vmem:[#allocation48_spill] sm:$0xff] %v5056_v51 }
  0x64   : > { %4334 = vset.pattern.permute.xlu1 %v4699_v2  ;;  %v5005_v2 = vrot.slane %v320_v52, %v4880_v17  ;;  %v5059_v52 = vrot.slane %v324_v4, %v4880_v17 }
  0x65   : > { %1101 = vperm.xlu1 %4334, %v307_v10   ;;  %v5025_v10 = vrot.slane %v322_v62, %v4876_v15 }
  0x66   : > { %8501 = vst [vmem:[#allocation31_spill] sm:$0xff] %v5005_v2  ;;  %8519 = vst [vmem:[#allocation49_spill] sm:$0xff] %v5059_v52 }
  0x67   : > { %8507 = vst [vmem:[#allocation37_spill] sm:$0xff] %v5025_v10 }
  0x69   : > { %1111 = vperm.xlu1 %4334, %v309_v11   ;;  %v5028_v11 = vrot.slane %v321_v61, %v4880_v17 }
  0x6b   : > { %8508 = vst [vmem:[#allocation38_spill] sm:$0xff] %v5028_v11 }
  0x6d   : > { %1116 = vperm.xlu1 %4334, %v310_v12   ;;  %v5031_v12 = vrot.slane %v322_v62, %v4880_v17 }
  0x6f   : > { %8509 = vst [vmem:[#allocation39_spill] sm:$0xff] %v5031_v12 }
  0xb8   : > { %v5045_v23 = vpop.permute.xlu1 %339  ;;  %v5047_v24 = vpop.permute.xlu0 %476 }
  0xb9   : > { %8514 = vst [vmem:[#allocation44_spill] sm:$0xff] %v5045_v23  ;;  %8515 = vst [vmem:[#allocation45_spill] sm:$0xff] %v5047_v24  ;;  %v5063_v13 = vmul.f32 %v4897_v26, %v5047_v24  ;;  %v5067_v14 = vmul.f32 %v4900_v27, %v5047_v24  ;;  %v5071_v61 = vmul.f32 %v4912_v31, %v5047_v24 }
  0xba   : > { %v5075_v62 = vmul.f32 %v4915_v32, %v5047_v24  ;;  %v415_v3 = vmul.f32 %v4886_v21, %v5045_v23  ;;  %v416_v4 = vmul.f32 %v4894_v25, %v5045_v23  ;;  %v423_v17 = vmul.f32 %v4906_v29, %v5045_v23 }
  0xbb   : > { %8520 = vst [vmem:[#allocation50_spill] sm:$0xff] %v5071_v61  ;;  %v424_v15 = vmul.f32 %v4909_v30, %v5045_v23  ;;  %v5087_v28 = vmul.f32 %v4924_v35, %v5047_v24  ;;  %v5091_v22 = vmul.f32 %v4927_v36, %v5047_v24  ;;  %v5095_v52 = vmul.f32 %v4918_v33, %v5045_v23 }
  0xbc   : > { %8521 = vst [vmem:[#allocation51_spill] sm:$0xff] %v5075_v62  ;;  %v5099_v51 = vmul.f32 %v4921_v34, %v5045_v23  ;;  %v5101_v20 = vpop.permute.xlu1 %344  ;;  %v5103_v19 = vpop.permute.xlu0 %488  ;;  %v5107_v42 = vmul.f32 %v4976_v55, %v5047_v24  ;;  %v5111_v41 = vmul.f32 %v4979_v56, %v5047_v24  ;;  %v5115_v18 = vmul.f32 %v4970_v53, %v5045_v23 }
  0xbd   : > { %8522 = vst [vmem:[#allocation52_spill] sm:$0xff] %v5087_v28  ;;  %8523 = vst [vmem:[#allocation53_spill] sm:$0xff] %v5091_v22  ;;  %v5119_v16 = vmul.f32 %v4973_v54, %v5045_v23  ;;  %v417_v12 = vmul.f32 %v4886_v21, %v5101_v20  ;;  %v418_v11 = vmul.f32 %v4894_v25, %v5101_v20 }
  0xbe   : > { %8524 = vst [vmem:[#allocation54_spill] sm:$0xff] %v5101_v20  ;;  %8525 = vst [vmem:[#allocation55_spill] sm:$0xff] %v5103_v19  ;;  %v561_v10 = vmul.f32 %v4897_v26, %v5103_v19  ;;  %v562_v9 = vmul.f32 %v4900_v27, %v5103_v19  ;;  %v425_v8 = vmul.f32 %v4906_v29, %v5101_v20 }
  0xbf   : > { %8526 = vst [vmem:[#allocation56_spill] sm:$0xff] %v5107_v42  ;;  %8527 = vst [vmem:[#allocation57_spill] sm:$0xff] %v5111_v41  ;;  %v426_v7 = vmul.f32 %v4909_v30, %v5101_v20  ;;  %v569_v6 = vmul.f32 %v4912_v31, %v5103_v19  ;;  %v570_v5 = vmul.f32 %v4915_v32, %v5103_v19 }
  0xc0   : > { %v5137_v41 = vadd.f32 %v561_v10, %v417_v12  ;;  %v5139_v42 = vadd.f32 %v562_v9, %v418_v11  ;;  %v433_v54 = vmul.f32 %v4918_v33, %v5101_v20  ;;  %v434_v53 = vmul.f32 %v4921_v34, %v5101_v20 }
  0xc1   : > { %v5145_v22 = vadd.f32 %v569_v6, %v425_v8  ;;  %v5147_v28 = vadd.f32 %v570_v5, %v426_v7  ;;  %v577_v62 = vmul.f32 %v4924_v35, %v5103_v19  ;;  %v578_v61 = vmul.f32 %v4927_v36, %v5103_v19  ;;  %v5153_v10 = vpop.permute.xlu1 %480  ;;  %v5155_v9 = vpop.permute.xlu0 %688 }
  0xc2   : > { %8530 = vst [vmem:[#allocation60_spill] sm:$0xff] %v5153_v10  ;;  %8531 = vst [vmem:[#allocation61_spill] sm:$0xff] %v5155_v9  ;;  %v5159_v11 = vmul.f32 %v5002_v1, %v5047_v24  ;;  %v5163_v6 = vmul.f32 %v5005_v2, %v5047_v24  ;;  %v5167_v5 = vmul.f32 %v4996_v63, %v5045_v23 }
  0xc3   : > { %8528 = vst [vmem:[#allocation58_spill] sm:$0xff] %v5145_v22  ;;  %8529 = vst [vmem:[#allocation59_spill] sm:$0xff] %v5147_v28  ;;  %v5171_v7 = vmul.f32 %v4999_v0, %v5045_v23  ;;  %v5175_v8 = vmul.f32 %v4897_v26, %v5153_v10  ;;  %v5179_v12 = vmul.f32 %v4900_v27, %v5153_v10 }
  0xc4   : > { %8532 = vst [vmem:[#allocation62_spill] sm:$0xff] %v5159_v11  ;;  %8533 = vst [vmem:[#allocation63_spill] sm:$0xff] %v5163_v6  ;;  %v5183_v24 = vmul.f32 %v4930_v37, %v5155_v9  ;;  %v5187_v19 = vmul.f32 %v4933_v38, %v5155_v9  ;;  %v5191_v23 = vmul.f32 %v4912_v31, %v5153_v10 }
  0xc5   : > { %8534 = vst [vmem:[#allocation64_spill] sm:$0xff] %v5167_v5  ;;  %8535 = vst [vmem:[#allocation65_spill] sm:$0xff] %v5171_v7  ;;  %v5195_v20 = vmul.f32 %v4915_v32, %v5153_v10  ;;  %v5199_v7 = vmul.f32 %v4936_v39, %v5155_v9  ;;  %v5203_v5 = vmul.f32 %v4939_v40, %v5155_v9  ;;  %v5221_v0 = vpop.permute.xlu1 %484 }
  0xc6   : > { %v5207_v2 = vmul.f32 %v4924_v35, %v5153_v10  ;;  %v5211_v1 = vmul.f32 %v4927_v36, %v5153_v10  ;;  %v5215_v6 = vmul.f32 %v4956_v47, %v5155_v9  ;;  %v5219_v11 = vmul.f32 %v4959_v48, %v5155_v9  ;;  %8541 = vst [vmem:[#allocation71_spill] sm:$0xff] %v5221_v0  ;;  %v5235_v22 = vpop.permute.xlu0 %892 }
  0xc7   : > { %8536 = vst [vmem:[#allocation66_spill] sm:$0xff] %v5203_v5  ;;  %v5223_v63 = vadd.f32 %v577_v62, %v433_v54  ;;  %v5225_v28 = vadd.f32 %v578_v61, %v434_v53  ;;  %8546 = vst [vmem:[#allocation76_spill] sm:$0xff] %v5235_v22  ;;  %v559_v9 = vmul.f32 %v4897_v26, %v5221_v0 }
  0xc8   : > { %8537 = vst [vmem:[#allocation67_spill] sm:$0xff] %v5207_v2  ;;  %8538 = vst [vmem:[#allocation68_spill] sm:$0xff] %v5211_v1  ;;  %v5229_v2 = vmul.f32 %v4976_v55, %v5153_v10  ;;  %v5233_v1 = vmul.f32 %v4979_v56, %v5153_v10  ;;  %v567_v53 = vmul.f32 %v4912_v31, %v5221_v0 }
  0xc9   : > { %8539 = vst [vmem:[#allocation69_spill] sm:$0xff] %v5215_v6  ;;  %8540 = vst [vmem:[#allocation70_spill] sm:$0xff] %v5219_v11  ;;  %v560_v11 = vmul.f32 %v4900_v27, %v5221_v0  ;;  %v568_v54 = vmul.f32 %v4915_v32, %v5221_v0  ;;  %v5247_v61 = vmul.f32 %v4944_v43, %v5235_v22 }
  0xca   : > { %8542 = vst [vmem:[#allocation72_spill] sm:$0xff] %v5223_v63  ;;  %8543 = vst [vmem:[#allocation73_spill] sm:$0xff] %v5225_v28  ;;  %v5251_v62 = vmul.f32 %v4947_v44, %v5235_v22  ;;  %v5255_v26 = vmul.f32 %v4950_v45, %v5235_v22  ;;  %v5259_v27 = vmul.f32 %v4953_v46, %v5235_v22  ;;  %v5273_v5 = vpop.permute.xlu1 %684 }
  0xcb   : > { %8544 = vst [vmem:[#allocation74_spill] sm:$0xff] %v5229_v2  ;;  %8545 = vst [vmem:[#allocation75_spill] sm:$0xff] %v5233_v1  ;;  %v623_v31 = vadd.f32 %v559_v9, %v415_v3  ;;  %v624_v10 = vadd.f32 %v560_v11, %v416_v4  ;;  %v631_v1 = vadd.f32 %v567_v53, %v423_v17  ;;  %v5275_v3 = vpop.permute.xlu0 %904 }
  0xcc   : > { %v632_v32 = vadd.f32 %v568_v54, %v424_v15  ;;  %v5263_v2 = vmul.f32 %v4962_v49, %v5235_v22  ;;  %v5267_v28 = vmul.f32 %v4965_v50, %v5235_v22  ;;  %v575_v63 = vmul.f32 %v4924_v35, %v5221_v0  ;;  %8547 = vst [vmem:[#allocation77_spill] sm:$0xff] %v5273_v5 }
  0xcd   : > { %v576_v6 = vmul.f32 %v4927_v36, %v5221_v0  ;;  %8548 = vst [vmem:[#allocation78_spill] sm:$0xff] %v5275_v3  ;;  %v5279_v15 = vmul.f32 %v4988_v59, %v5235_v22  ;;  %v5283_v17 = vmul.f32 %v4991_v60, %v5235_v22  ;;  %v583_v4 = vmul.f32 %v4976_v55, %v5221_v0 }
  0xce   : > { %v584_v35 = vmul.f32 %v4979_v56, %v5221_v0  ;;  %v763_v36 = vmul.f32 %v4930_v37, %v5273_v5  ;;  %v764_v9 = vmul.f32 %v4933_v38, %v5273_v5  ;;  %v771_v11 = vmul.f32 %v4936_v39, %v5273_v5 }
  0xcf   : > { %8549 = vst [vmem:[#allocation79_spill] sm:$0xff] %v5279_v15  ;;  %8550 = vst [vmem:[#allocation80_spill] sm:$0xff] %v5283_v17  ;;  %v772_v53 = vmul.f32 %v4939_v40, %v5273_v5  ;;  %v977_v54 = vmul.f32 %v4944_v43, %v5275_v3  ;;  %v978_v55 = vmul.f32 %v4947_v44, %v5275_v3  ;;  %v5323_v15 = vpop.permute.xlu1 %692 }
  0xd0   : > { %v5303_v56 = vmul.f32 %v4956_v47, %v5273_v5  ;;  %v5307_v0 = vmul.f32 %v4959_v48, %v5273_v5  ;;  %v5310_v22 = vadd.f32 %v575_v63, %v5095_v52  ;;  %v5313_v60 = vadd.f32 %v576_v6, %v5099_v51  ;;  %8555 = vst [vmem:[#allocation85_spill] sm:$0xff] %v5323_v15  ;;  %v5339_v6 = vpop.permute.xlu0 %329 }
  0xd1   : > { %v5317_v59 = vmul.f32 %v4950_v45, %v5275_v3  ;;  %v5321_v17 = vmul.f32 %v4953_v46, %v5275_v3  ;;  %v5327_v50 = vmul.f32 %v4982_v57, %v5273_v5  ;;  %v5331_v63 = vmul.f32 %v4985_v58, %v5273_v5  ;;  %8560 = vst [vmem:[#allocation90_spill] sm:$0xff] %v5339_v6 }
  0xd2   : > { %8551 = vst [vmem:[#allocation81_spill] sm:$0xff] %v5310_v22  ;;  %8552 = vst [vmem:[#allocation82_spill] sm:$0xff] %v5313_v60  ;;  %v5334_v51 = vadd.f32 %v583_v4, %v5115_v18  ;;  %v5337_v52 = vadd.f32 %v584_v35, %v5119_v16  ;;  %v767_v3 = vmul.f32 %v4930_v37, %v5323_v15  ;;  %v8563_v60 = vld [vmem:[#allocation51_spill] sm:$0xff] }
  0xd3   : > { %8553 = vst [vmem:[#allocation83_spill] sm:$0xff] %v5317_v59  ;;  %8554 = vst [vmem:[#allocation84_spill] sm:$0xff] %v5321_v17  ;;  %v768_v17 = vmul.f32 %v4933_v38, %v5323_v15  ;;  %v775_v57 = vmul.f32 %v4936_v39, %v5323_v15  ;;  %v776_v5 = vmul.f32 %v4939_v40, %v5323_v15  ;;  %v8562_v39 = vld [vmem:[#allocation50_spill] sm:$0xff] }
  0xd4   : > { %8556 = vst [vmem:[#allocation86_spill] sm:$0xff] %v5327_v50  ;;  %8557 = vst [vmem:[#allocation87_spill] sm:$0xff] %v5331_v63  ;;  %v411_v18 = vmul.f32 %v4886_v21, %v5339_v6  ;;  %v412_v16 = vmul.f32 %v4894_v25, %v5339_v6  ;;  %v419_v4 = vmul.f32 %v4906_v29, %v5339_v6  ;;  %v5357_v50 = vpop.permute.xlu1 %696  ;;  %v5363_v48 = vpop.permute.xlu0 %334 }
  0xd5   : > { %8558 = vst [vmem:[#allocation88_spill] sm:$0xff] %v5334_v51  ;;  %8559 = vst [vmem:[#allocation89_spill] sm:$0xff] %v5337_v52  ;;  %v420_v35 = vmul.f32 %v4909_v30, %v5339_v6  ;;  %v831_v52 = vadd.f32 %v767_v3, %v623_v31  ;;  %v832_v51 = vadd.f32 %v768_v17, %v624_v10 }
  0xd6   : > { %v839_v58 = vadd.f32 %v775_v57, %v631_v1  ;;  %v840_v63 = vadd.f32 %v776_v5, %v632_v32  ;;  %8561 = vst [vmem:[#allocation91_spill] sm:$0xff] %v5357_v50  ;;  %v619_v59 = vadd.f32 %v5063_v13, %v411_v18  ;;  %v620_v40 = vadd.f32 %v5067_v14, %v412_v16 }
  0xd7   : > { %v627_v49 = vadd.f32 %v8562_v39, %v419_v4  ;;  %v628_v22 = vadd.f32 %v8563_v60, %v420_v35  ;;  %8564 = vst [vmem:[#allocation50_spill] sm:$0xff] %v5363_v48  ;;  %v769_v47 = vmul.f32 %v4930_v37, %v5357_v50  ;;  %v770_v10 = vmul.f32 %v4933_v38, %v5357_v50 }
  0xd8   : > { %v427_v57 = vmul.f32 %v4918_v33, %v5339_v6  ;;  %v428_v13 = vmul.f32 %v4921_v34, %v5339_v6  ;;  %v413_v14 = vmul.f32 %v4886_v21, %v5363_v48  ;;  %v414_v39 = vmul.f32 %v4894_v25, %v5363_v48  ;;  %v5383_v21 = vpop.permute.xlu1 %896 }
  0xd9   : > { %v827_v60 = vadd.f32 %v763_v36, %v619_v59  ;;  %v828_v1 = vadd.f32 %v764_v9, %v620_v40  ;;  %v835_v5 = vadd.f32 %v771_v11, %v627_v49  ;;  %v836_v31 = vadd.f32 %v772_v53, %v628_v22  ;;  %8565 = vst [vmem:[#allocation51_spill] sm:$0xff] %v5383_v21  ;;  %v5409_v9 = vpop.permute.xlu0 %1106 }
  0xda   : > { %v833_v37 = vadd.f32 %v769_v47, %v5137_v41  ;;  %v834_v38 = vadd.f32 %v770_v10, %v5139_v42  ;;  %v621_v32 = vadd.f32 %v5175_v8, %v413_v14  ;;  %v622_v3 = vadd.f32 %v5179_v12, %v414_v39  ;;  %v8566_v8 = vld [vmem:[#allocation52_spill] sm:$0xff] }
  0xdb   : > { %v1035_v17 = vadd.f32 %v5247_v61, %v827_v60  ;;  %v1036_v18 = vadd.f32 %v5251_v62, %v828_v1  ;;  %v1043_v25 = vadd.f32 %v5255_v26, %v835_v5  ;;  %v1044_v40 = vadd.f32 %v5259_v27, %v836_v31  ;;  %v8567_v61 = vld [vmem:[#allocation53_spill] sm:$0xff]  ;;  %8568 = vst [vmem:[#allocation52_spill] sm:$0xff] %v5409_v9  ;;  %v8570_v5 = vld [vmem:[#allocation66_spill] sm:$0xff] }
  0xdc   : > { %v5387_v49 = vadd.f32 %v977_v54, %v833_v37  ;;  %v5389_v22 = vadd.f32 %v978_v55, %v834_v38  ;;  %v829_v47 = vadd.f32 %v5183_v24, %v621_v32  ;;  %v830_v59 = vadd.f32 %v5187_v19, %v622_v3  ;;  %v5411_v11 = vpop.permute.xlu1 %900 }
  0xdd   : > { %v973_v41 = vmul.f32 %v4944_v43, %v5383_v21  ;;  %v974_v42 = vmul.f32 %v4947_v44, %v5383_v21  ;;  %v635_v12 = vadd.f32 %v8566_v8, %v427_v57  ;;  %v636_v62 = vadd.f32 %v8567_v61, %v428_v13  ;;  %8569 = vst [vmem:[#allocation53_spill] sm:$0xff] %v5411_v11 }
  0xde   : > { %v421_v26 = vmul.f32 %v4906_v29, %v5363_v48  ;;  %v422_v55 = vmul.f32 %v4909_v30, %v5363_v48  ;;  %v981_v19 = vmul.f32 %v4950_v45, %v5383_v21  ;;  %v5407_v36 = vmul.f32 %v4953_v46, %v5383_v21 }
  0xdf   : > { %v1037_v27 = vadd.f32 %v973_v41, %v829_v47  ;;  %v1038_v24 = vadd.f32 %v974_v42, %v830_v59  ;;  %v843_v53 = vadd.f32 %v5303_v56, %v635_v12  ;;  %v844_v29 = vadd.f32 %v5307_v0, %v636_v62 }
  0xe0   : > { %v629_v54 = vadd.f32 %v5191_v23, %v421_v26  ;;  %v630_v30 = vadd.f32 %v5195_v20, %v422_v55  ;;  %v975_v35 = vmul.f32 %v4944_v43, %v5411_v11  ;;  %v976_v10 = vmul.f32 %v4947_v44, %v5411_v11  ;;  %v5431_v31 = vpop.permute.xlu1 %1101 }
  0xe1   : > { %v1121_v16 = vadd.f32 %v5409_v9, %v1037_v27  ;;  %v1122_v4 = vadd.f32 %v5409_v9, %v1038_v24  ;;  %v983_v57 = vmul.f32 %v4950_v45, %v5411_v11  ;;  %v984_v56 = vmul.f32 %v4953_v46, %v5411_v11  ;;  %8571 = vst [vmem:[#allocation66_spill] sm:$0xff] %v5431_v31  ;;  %v8572_v46 = vld [vmem:[#allocation16_spill] sm:$0xff] }
  0xe2   : > { %v1051_v0 = vadd.f32 %v5263_v2, %v843_v53  ;;  %v1052_v20 = vadd.f32 %v5267_v28, %v844_v29  ;;  %v1039_v14 = vadd.f32 %v975_v35, %v831_v52  ;;  %v1040_v39 = vadd.f32 %v976_v10, %v832_v51  ;;  %v8573_v28 = vld [vmem:[#allocation17_spill] sm:$0xff] }
  0xe3   : > { %v1185_v23 = vmax.f32 %v1121_v16, 1e-06  ;;  %v1186_v13 = vmax.f32 %v1122_v4, 1e-06  ;;  %v1047_v60 = vadd.f32 %v983_v57, %v839_v58  ;;  %v1048_v1 = vadd.f32 %v984_v56, %v840_v63 }
  0xe4   : > { %v837_v43 = vadd.f32 %v5199_v7, %v629_v54  ;;  %v838_v44 = vadd.f32 %v8570_v5, %v630_v30  ;;  %v5435_v38 = vmul.f32 %v8572_v46, %v5323_v15  ;;  %v5439_v2 = vmul.f32 %v8573_v28, %v5323_v15  ;;  %v5447_v12 = vpop.permute.xlu1 %1111 }
  0xe5   : > { %v1249_v45 = vmul.f32 %v1185_v23, %v1185_v23  ;;  %v1250_v37 = vmul.f32 %v1186_v13, %v1186_v13  ;;  %v1119_v51 = vadd.f32 %v5431_v31, %v1035_v17  ;;  %v1120_v58 = vadd.f32 %v5431_v31, %v1036_v18 }
  0xe6   : > { %v1127_v7 = vadd.f32 %v5431_v31, %v1043_v25  ;;  %v1128_v63 = vadd.f32 %v5431_v31, %v1044_v40  ;;  %v1135_v3 = vadd.f32 %v5431_v31, %v1051_v0  ;;  %v1136_v47 = vadd.f32 %v5431_v31, %v1052_v20 }
  0xe7   : > { %v1313_v52 = vmul.f32 %v1249_v45, %v1185_v23  ;;  %v1314_v32 = vmul.f32 %v1250_v37, %v1186_v13  ;;  %v1183_v59 = vmax.f32 %v1119_v51, 1e-06  ;;  %v1184_v41 = vmax.f32 %v1120_v58, 1e-06 }
  0xe8   : > { %v1191_v42 = vmax.f32 %v1127_v7, 1e-06  ;;  %v1045_v8 = vadd.f32 %v981_v19, %v837_v43  ;;  %v1192_v17 = vmax.f32 %v1128_v63, 1e-06  ;;  %v1199_v62 = vmax.f32 %v1135_v3, 1e-06  ;;  %v5453_v4 = vpop.permute.xlu1 %1116 }
  0xe9   : > { %v1378_v61 = vadd.f32 %v1314_v32, %v1313_v52  ;;  %v1200_v18 = vmax.f32 %v1136_v47, 1e-06  ;;  %v1247_v26 = vmul.f32 %v1183_v59, %v1183_v59  ;;  %v1248_v25 = vmul.f32 %v1184_v41, %v1184_v41  ;;  %8574 = vst [vmem:[#allocation16_spill] sm:$0xff] %v5453_v4 }
  0xea   : > { %v1255_v55 = vmul.f32 %v1191_v42, %v1191_v42  ;;  %v1123_v40 = vadd.f32 %v5447_v12, %v1039_v14  ;;  %v1256_v27 = vmul.f32 %v1192_v17, %v1192_v17  ;;  %v1124_v24 = vadd.f32 %v5447_v12, %v1040_v39 }
  0xeb   : > { %1379 = vadd.xlane.f32.xlu1 %v1378_v61  ;;  %v1131_v53 = vadd.f32 %v5447_v12, %v1047_v60  ;;  %v1132_v29 = vadd.f32 %v5447_v12, %v1048_v1  ;;  %v1311_v19 = vmul.f32 %v1247_v26, %v1183_v59  ;;  %v1312_v54 = vmul.f32 %v1248_v25, %v1184_v41  ;;  %v8575_v26 = vld [vmem:[#allocation81_spill] sm:$0xff] }
  0xec   : > { %v1319_v30 = vmul.f32 %v1255_v55, %v1191_v42  ;;  %v1187_v16 = vmax.f32 %v1123_v40, 1e-06  ;;  %v1320_v35 = vmul.f32 %v1256_v27, %v1192_v17  ;;  %v1188_v10 = vmax.f32 %v1124_v24, 1e-06  ;;  %v8576_v27 = vld [vmem:[#allocation82_spill] sm:$0xff] }
  0xed   : > { %v1195_v57 = vmax.f32 %v1131_v53, 1e-06  ;;  %v1196_v56 = vmax.f32 %v1132_v29, 1e-06  ;;  %v1375_v0 = vadd.f32 %v1312_v54, %v1311_v19  ;;  %v1125_v23 = vadd.f32 %v5453_v4, %v5387_v49  ;;  %v8579_v29 = vld [vmem:[#allocation14_spill] sm:$0xff] }
  0xee   : > { %v1251_v20 = vmul.f32 %v1187_v16, %v1187_v16  ;;  %v1126_v13 = vadd.f32 %v5453_v4, %v5389_v22  ;;  %v1387_v14 = vadd.f32 %v1320_v35, %v1319_v30  ;;  %v1252_v39 = vmul.f32 %v1188_v10, %v1188_v10  ;;  %v8580_v30 = vld [vmem:[#allocation15_spill] sm:$0xff]  ;;  %v8581_v35 = vld [vmem:[#allocation20_spill] sm:$0xff] }
  0xef   : > { %v1259_v60 = vmul.f32 %v1195_v57, %v1195_v57  ;;  %v1260_v1 = vmul.f32 %v1196_v56, %v1196_v56  ;;  %1376 = vadd.xlane.f32.xlu0 %v1375_v0  ;;  %v1189_v5 = vmax.f32 %v1125_v23, 1e-06  ;;  %v1263_v37 = vmul.f32 %v1199_v62, %v1199_v62 }
  0xf0   : > { %v1315_v43 = vmul.f32 %v1251_v20, %v1187_v16  ;;  %v1190_v45 = vmax.f32 %v1126_v13, 1e-06  ;;  %1388 = vadd.xlane.f32.xlu1 %v1387_v14  ;;  %v1316_v51 = vmul.f32 %v1252_v39, %v1188_v10  ;;  %v1264_v63 = vmul.f32 %v1200_v18, %v1200_v18  ;;  %v8583_v20 = vld [vmem:[#allocation21_spill] sm:$0xff]  ;;  %v8584_v39 = vld [vmem:[#allocation59_spill] sm:$0xff] }
  0xf1   : > { %v1323_v58 = vmul.f32 %v1259_v60, %v1195_v57  ;;  %v1324_v7 = vmul.f32 %v1260_v1, %v1196_v56  ;;  %v1253_v52 = vmul.f32 %v1189_v5, %v1189_v5  ;;  %v1327_v49 = vmul.f32 %v1263_v37, %v1199_v62  ;;  %v8582_v56 = vld [vmem:[#allocation58_spill] sm:$0xff]  ;;  %v8586_v37 = vld [vmem:[#allocation56_spill] sm:$0xff] }
  0xf2   : > { %v1254_v32 = vmul.f32 %v1190_v45, %v1190_v45  ;;  %v1046_v3 = vadd.f32 %v5407_v36, %v838_v44  ;;  %v1381_v22 = vadd.f32 %v1316_v51, %v1315_v43  ;;  %v1328_v59 = vmul.f32 %v1264_v63, %v1200_v18  ;;  %v8577_v36 = vld [vmem:[#allocation18_spill] sm:$0xff] }
  0xf3   : > { %v1393_v47 = vadd.f32 %v1324_v7, %v1323_v58  ;;  %v1129_v41 = vadd.f32 %v5409_v9, %v1045_v8  ;;  %v1317_v42 = vmul.f32 %v1253_v52, %v1189_v5  ;;  %v847_v25 = vadd.f32 %v5435_v38, %v8575_v26  ;;  %v8578_v8 = vld [vmem:[#allocation19_spill] sm:$0xff]  ;;  %v8587_v7 = vld [vmem:[#allocation84_spill] sm:$0xff]  ;;  %v8588_v52 = vld [vmem:[#allocation57_spill] sm:$0xff] }
  0xf4   : > { %v1318_v61 = vmul.f32 %v1254_v32, %v1190_v45  ;;  %v1130_v17 = vadd.f32 %v5409_v9, %v1046_v3  ;;  %1382 = vadd.xlane.f32.xlu0 %v1381_v22  ;;  %v1399_v55 = vadd.f32 %v1328_v59, %v1327_v49  ;;  %v848_v62 = vadd.f32 %v5439_v2, %v8576_v27  ;;  %v8585_v5 = vld [vmem:[#allocation83_spill] sm:$0xff]  ;;  %v8589_v59 = vld [vmem:[#allocation86_spill] sm:$0xff] }
  0xf5   : > { %1394 = vadd.xlane.f32.xlu1 %v1393_v47  ;;  %v1193_v40 = vmax.f32 %v1129_v41, 1e-06  ;;  %v991_v44 = vmul.f32 %v8577_v36, %v5411_v11  ;;  %v992_v53 = vmul.f32 %v8578_v8, %v5411_v11  ;;  %v777_v19 = vmul.f32 %v8579_v29, %v5357_v50  ;;  %v8591_v27 = vld [vmem:[#allocation79_spill] sm:$0xff] }
  0xf6   : > { %v1384_v18 = vadd.f32 %v1318_v61, %v1317_v42  ;;  %v1194_v24 = vmax.f32 %v1130_v17, 1e-06  ;;  %v778_v16 = vmul.f32 %v8580_v30, %v5357_v50  ;;  %v435_v10 = vmul.f32 %v8581_v35, %v5339_v6  ;;  %v8590_v17 = vld [vmem:[#allocation87_spill] sm:$0xff] }
  0xf7   : > { %v1257_v54 = vmul.f32 %v1193_v40, %v1193_v40  ;;  %v1055_v38 = vadd.f32 %v991_v44, %v847_v25  ;;  %v1056_v57 = vadd.f32 %v992_v53, %v848_v62  ;;  %v841_v0 = vadd.f32 %v777_v19, %v8582_v56  ;;  %v8593_v53 = vld [vmem:[#allocation80_spill] sm:$0xff]  ;;  %v8596_v56 = vld [vmem:[#allocation70_spill] sm:$0xff] }
  0xf8   : > { %v1258_v2 = vmul.f32 %v1194_v24, %v1194_v24  ;;  %v436_v23 = vmul.f32 %v8583_v20, %v5339_v6  ;;  %1385 = vadd.xlane.f32.xlu0 %v1384_v18  ;;  %v842_v60 = vadd.f32 %v778_v16, %v8584_v39  ;;  %v643_v51 = vadd.f32 %v8586_v37, %v435_v10  ;;  %v8594_v19 = vld [vmem:[#allocation68_spill] sm:$0xff]  ;;  %v8595_v10 = vld [vmem:[#allocation69_spill] sm:$0xff] }
  0xf9   : > { %1400 = vadd.xlane.f32.xlu1 %v1399_v55  ;;  %v1321_v13 = vmul.f32 %v1257_v54, %v1193_v40  ;;  %v1139_v14 = vadd.f32 %v5447_v12, %v1055_v38  ;;  %v1140_v43 = vadd.f32 %v5447_v12, %v1056_v57  ;;  %v1049_v45 = vadd.f32 %v8585_v5, %v841_v0 }
  0xfa   : > { %v1322_v1 = vmul.f32 %v1258_v2, %v1194_v24  ;;  %v1050_v63 = vadd.f32 %v8587_v7, %v842_v60  ;;  %v644_v32 = vadd.f32 %v8588_v52, %v436_v23  ;;  %v429_v49 = vmul.f32 %v4918_v33, %v5363_v48  ;;  %v8592_v33 = vld [vmem:[#allocation67_spill] sm:$0xff]  ;;  %v8598_v7 = vld [vmem:[#allocation25_spill] sm:$0xff]  ;;  %v8599_v52 = vld [vmem:[#allocation26_spill] sm:$0xff] }
  0xfb   : > { %v1203_v58 = vmax.f32 %v1139_v14, 1e-06  ;;  %v1204_v22 = vmax.f32 %v1140_v43, 1e-06  ;;  %v1133_v47 = vadd.f32 %v5453_v4, %v1049_v45  ;;  %v851_v41 = vadd.f32 %v8589_v59, %v643_v51  ;;  %v8597_v45 = vld [vmem:[#allocation24_spill] sm:$0xff] }
  0xfc   : > { %v1390_v3 = vadd.f32 %v1322_v1, %v1321_v13  ;;  %v1134_v61 = vadd.f32 %v5453_v4, %v1050_v63  ;;  %v852_v26 = vadd.f32 %v8590_v17, %v644_v32  ;;  %v430_v25 = vmul.f32 %v4921_v34, %v5363_v48 }
  0xfd   : > { %v1267_v42 = vmul.f32 %v1203_v58, %v1203_v58  ;;  %v1268_v55 = vmul.f32 %v1204_v22, %v1204_v22  ;;  %v1197_v40 = vmax.f32 %v1133_v47, 1e-06  ;;  %v1059_v62 = vadd.f32 %v8591_v27, %v851_v41  ;;  %v8600_v47 = vld [vmem:[#allocation88_spill] sm:$0xff] }
  0xfe   : > { %1391 = vadd.xlane.f32.xlu0 %v1390_v3  ;;  %v637_v44 = vadd.f32 %v8592_v33, %v429_v49  ;;  %v1198_v24 = vmax.f32 %v1134_v61, 1e-06  ;;  %v1060_v29 = vadd.f32 %v8593_v53, %v852_v26  ;;  %v638_v54 = vadd.f32 %v8594_v19, %v430_v25  ;;  %v8601_v61 = vld [vmem:[#allocation89_spill] sm:$0xff]  ;;  %v8602_v26 = vld [vmem:[#allocation27_spill] sm:$0xff] }
  0xff   : > { %v1331_v18 = vmul.f32 %v1267_v42, %v1203_v58  ;;  %v1332_v38 = vmul.f32 %v1268_v55, %v1204_v22  ;;  %v1261_v30 = vmul.f32 %v1197_v40, %v1197_v40  ;;  %v1143_v16 = vadd.f32 %v5431_v31, %v1059_v62 }
 0x100   : > { %v845_v2 = vadd.f32 %v8595_v10, %v637_v44  ;;  %v1262_v34 = vmul.f32 %v1198_v24, %v1198_v24  ;;  %v1144_v57 = vadd.f32 %v5431_v31, %v1060_v29  ;;  %v846_v0 = vadd.f32 %v8596_v56, %v638_v54 }
 0x101   : > { %v989_v23 = vmul.f32 %v8577_v36, %v5383_v21  ;;  %v1405_v13 = vadd.f32 %v1332_v38, %v1331_v18  ;;  %v1325_v14 = vmul.f32 %v1261_v30, %v1197_v40  ;;  %v1207_v39 = vmax.f32 %v1143_v16, 1e-06  ;;  %v8604_v38 = vld [vmem:[#allocation72_spill] sm:$0xff] }
 0x102   : > { %v990_v60 = vmul.f32 %v8578_v8, %v5383_v21  ;;  %v1326_v1 = vmul.f32 %v1262_v34, %v1198_v24  ;;  %v1208_v43 = vmax.f32 %v1144_v57, 1e-06  ;;  %v791_v37 = vmul.f32 %v8597_v45, %v5323_v15  ;;  %v8603_v24 = vld [vmem:[#allocation78_spill] sm:$0xff] }
 0x103   : > { %v1053_v5 = vadd.f32 %v989_v23, %v845_v2  ;;  %1406 = vadd.xlane.f32.xlu1 %v1405_v13  ;;  %v1271_v51 = vmul.f32 %v1207_v39, %v1207_v39  ;;  %v792_v63 = vmul.f32 %v8598_v7, %v5323_v15  ;;  %v999_v32 = vmul.f32 %v8599_v52, %v5411_v11  ;;  %v8605_v2 = vld [vmem:[#allocation73_spill] sm:$0xff] }
 0x104   : > { %v1054_v58 = vadd.f32 %v990_v60, %v846_v0  ;;  %v1396_v49 = vadd.f32 %v1326_v1, %v1325_v14  ;;  %v1272_v3 = vmul.f32 %v1208_v43, %v1208_v43  ;;  %v855_v59 = vadd.f32 %v791_v37, %v8600_v47 }
 0x105   : > { %v1137_v22 = vadd.f32 %v5409_v9, %v1053_v5  ;;  %v1335_v41 = vmul.f32 %v1271_v51, %v1207_v39  ;;  %v856_v17 = vadd.f32 %v792_v63, %v8601_v61  ;;  %v1000_v25 = vmul.f32 %v8602_v26, %v5411_v11  ;;  %v8607_v39 = vld [vmem:[#allocation29_spill] sm:$0xff]  ;;  %v8608_v5 = vld [vmem:[#allocation62_spill] sm:$0xff] }
 0x106   : > { %v1138_v42 = vadd.f32 %v5409_v9, %v1054_v58  ;;  %1397 = vadd.xlane.f32.xlu0 %v1396_v49  ;;  %v1336_v55 = vmul.f32 %v1272_v3, %v1208_v43  ;;  %v1063_v27 = vadd.f32 %v999_v32, %v855_v59  ;;  %v785_v62 = vmul.f32 %v8572_v46, %v5357_v50  ;;  %v8609_v51 = vld [vmem:[#allocation77_spill] sm:$0xff]  ;;  %v8611_v3 = vld [vmem:[#allocation63_spill] sm:$0xff] }
 0x107   : > { %v1201_v40 = vmax.f32 %v1137_v22, 1e-06  ;;  %v1064_v44 = vadd.f32 %v1000_v25, %v856_v17  ;;  %v786_v18 = vmul.f32 %v8573_v28, %v5357_v50  ;;  %v993_v53 = vmul.f32 %v8577_v36, %v8603_v24  ;;  %v8606_v36 = vld [vmem:[#allocation28_spill] sm:$0xff] }
 0x108   : > { %v1202_v33 = vmax.f32 %v1138_v42, 1e-06  ;;  %v1411_v29 = vadd.f32 %v1336_v55, %v1335_v41  ;;  %v1147_v54 = vadd.f32 %v5447_v12, %v1063_v27  ;;  %v849_v30 = vadd.f32 %v785_v62, %v8604_v38  ;;  %v8612_v41 = vld [vmem:[#allocation33_spill] sm:$0xff]  ;;  %v8613_v55 = vld [vmem:[#allocation76_spill] sm:$0xff]  ;;  %v8615_v62 = vld [vmem:[#allocation35_spill] sm:$0xff] }
 0x109   : > { %v1265_v19 = vmul.f32 %v1201_v40, %v1201_v40  ;;  %v1148_v10 = vadd.f32 %v5447_v12, %v1064_v44  ;;  %v850_v34 = vadd.f32 %v786_v18, %v8605_v2  ;;  %v994_v46 = vmul.f32 %v8578_v8, %v8603_v24  ;;  %v8610_v8 = vld [vmem:[#allocation32_spill] sm:$0xff] }
 0x10a   : > { %v1266_v16 = vmul.f32 %v1202_v33, %v1202_v33  ;;  %1412 = vadd.xlane.f32.xlu1 %v1411_v29  ;;  %v1211_v28 = vmax.f32 %v1147_v54, 1e-06  ;;  %v1057_v56 = vadd.f32 %v993_v53, %v849_v30  ;;  %v443_v0 = vmul.f32 %v8606_v36, %v5339_v6  ;;  %v8616_v30 = vld [vmem:[#allocation61_spill] sm:$0xff] }
 0x10b   : > { %v1329_v57 = vmul.f32 %v1265_v19, %v1201_v40  ;;  %v1212_v13 = vmax.f32 %v1148_v10, 1e-06  ;;  %v1058_v14 = vadd.f32 %v994_v46, %v850_v34  ;;  %v444_v60 = vmul.f32 %v8607_v39, %v5339_v6  ;;  %v8614_v40 = vld [vmem:[#allocation34_spill] sm:$0xff] }
 0x10c   : > { %v1330_v23 = vmul.f32 %v1266_v16, %v1202_v33  ;;  %v1275_v1 = vmul.f32 %v1211_v28, %v1211_v28  ;;  %v1141_v43 = vadd.f32 %v5453_v4, %v1057_v56  ;;  %v651_v37 = vadd.f32 %v8608_v5, %v443_v0  ;;  %v8617_v34 = vld [vmem:[#allocation74_spill] sm:$0xff] }
 0x10d   : > { %v795_v58 = vmul.f32 %v8610_v8, %v8609_v51  ;;  %v1276_v32 = vmul.f32 %v1212_v13, %v1212_v13  ;;  %v1142_v49 = vadd.f32 %v5453_v4, %v1058_v14  ;;  %v652_v22 = vadd.f32 %v8611_v3, %v444_v60  ;;  %v8620_v5 = vld [vmem:[#allocation30_spill] sm:$0xff] }
 0x10e   : > { %v1402_v63 = vadd.f32 %v1330_v23, %v1329_v57  ;;  %v1339_v47 = vmul.f32 %v1275_v1, %v1211_v28  ;;  %v1205_v59 = vmax.f32 %v1141_v43, 1e-06  ;;  %v796_v42 = vmul.f32 %v8612_v41, %v8609_v51  ;;  %v8618_v57 = vld [vmem:[#allocation75_spill] sm:$0xff] }
 0x10f   : > { %v859_v61 = vadd.f32 %v795_v58, %v651_v37  ;;  %v1340_v17 = vmul.f32 %v1276_v32, %v1212_v13  ;;  %v1206_v25 = vmax.f32 %v1142_v49, 1e-06  ;;  %v1003_v27 = vmul.f32 %v8614_v40, %v8613_v55  ;;  %v8619_v43 = vld [vmem:[#allocation71_spill] sm:$0xff] }
 0x110   : > { %1403 = vadd.xlane.f32.xlu0 %v1402_v63  ;;  %v1004_v33 = vmul.f32 %v8615_v62, %v8613_v55  ;;  %v1269_v44 = vmul.f32 %v1205_v59, %v1205_v59  ;;  %v860_v18 = vadd.f32 %v796_v42, %v652_v22  ;;  %v437_v53 = vmul.f32 %v8581_v35, %v5363_v48  ;;  %v8621_v49 = vld [vmem:[#allocation31_spill] sm:$0xff] }
 0x111   : > { %v438_v29 = vmul.f32 %v8583_v20, %v5363_v48  ;;  %v1417_v19 = vadd.f32 %v1340_v17, %v1339_v47  ;;  %v1270_v54 = vmul.f32 %v1206_v25, %v1206_v25  ;;  %v1067_v38 = vadd.f32 %v1003_v27, %v859_v61  ;;  %v8623_v27 = vld [vmem:[#allocation65_spill] sm:$0xff] }
 0x112   : > { %v789_v16 = vmul.f32 %v8597_v45, %v8616_v30  ;;  %v1333_v10 = vmul.f32 %v1269_v44, %v1205_v59  ;;  %v1068_v2 = vadd.f32 %v1004_v33, %v860_v18  ;;  %v645_v46 = vadd.f32 %v8617_v34, %v437_v53  ;;  %v8622_v59 = vld [vmem:[#allocation64_spill] sm:$0xff] }
 0x113   : > { %v646_v28 = vadd.f32 %v8618_v57, %v438_v29  ;;  %1418 = vadd.xlane.f32.xlu1 %v1417_v19  ;;  %v1334_v56 = vmul.f32 %v1270_v54, %v1206_v25  ;;  %v1151_v0 = vadd.f32 %v5431_v31, %v1067_v38  ;;  %v790_v23 = vmul.f32 %v8598_v7, %v8616_v30  ;;  %v8624_v57 = vld [vmem:[#allocation54_spill] sm:$0xff] }
 0x114   : > { %v997_v13 = vmul.f32 %v8599_v52, %v5383_v21  ;;  %v1152_v14 = vadd.f32 %v5431_v31, %v1068_v2  ;;  %v853_v60 = vadd.f32 %v789_v16, %v645_v46  ;;  %v998_v1 = vmul.f32 %v8602_v26, %v5383_v21 }
 0x115   : > { %v591_v37 = vmul.f32 %v8620_v5, %v8619_v43  ;;  %v1408_v58 = vadd.f32 %v1334_v56, %v1333_v10  ;;  %v1215_v63 = vmax.f32 %v1151_v0, 1e-06  ;;  %v854_v32 = vadd.f32 %v790_v23, %v646_v28 }
 0x116   : > { %v592_v3 = vmul.f32 %v8621_v49, %v8619_v43  ;;  %v1216_v22 = vmax.f32 %v1152_v14, 1e-06  ;;  %v1061_v47 = vadd.f32 %v997_v13, %v853_v60  ;;  %v799_v61 = vmul.f32 %v8610_v8, %v5323_v15  ;;  %v8625_v13 = vld [vmem:[#allocation55_spill] sm:$0xff]  ;;  %v8626_v14 = vld [vmem:[#allocation22_spill] sm:$0xff] }
 0x117   : > { %v655_v42 = vadd.f32 %v591_v37, %v8622_v59  ;;  %1409 = vadd.xlane.f32.xlu0 %v1408_v58  ;;  %v1279_v17 = vmul.f32 %v1215_v63, %v1215_v63  ;;  %v1062_v25 = vadd.f32 %v998_v1, %v854_v32  ;;  %v800_v44 = vmul.f32 %v8612_v41, %v5323_v15 }
 0x118   : > { %v656_v33 = vadd.f32 %v592_v3, %v8623_v27  ;;  %v1280_v18 = vmul.f32 %v1216_v22, %v1216_v22  ;;  %v1145_v53 = vadd.f32 %v5409_v9, %v1061_v47  ;;  %v1007_v19 = vmul.f32 %v8614_v40, %v5411_v11 }
 0x119   : > { %v863_v29 = vadd.f32 %v799_v61, %v655_v42  ;;  %v1343_v54 = vmul.f32 %v1279_v17, %v1215_v63  ;;  %v1146_v38 = vadd.f32 %v5409_v9, %v1062_v25  ;;  %v1008_v10 = vmul.f32 %v8615_v62, %v5411_v11  ;;  %v8627_v63 = vld [vmem:[#allocation23_spill] sm:$0xff] }
 0x11a   : > { %v864_v16 = vadd.f32 %v800_v44, %v656_v33  ;;  %v1344_v2 = vmul.f32 %v1280_v18, %v1216_v22  ;;  %v1209_v34 = vmax.f32 %v1145_v53, 1e-06  ;;  %v441_v28 = vmul.f32 %v8581_v35, %v8624_v57 }
 0x11b   : > { %v1071_v46 = vadd.f32 %v1007_v19, %v863_v29  ;;  %v1210_v56 = vmax.f32 %v1146_v38, 1e-06  ;;  %v442_v23 = vmul.f32 %v8583_v20, %v8624_v57  ;;  %v585_v60 = vmul.f32 %v8626_v14, %v8625_v13 }
 0x11c   : > { %v1072_v0 = vadd.f32 %v1008_v10, %v864_v16  ;;  %v1423_v1 = vadd.f32 %v1344_v2, %v1343_v54  ;;  %v1273_v37 = vmul.f32 %v1209_v34, %v1209_v34  ;;  %v586_v32 = vmul.f32 %v8627_v63, %v8625_v13  ;;  %v8629_v16 = vld [vmem:[#allocation37_spill] sm:$0xff] }
 0x11d   : > { %v1155_v58 = vadd.f32 %v5447_v12, %v1071_v46  ;;  %v1274_v3 = vmul.f32 %v1210_v56, %v1210_v56  ;;  %v649_v47 = vadd.f32 %v585_v60, %v441_v28  ;;  %v793_v35 = vmul.f32 %v8597_v45, %v5357_v50  ;;  %v8628_v45 = vld [vmem:[#allocation36_spill] sm:$0xff]  ;;  %v8631_v46 = vld [vmem:[#allocation38_spill] sm:$0xff]  ;;  %v8634_v60 = vld [vmem:[#allocation41_spill] sm:$0xff] }
 0x11e   : > { %v1156_v22 = vadd.f32 %v5447_v12, %v1072_v0  ;;  %1424 = vadd.xlane.f32.xlu1 %v1423_v1  ;;  %v1337_v59 = vmul.f32 %v1273_v37, %v1209_v34  ;;  %v650_v42 = vadd.f32 %v586_v32, %v442_v23  ;;  %v794_v61 = vmul.f32 %v8598_v7, %v5357_v50  ;;  %v8630_v34 = vld [vmem:[#allocation45_spill] sm:$0xff]  ;;  %v8633_v23 = vld [vmem:[#allocation40_spill] sm:$0xff]  ;;  %v8635_v32 = vld [vmem:[#allocation46_spill] sm:$0xff] }
 0x11f   : > { %v1219_v20 = vmax.f32 %v1155_v58, 1e-06  ;;  %v1338_v17 = vmul.f32 %v1274_v3, %v1210_v56  ;;  %v857_v27 = vadd.f32 %v793_v35, %v649_v47  ;;  %v1001_v33 = vmul.f32 %v8599_v52, %v8603_v24  ;;  %v8632_v52 = vld [vmem:[#allocation39_spill] sm:$0xff] }
 0x120   : > { %v1220_v25 = vmax.f32 %v1156_v22, 1e-06  ;;  %v858_v18 = vadd.f32 %v794_v61, %v650_v42  ;;  %v1002_v53 = vmul.f32 %v8602_v26, %v8603_v24  ;;  %v451_v29 = vmul.f32 %v8628_v45, %v5339_v6  ;;  %v8636_v35 = vld [vmem:[#allocation47_spill] sm:$0xff] }
 0x121   : > { %v1283_v44 = vmul.f32 %v1219_v20, %v1219_v20  ;;  %v1414_v19 = vadd.f32 %v1338_v17, %v1337_v59  ;;  %v1065_v38 = vadd.f32 %v1001_v33, %v857_v27  ;;  %v452_v7 = vmul.f32 %v8629_v16, %v5339_v6  ;;  %v8637_v33 = vld [vmem:[#allocation60_spill] sm:$0xff] }
 0x122   : > { %v1284_v54 = vmul.f32 %v1220_v25, %v1220_v25  ;;  %v1066_v2 = vadd.f32 %v1002_v53, %v858_v18  ;;  %v595_v28 = vmul.f32 %v8631_v46, %v8630_v34  ;;  %v596_v56 = vmul.f32 %v8632_v52, %v8630_v34 }
 0x123   : > { %v1347_v10 = vmul.f32 %v1283_v44, %v1219_v20  ;;  %1415 = vadd.xlane.f32.xlu0 %v1414_v19  ;;  %v1149_v26 = vadd.f32 %v5453_v4, %v1065_v38  ;;  %v803_v14 = vmul.f32 %v8633_v23, %v8609_v51  ;;  %v804_v1 = vmul.f32 %v8634_v60, %v8609_v51 }
 0x124   : > { %v1348_v0 = vmul.f32 %v1284_v54, %v1220_v25  ;;  %v1150_v37 = vadd.f32 %v5453_v4, %v1066_v2  ;;  %v659_v58 = vadd.f32 %v595_v28, %v451_v29  ;;  %v660_v63 = vadd.f32 %v596_v56, %v452_v7 }
 0x125   : > { %v1011_v3 = vmul.f32 %v8635_v32, %v8613_v55  ;;  %v1213_v47 = vmax.f32 %v1149_v26, 1e-06  ;;  %v1012_v59 = vmul.f32 %v8636_v35, %v8613_v55  ;;  %v445_v20 = vmul.f32 %v8606_v36, %v5363_v48 }
 0x126   : > { %v1429_v22 = vadd.f32 %v1348_v0, %v1347_v10  ;;  %v1214_v42 = vmax.f32 %v1150_v37, 1e-06  ;;  %v867_v61 = vadd.f32 %v803_v14, %v659_v58  ;;  %v868_v17 = vadd.f32 %v804_v1, %v660_v63  ;;  %v8638_v58 = vld [vmem:[#allocation44_spill] sm:$0xff] }
 0x127   : > { %v446_v25 = vmul.f32 %v8607_v39, %v5363_v48  ;;  %v1277_v27 = vmul.f32 %v1213_v47, %v1213_v47  ;;  %v589_v44 = vmul.f32 %v8620_v5, %v8637_v33  ;;  %v590_v18 = vmul.f32 %v8621_v49, %v8637_v33 }
 0x128   : > { %1430 = vadd.xlane.f32.xlu1 %v1429_v22  ;;  %v797_v53 = vmul.f32 %v8610_v8, %v8616_v30  ;;  %v1278_v29 = vmul.f32 %v1214_v42, %v1214_v42  ;;  %v1075_v19 = vadd.f32 %v1011_v3, %v867_v61  ;;  %v1076_v54 = vadd.f32 %v1012_v59, %v868_v17 }
 0x129   : > { %v798_v38 = vmul.f32 %v8612_v41, %v8616_v30  ;;  %v1341_v7 = vmul.f32 %v1277_v27, %v1213_v47  ;;  %v653_v10 = vadd.f32 %v589_v44, %v445_v20  ;;  %v654_v2 = vadd.f32 %v590_v18, %v446_v25 }
 0x12a   : > { %v1005_v28 = vmul.f32 %v8614_v40, %v5383_v21  ;;  %v1342_v56 = vmul.f32 %v1278_v29, %v1214_v42  ;;  %v1159_v0 = vadd.f32 %v5431_v31, %v1075_v19  ;;  %v1160_v26 = vadd.f32 %v5431_v31, %v1076_v54 }
 0x12b   : > { %v1006_v14 = vmul.f32 %v8615_v62, %v5383_v21  ;;  %v861_v1 = vadd.f32 %v797_v53, %v653_v10  ;;  %v862_v37 = vadd.f32 %v798_v38, %v654_v2  ;;  %v455_v63 = vmul.f32 %v8628_v45, %v8638_v58 }
 0x12c   : > { %v456_v3 = vmul.f32 %v8629_v16, %v8638_v58  ;;  %v1420_v22 = vadd.f32 %v1342_v56, %v1341_v7  ;;  %v1223_v47 = vmax.f32 %v1159_v0, 1e-06  ;;  %v1224_v59 = vmax.f32 %v1160_v26, 1e-06 }
 0x12d   : > { %v599_v20 = vmul.f32 %v8631_v46, %v8619_v43  ;;  %v1069_v42 = vadd.f32 %v1005_v28, %v861_v1  ;;  %v1070_v61 = vadd.f32 %v1006_v14, %v862_v37  ;;  %v600_v17 = vmul.f32 %v8632_v52, %v8619_v43 }
 0x12e   : > { %v807_v25 = vmul.f32 %v8633_v23, %v5323_v15  ;;  %1421 = vadd.xlane.f32.xlu0 %v1420_v22  ;;  %v1287_v27 = vmul.f32 %v1223_v47, %v1223_v47  ;;  %v1288_v44 = vmul.f32 %v1224_v59, %v1224_v59  ;;  %v808_v53 = vmul.f32 %v8634_v60, %v5323_v15 }
 0x12f   : > { %v663_v18 = vadd.f32 %v599_v20, %v455_v63  ;;  %v1153_v29 = vadd.f32 %v5409_v9, %v1069_v42  ;;  %v1154_v19 = vadd.f32 %v5409_v9, %v1070_v61  ;;  %v664_v54 = vadd.f32 %v600_v17, %v456_v3 }
 0x130   : > { %v1015_v38 = vmul.f32 %v8635_v32, %v5411_v11  ;;  %v1351_v7 = vmul.f32 %v1287_v27, %v1223_v47  ;;  %v1352_v10 = vmul.f32 %v1288_v44, %v1224_v59  ;;  %v1016_v28 = vmul.f32 %v8636_v35, %v5411_v11 }
 0x131   : > { %v871_v2 = vadd.f32 %v807_v25, %v663_v18  ;;  %v1217_v56 = vmax.f32 %v1153_v29, 1e-06  ;;  %v1218_v0 = vmax.f32 %v1154_v19, 1e-06  ;;  %v872_v26 = vadd.f32 %v808_v53, %v664_v54 }
 0x132   : > { %v449_v14 = vmul.f32 %v8606_v36, %v8624_v57  ;;  %v1435_v1 = vadd.f32 %v1352_v10, %v1351_v7  ;;  %v450_v63 = vmul.f32 %v8607_v39, %v8624_v57  ;;  %v593_v3 = vmul.f32 %v8620_v5, %v8625_v13  ;;  %v8640_v10 = vld [vmem:[#allocation43_spill] sm:$0xff] }
 0x133   : > { %v1079_v37 = vadd.f32 %v1015_v38, %v871_v2  ;;  %v1281_v22 = vmul.f32 %v1217_v56, %v1217_v56  ;;  %v1282_v47 = vmul.f32 %v1218_v0, %v1218_v0  ;;  %v1080_v59 = vadd.f32 %v1016_v28, %v872_v26  ;;  %v8641_v28 = vld [vmem:[#allocation48_spill] sm:$0xff] }
 0x134   : > { %v594_v20 = vmul.f32 %v8621_v49, %v8625_v13  ;;  %1436 = vadd.xlane.f32.xlu1 %v1435_v1  ;;  %v657_v61 = vadd.f32 %v593_v3, %v449_v14  ;;  %v801_v36 = vmul.f32 %v8610_v8, %v5357_v50  ;;  %v802_v17 = vmul.f32 %v8612_v41, %v5357_v50  ;;  %v8639_v41 = vld [vmem:[#allocation42_spill] sm:$0xff]  ;;  %v4591_v14 = vld [vmem:[%s4842_s8 + $0x60] sm:$0xf] }
 0x135   : > { %v1163_v42 = vadd.f32 %v5447_v12, %v1079_v37  ;;  %v1345_v39 = vmul.f32 %v1281_v22, %v1217_v56  ;;  %v1346_v25 = vmul.f32 %v1282_v47, %v1218_v0  ;;  %v1164_v5 = vadd.f32 %v5447_v12, %v1080_v59  ;;  %v8643_v1 = vld [vmem:[#allocation12_spill] sm:$0xff]  ;;  %v4592_v47 = vld [vmem:[%s4842_s8 + $0x68] sm:$0xf] }
 0x136   : > { %v658_v27 = vadd.f32 %v594_v20, %v450_v63  ;;  %v865_v18 = vadd.f32 %v801_v36, %v657_v61  ;;  %v1009_v49 = vmul.f32 %v8614_v40, %v8603_v24  ;;  %v1010_v53 = vmul.f32 %v8615_v62, %v8603_v24  ;;  %v8642_v62 = vld [vmem:[#allocation49_spill] sm:$0xff] }
 0x137   : > { %v1227_v44 = vmax.f32 %v1163_v42, 1e-06  ;;  %v1426_v29 = vadd.f32 %v1346_v25, %v1345_v39  ;;  %v1228_v19 = vmax.f32 %v1164_v5, 1e-06  ;;  %v459_v54 = vmul.f32 %v8639_v41, %v5339_v6  ;;  %v8644_v25 = vld [vmem:[#allocation13_spill] sm:$0xff] }
 0x138   : > { %v866_v8 = vadd.f32 %v802_v17, %v658_v27  ;;  %v1073_v7 = vadd.f32 %v1009_v49, %v865_v18  ;;  %v460_v2 = vmul.f32 %v8640_v10, %v5339_v6  ;;  %v603_v56 = vmul.f32 %v8641_v28, %v8630_v34 }
 0x139   : > { %v1291_v38 = vmul.f32 %v1227_v44, %v1227_v44  ;;  %1427 = vadd.xlane.f32.xlu0 %v1426_v29  ;;  %v1292_v40 = vmul.f32 %v1228_v19, %v1228_v19  ;;  %v604_v26 = vmul.f32 %v8642_v62, %v8630_v34  ;;  %v5678_v37 = vrot.slane %v4591_v14, %v8643_v1 }
 0x13a   : > { %v1074_v0 = vadd.f32 %v1010_v53, %v866_v8  ;;  %v1157_v3 = vadd.f32 %v5453_v4, %v1073_v7  ;;  %v667_v22 = vadd.f32 %v603_v56, %v459_v54  ;;  %v5683_v59 = vrot.slane %v4592_v47, %v8643_v1 }
 0x13b   : > { %v1355_v63 = vmul.f32 %v1291_v38, %v1227_v44  ;;  %v1356_v20 = vmul.f32 %v1292_v40, %v1228_v19  ;;  %v668_v61 = vadd.f32 %v604_v26, %v460_v2  ;;  %v811_v36 = vmul.f32 %v5678_v37, %v8609_v51 }
 0x13c   : > { %v1158_v42 = vadd.f32 %v5453_v4, %v1074_v0  ;;  %v1221_v17 = vmax.f32 %v1157_v3, 1e-06  ;;  %v812_v39 = vmul.f32 %v5683_v59, %v8609_v51  ;;  %v5691_v5 = vrot.slane %v4591_v14, %v8644_v25 }
 0x13d   : > { %v5694_v27 = vrot.slane %v4592_v47, %v8644_v25  ;;  %v1441_v44 = vadd.f32 %v1356_v20, %v1355_v63  ;;  %v875_v49 = vadd.f32 %v811_v36, %v667_v22  ;;  %v453_v53 = vmul.f32 %v8628_v45, %v5363_v48 }
 0x13e   : > { %v1222_v18 = vmax.f32 %v1158_v42, 1e-06  ;;  %v1285_v29 = vmul.f32 %v1221_v17, %v1221_v17  ;;  %v876_v19 = vadd.f32 %v812_v39, %v668_v61  ;;  %v1019_v8 = vmul.f32 %v5691_v5, %v8613_v55 }
 0x13f   : > { %v1020_v54 = vmul.f32 %v5694_v27, %v8613_v55  ;;  %1442 = vadd.xlane.f32.xlu1 %v1441_v44  ;;  %v454_v7 = vmul.f32 %v8629_v16, %v5363_v48  ;;  %v597_v2 = vmul.f32 %v8631_v46, %v8637_v33  ;;  %v598_v56 = vmul.f32 %v8632_v52, %v8637_v33 }
 0x140   : > { %v1286_v38 = vmul.f32 %v1222_v18, %v1222_v18  ;;  %v1349_v40 = vmul.f32 %v1285_v29, %v1221_v17  ;;  %v1083_v0 = vadd.f32 %v1019_v8, %v875_v49  ;;  %v805_v14 = vmul.f32 %v8633_v23, %v8616_v30 }
 0x141   : > { %v1084_v26 = vadd.f32 %v1020_v54, %v876_v19  ;;  %v661_v3 = vadd.f32 %v597_v2, %v453_v53  ;;  %v662_v22 = vadd.f32 %v598_v56, %v454_v7  ;;  %v806_v47 = vmul.f32 %v8634_v60, %v8616_v30 }
 0x142   : > { %v1350_v63 = vmul.f32 %v1286_v38, %v1222_v18  ;;  %v1167_v20 = vadd.f32 %v5431_v31, %v1083_v0  ;;  %v1013_v61 = vmul.f32 %v8635_v32, %v5383_v21  ;;  %v1014_v36 = vmul.f32 %v8636_v35, %v5383_v21 }
 0x143   : > { %v1168_v42 = vadd.f32 %v5431_v31, %v1084_v26  ;;  %v869_v39 = vadd.f32 %v805_v14, %v661_v3  ;;  %v870_v44 = vadd.f32 %v806_v47, %v662_v22  ;;  %v463_v18 = vmul.f32 %v8639_v41, %v8638_v58 }
 0x144   : > { %v1432_v17 = vadd.f32 %v1350_v63, %v1349_v40  ;;  %v1231_v49 = vmax.f32 %v1167_v20, 1e-06  ;;  %v464_v29 = vmul.f32 %v8640_v10, %v8638_v58  ;;  %v607_v19 = vmul.f32 %v8641_v28, %v8619_v43 }
 0x145   : > { %v1232_v53 = vmax.f32 %v1168_v42, 1e-06  ;;  %v1077_v8 = vadd.f32 %v1013_v61, %v869_v39  ;;  %v1078_v54 = vadd.f32 %v1014_v36, %v870_v44  ;;  %v608_v38 = vmul.f32 %v8642_v62, %v8619_v43 }
 0x146   : > { %1433 = vadd.xlane.f32.xlu0 %v1432_v17  ;;  %v815_v7 = vmul.f32 %v5678_v37, %v5323_v15  ;;  %v1295_v2 = vmul.f32 %v1231_v49, %v1231_v49  ;;  %v671_v40 = vadd.f32 %v607_v19, %v463_v18  ;;  %v816_v0 = vmul.f32 %v5683_v59, %v5323_v15 }
 0x147   : > { %v1296_v56 = vmul.f32 %v1232_v53, %v1232_v53  ;;  %v1161_v26 = vadd.f32 %v5409_v9, %v1077_v8  ;;  %v1162_v14 = vadd.f32 %v5409_v9, %v1078_v54  ;;  %v672_v63 = vadd.f32 %v608_v38, %v464_v29 }
 0x148   : > { %v1023_v3 = vmul.f32 %v5691_v5, %v5411_v11  ;;  %v1359_v22 = vmul.f32 %v1295_v2, %v1231_v49  ;;  %v879_v20 = vadd.f32 %v815_v7, %v671_v40  ;;  %v1024_v42 = vmul.f32 %v5694_v27, %v5411_v11  ;;  %v325_v2 = vld [vmem:[%s4842_s8 + $0x70] sm:$0xf] }
 0x149   : > { %v1360_v47 = vmul.f32 %v1296_v56, %v1232_v53  ;;  %v1225_v61 = vmax.f32 %v1161_v26, 1e-06  ;;  %v1226_v36 = vmax.f32 %v1162_v14, 1e-06  ;;  %v880_v17 = vadd.f32 %v816_v0, %v672_v63  ;;  %v326_v26 = vld [vmem:[%s4842_s8 + $0x78] sm:$0xf] }
 0x14a   : > { %v457_v39 = vmul.f32 %v8628_v45, %v8624_v57  ;;  %v1087_v18 = vadd.f32 %v1023_v3, %v879_v20  ;;  %v458_v29 = vmul.f32 %v8629_v16, %v8624_v57  ;;  %v601_v49 = vmul.f32 %v8631_v46, %v8625_v13  ;;  %v8645_v20 = vld [vmem:[#allocation10_spill] sm:$0xff] }
 0x14b   : > { %v1447_v44 = vadd.f32 %v1360_v47, %v1359_v22  ;;  %v1289_v53 = vmul.f32 %v1225_v61, %v1225_v61  ;;  %v1290_v19 = vmul.f32 %v1226_v36, %v1226_v36  ;;  %v1088_v8 = vadd.f32 %v1024_v42, %v880_v17  ;;  %v8646_v17 = vld [vmem:[#allocation11_spill] sm:$0xff] }
 0x14c   : > { %v602_v54 = vmul.f32 %v8632_v52, %v8625_v13  ;;  %v1171_v38 = vadd.f32 %v5447_v12, %v1087_v18  ;;  %v665_v7 = vadd.f32 %v601_v49, %v457_v39  ;;  %v809_v45 = vmul.f32 %v8633_v23, %v5357_v50 }
 0x14d   : > { %1448 = vadd.xlane.f32.xlu1 %v1447_v44  ;;  %v810_v16 = vmul.f32 %v8634_v60, %v5357_v50  ;;  %v1353_v56 = vmul.f32 %v1289_v53, %v1225_v61  ;;  %v1354_v40 = vmul.f32 %v1290_v19, %v1226_v36  ;;  %v1172_v46 = vadd.f32 %v5447_v12, %v1088_v8 }
 0x14e   : > { %v666_v0 = vadd.f32 %v602_v54, %v458_v29  ;;  %v1235_v14 = vmax.f32 %v1171_v38, 1e-06  ;;  %v873_v63 = vadd.f32 %v809_v45, %v665_v7  ;;  %v1017_v52 = vmul.f32 %v8635_v32, %v8603_v24 }
 0x14f   : > { %v1018_v3 = vmul.f32 %v8636_v35, %v8603_v24  ;;  %v1438_v22 = vadd.f32 %v1354_v40, %v1353_v56  ;;  %v1236_v23 = vmax.f32 %v1172_v46, 1e-06  ;;  %v5757_v60 = vrot.slane %v325_v2, %v8645_v20 }
 0x150   : > { %v874_v47 = vadd.f32 %v810_v16, %v666_v0  ;;  %v1299_v42 = vmul.f32 %v1235_v14, %v1235_v14  ;;  %v1081_v61 = vadd.f32 %v1017_v52, %v873_v63  ;;  %v5760_v36 = vrot.slane %v326_v26, %v8645_v20 }
 0x151   : > { %v5763_v39 = vrot.slane %v325_v2, %v8646_v17  ;;  %1439 = vadd.xlane.f32.xlu0 %v1438_v22  ;;  %v1300_v44 = vmul.f32 %v1236_v23, %v1236_v23  ;;  %v467_v35 = vmul.f32 %v5757_v60, %v5339_v6  ;;  %v5768_v18 = vrot.slane %v326_v26, %v8646_v17 }
 0x152   : > { %v1082_v32 = vadd.f32 %v1018_v3, %v874_v47  ;;  %v1363_v29 = vmul.f32 %v1299_v42, %v1235_v14  ;;  %v1165_v49 = vadd.f32 %v5453_v4, %v1081_v61  ;;  %v468_v53 = vmul.f32 %v5760_v36, %v5339_v6 }
 0x153   : > { %v611_v19 = vmul.f32 %v5763_v39, %v8630_v34  ;;  %v1364_v8 = vmul.f32 %v1300_v44, %v1236_v23  ;;  %v612_v38 = vmul.f32 %v5768_v18, %v8630_v34  ;;  %v5779_v7 = vrot.slane %v325_v2, %v8643_v1 }
 0x154   : > { %v1166_v54 = vadd.f32 %v5453_v4, %v1082_v32  ;;  %v1229_v45 = vmax.f32 %v1165_v49, 1e-06  ;;  %v5782_v56 = vrot.slane %v326_v26, %v8643_v1  ;;  %v5785_v40 = vrot.slane %v325_v2, %v8644_v25 }
 0x155   : > { %v675_v16 = vadd.f32 %v611_v19, %v467_v35  ;;  %v1453_v46 = vadd.f32 %v1364_v8, %v1363_v29  ;;  %v676_v14 = vadd.f32 %v612_v38, %v468_v53  ;;  %v819_v63 = vmul.f32 %v5779_v7, %v8609_v51 }
 0x156   : > { %v1230_v0 = vmax.f32 %v1166_v54, 1e-06  ;;  %v1293_v52 = vmul.f32 %v1229_v45, %v1229_v45  ;;  %v820_v3 = vmul.f32 %v5782_v56, %v8609_v51  ;;  %v5792_v22 = vrot.slane %v326_v26, %v8644_v25 }
 0x157   : > { %v1027_v23 = vmul.f32 %v5785_v40, %v8613_v55  ;;  %1454 = vadd.xlane.f32.xlu1 %v1453_v46  ;;  %v883_v2 = vadd.f32 %v819_v63, %v675_v16  ;;  %v461_v42 = vmul.f32 %v8639_v41, %v5363_v48  ;;  %v462_v61 = vmul.f32 %v8640_v10, %v5363_v48 }
 0x158   : > { %v1294_v47 = vmul.f32 %v1230_v0, %v1230_v0  ;;  %v1357_v44 = vmul.f32 %v1293_v52, %v1229_v45  ;;  %v884_v32 = vadd.f32 %v820_v3, %v676_v14  ;;  %v1028_v35 = vmul.f32 %v5792_v22, %v8613_v55 }
 0x159   : > { %v605_v26 = vmul.f32 %v8641_v28, %v8637_v33  ;;  %v1091_v49 = vadd.f32 %v1027_v23, %v883_v2  ;;  %v606_v53 = vmul.f32 %v8642_v62, %v8637_v33  ;;  %v813_v19 = vmul.f32 %v5678_v37, %v8616_v30 }
 0x15a   : > { %v1358_v29 = vmul.f32 %v1294_v47, %v1230_v0  ;;  %v1092_v8 = vadd.f32 %v1028_v35, %v884_v32  ;;  %v814_v38 = vmul.f32 %v5683_v59, %v8616_v30  ;;  %v1021_v45 = vmul.f32 %v5691_v5, %v5383_v21 }
 0x15b   : > { %v669_v54 = vadd.f32 %v605_v26, %v461_v42  ;;  %v1175_v46 = vadd.f32 %v5431_v31, %v1091_v49  ;;  %v670_v14 = vadd.f32 %v606_v53, %v462_v61  ;;  %v1022_v0 = vmul.f32 %v5694_v27, %v5383_v21 }
 0x15c   : > { %v1444_v16 = vadd.f32 %v1358_v29, %v1357_v44  ;;  %v1176_v63 = vadd.f32 %v5431_v31, %v1092_v8  ;;  %v471_v3 = vmul.f32 %v5757_v60, %v8638_v58  ;;  %v472_v23 = vmul.f32 %v5760_v36, %v8638_v58 }
 0x15d   : > { %v877_v52 = vadd.f32 %v813_v19, %v669_v54  ;;  %v1239_v47 = vmax.f32 %v1175_v46, 1e-06  ;;  %v878_v2 = vadd.f32 %v814_v38, %v670_v14  ;;  %v615_v42 = vmul.f32 %v5763_v39, %v8619_v43 }
 0x15e   : > { %1445 = vadd.xlane.f32.xlu0 %v1444_v16  ;;  %v616_v61 = vmul.f32 %v5768_v18, %v8619_v43  ;;  %v1240_v44 = vmax.f32 %v1176_v63, 1e-06  ;;  %v823_v35 = vmul.f32 %v5779_v7, %v5323_v15  ;;  %v824_v26 = vmul.f32 %v5782_v56, %v5323_v15 }
 0x15f   : > { %v1085_v32 = vadd.f32 %v1021_v45, %v877_v52  ;;  %v1303_v29 = vmul.f32 %v1239_v47, %v1239_v47  ;;  %v1086_v49 = vadd.f32 %v1022_v0, %v878_v2  ;;  %v679_v53 = vadd.f32 %v615_v42, %v471_v3 }
 0x160   : > { %v680_v19 = vadd.f32 %v616_v61, %v472_v23  ;;  %v1304_v8 = vmul.f32 %v1240_v44, %v1240_v44  ;;  %v1031_v38 = vmul.f32 %v5785_v40, %v5411_v11  ;;  %v1032_v16 = vmul.f32 %v5792_v22, %v5411_v11 }
 0x161   : > { %v1169_v54 = vadd.f32 %v5409_v9, %v1085_v32  ;;  %v1367_v45 = vmul.f32 %v1303_v29, %v1239_v47  ;;  %v1170_v46 = vadd.f32 %v5409_v9, %v1086_v49  ;;  %v887_v14 = vadd.f32 %v823_v35, %v679_v53 }
 0x162   : > { %v888_v63 = vadd.f32 %v824_v26, %v680_v19  ;;  %v1368_v52 = vmul.f32 %v1304_v8, %v1240_v44  ;;  %v465_v0 = vmul.f32 %v8639_v41, %v8624_v57  ;;  %v466_v3 = vmul.f32 %v8640_v10, %v8624_v57 }
 0x163   : > { %v1233_v25 = vmax.f32 %v1169_v54, 1e-06  ;;  %v1234_v23 = vmax.f32 %v1170_v46, 1e-06  ;;  %v1095_v2 = vadd.f32 %v1031_v38, %v887_v14  ;;  %v609_v61 = vmul.f32 %v8641_v28, %v8625_v13 }
 0x164   : > { %v1096_v42 = vadd.f32 %v1032_v16, %v888_v63  ;;  %v1459_v32 = vadd.f32 %v1368_v52, %v1367_v45  ;;  %v610_v35 = vmul.f32 %v8642_v62, %v8625_v13  ;;  %v817_v44 = vmul.f32 %v5678_v37, %v5357_v50 }
 0x165   : > { %v1297_v47 = vmul.f32 %v1233_v25, %v1233_v25  ;;  %v1298_v26 = vmul.f32 %v1234_v23, %v1234_v23  ;;  %v1179_v41 = vadd.f32 %v5447_v12, %v1095_v2  ;;  %v673_v29 = vadd.f32 %v609_v61, %v465_v0 }
 0x166   : > { %v1180_v10 = vadd.f32 %v5447_v12, %v1096_v42  ;;  %1460 = vadd.xlane.f32.xlu1 %v1459_v32  ;;  %v674_v53 = vadd.f32 %v610_v35, %v466_v3  ;;  %v818_v28 = vmul.f32 %v5683_v59, %v5357_v50  ;;  %v1025_v19 = vmul.f32 %v5691_v5, %v8603_v24 }
 0x167   : > { %v1361_v49 = vmul.f32 %v1297_v47, %v1233_v25  ;;  %v1362_v62 = vmul.f32 %v1298_v26, %v1234_v23  ;;  %v1243_v8 = vmax.f32 %v1179_v41, 1e-06  ;;  %v881_v37 = vadd.f32 %v817_v44, %v673_v29 }
 0x168   : > { %v1244_v54 = vmax.f32 %v1180_v10, 1e-06  ;;  %v882_v38 = vadd.f32 %v818_v28, %v674_v53  ;;  %v1026_v16 = vmul.f32 %v5694_v27, %v8603_v24  ;;  %v469_v45 = vmul.f32 %v5757_v60, %v5363_v48 }
 0x169   : > { %v470_v25 = vmul.f32 %v5760_v36, %v5363_v48  ;;  %v1450_v59 = vadd.f32 %v1362_v62, %v1361_v49  ;;  %v1307_v46 = vmul.f32 %v1243_v8, %v1243_v8  ;;  %v1089_v5 = vadd.f32 %v1025_v19, %v881_v37 }
 0x16a   : > { %v1308_v14 = vmul.f32 %v1244_v54, %v1244_v54  ;;  %v1090_v63 = vadd.f32 %v1026_v16, %v882_v38  ;;  %v613_v52 = vmul.f32 %v5763_v39, %v8637_v33  ;;  %v614_v0 = vmul.f32 %v5768_v18, %v8637_v33 }
 0x16b   : > { %v821_v27 = vmul.f32 %v5779_v7, %v8616_v30  ;;  %1451 = vadd.xlane.f32.xlu0 %v1450_v59  ;;  %v1371_v3 = vmul.f32 %v1307_v46, %v1243_v8  ;;  %v1173_v2 = vadd.f32 %v5453_v4, %v1089_v5  ;;  %v822_v42 = vmul.f32 %v5782_v56, %v8616_v30 }
 0x16c   : > { %v1372_v23 = vmul.f32 %v1308_v14, %v1244_v54  ;;  %v1174_v61 = vadd.f32 %v5453_v4, %v1090_v63  ;;  %v677_v32 = vadd.f32 %v613_v52, %v469_v45  ;;  %v678_v47 = vadd.f32 %v614_v0, %v470_v25 }
 0x16d   : > { %v1029_v35 = vmul.f32 %v5785_v40, %v5383_v21  ;;  %v1237_v26 = vmax.f32 %v1173_v2, 1e-06  ;;  %v1030_v41 = vmul.f32 %v5792_v22, %v5383_v21  ;;  %v473_v10 = vmul.f32 %v5757_v60, %v8624_v57 }
 0x16e   : > { %v1465_v44 = vadd.f32 %v1372_v23, %v1371_v3  ;;  %v1238_v29 = vmax.f32 %v1174_v61, 1e-06  ;;  %v885_v49 = vadd.f32 %v821_v27, %v677_v32  ;;  %v886_v53 = vadd.f32 %v822_v42, %v678_v47  ;;  %v295_v47 = vld [vmem:[%s5902_s14] sm:$0x3] }
 0x16f   : > { %v474_v28 = vmul.f32 %v5760_v36, %v8624_v57  ;;  %v1301_v19 = vmul.f32 %v1237_v26, %v1237_v26  ;;  %v617_v62 = vmul.f32 %v5763_v39, %v8625_v13  ;;  %v618_v8 = vmul.f32 %v5768_v18, %v8625_v13 }
 0x170   : > { %1466 = vadd.xlane.f32.xlu1 %v1465_v44  ;;  %v825_v54 = vmul.f32 %v5779_v7, %v5357_v50  ;;  %v1302_v60 = vmul.f32 %v1238_v29, %v1238_v29  ;;  %v1093_v37 = vadd.f32 %v1029_v35, %v885_v49  ;;  %v1094_v38 = vadd.f32 %v1030_v41, %v886_v53  ;;  %v296_v53 = vld [vmem:[%s5902_s14 + $0x2] sm:$0x3] }
 0x171   : > { %v826_v36 = vmul.f32 %v5782_v56, %v5357_v50  ;;  %v1365_v16 = vmul.f32 %v1301_v19, %v1237_v26  ;;  %v681_v45 = vadd.f32 %v617_v62, %v473_v10  ;;  %v682_v25 = vadd.f32 %v618_v8, %v474_v28  ;;  %v297_v19 = vld [vmem:[%s5902_s14 + $0x4] sm:$0x3] }
 0x172   : > { %v1366_v59 = vmul.f32 %v1302_v60, %v1238_v29  ;;  %v1177_v39 = vadd.f32 %v5409_v9, %v1093_v37  ;;  %v1178_v18 = vadd.f32 %v5409_v9, %v1094_v38  ;;  %v1033_v7 = vmul.f32 %v5785_v40, %v8603_v24  ;;  %v8648_v8 = vld [vmem:[#allocation9_spill] sm:$0xff]  ;;  %v1888_v38 = vld [vmem:[%s4842_s8 + $0x8] sm:$0xf0] }
 0x173   : > { %v889_v46 = vadd.f32 %v825_v54, %v681_v45  ;;  %v890_v14 = vadd.f32 %v826_v36, %v682_v25  ;;  %v1034_v5 = vmul.f32 %v5792_v22, %v8603_v24  ;;  %v1674_v41 = vrot.slane %v295_v47, %v8645_v20  ;;  %v298_v60 = vld [vmem:[%s5902_s14 + $0x6] sm:$0x3] }
 0x174   : > { %v1456_v63 = vadd.f32 %v1366_v59, %v1365_v16  ;;  %v1241_v52 = vmax.f32 %v1177_v39, 1e-06  ;;  %v1242_v56 = vmax.f32 %v1178_v18, 1e-06  ;;  %v1693_v28 = vrot.slane %v296_v53, %v8645_v20  ;;  %v1887_v37 = vld [vmem:[%s4842_s8] sm:$0xf0] }
 0x175   : > { %v1097_v0 = vadd.f32 %v1033_v7, %v889_v46  ;;  %v1098_v27 = vadd.f32 %v1034_v5, %v890_v14  ;;  %v1712_v62 = vrot.slane %v297_v19, %v8645_v20  ;;  %v5913_v54 = vsub.s32 4, %v8648_v8 }
 0x176   : > { %1457 = vadd.xlane.f32.xlu0 %v1456_v63  ;;  %v1305_v3 = vmul.f32 %v1241_v52, %v1241_v52  ;;  %v1306_v23 = vmul.f32 %v1242_v56, %v1242_v56  ;;  %v5919_v36 = vsub.s32 5, %v8648_v8  ;;  %v5922_v16 = vrot.slane %v298_v60, %v8645_v20 }
 0x177   : > { %v1181_v40 = vadd.f32 %v5453_v4, %v1097_v0  ;;  %v1182_v2 = vadd.f32 %v5453_v4, %v1098_v27  ;;  %8649 = vst [vmem:[#allocation17_spill] sm:$0xff] %v5913_v54  ;;  %v5925_v45 = vrot.slane %v1887_v37, %v5913_v54  ;;  %v5928_v25 = vrot.slane %v1888_v38, %v5913_v54  ;;  %v299_v0 = vld [vmem:[%s5902_s14 + $0x8] sm:$0x3] }
 0x178   : > { %v1369_v22 = vmul.f32 %v1305_v3, %v1241_v52  ;;  %v1370_v42 = vmul.f32 %v1306_v23, %v1242_v56  ;;  %8650 = vst [vmem:[#allocation81_spill] sm:$0xff] %v5919_v36  ;;  %v5931_v59 = vsub.s32 6, %v8648_v8  ;;  %v5938_v46 = vrot.slane %v1887_v37, %v5919_v36 }
 0x179   : > { %v1245_v61 = vmax.f32 %v1181_v40, 1e-06  ;;  %v1246_v32 = vmax.f32 %v1182_v2, 1e-06  ;;  %v1969_v39 = vmul.f32 %v5925_v45, %v5363_v48  ;;  %v1970_v18 = vmul.f32 %v5928_v25, %v5363_v48 }
 0x17a   : > { %v1462_v35 = vadd.f32 %v1370_v42, %v1369_v22  ;;  %8651 = vst [vmem:[#allocation82_spill] sm:$0xff] %v5931_v59  ;;  %v5941_v14 = vrot.slane %v1888_v38, %v5919_v36  ;;  %v5944_v7 = vsub.s32 7, %v8648_v8  ;;  %v2097_v5 = vmul.f32 %v5938_v46, %v8637_v33 }
 0x17b   : > { %v1309_v44 = vmul.f32 %v1245_v61, %v1245_v61  ;;  %v1310_v26 = vmul.f32 %v1246_v32, %v1246_v32  ;;  %v5952_v52 = vrot.slane %v1887_v37, %v5931_v59  ;;  %v5955_v56 = vrot.slane %v1888_v38, %v5931_v59 }
 0x17c   : > { %1463 = vadd.xlane.f32.xlu0 %v1462_v35  ;;  %8652 = vst [vmem:[#allocation18_spill] sm:$0xff] %v5944_v7  ;;  %v2098_v63 = vmul.f32 %v5941_v14, %v8637_v33  ;;  %v2161_v27 = vadd.f32 %v2097_v5, %v1969_v39  ;;  %v5959_v23 = vrot.slane %v1887_v37, %v5944_v7  ;;  %v1891_v33 = vld [vmem:[%s4842_s8 + $0x20] sm:$0xf0] }
 0x17d   : > { %v1373_v10 = vmul.f32 %v1309_v44, %v1245_v61  ;;  %v1374_v29 = vmul.f32 %v1310_v26, %v1246_v32  ;;  %v5963_v40 = vrot.slane %v299_v0, %v8645_v20  ;;  %v2289_v2 = vmul.f32 %v5952_v52, %v8616_v30 }
 0x17e   : > { %v2162_v3 = vadd.f32 %v2098_v63, %v1970_v18  ;;  %v2290_v22 = vmul.f32 %v5955_v56, %v8616_v30  ;;  %v5970_v42 = vrot.slane %v1888_v38, %v5944_v7  ;;  %v2481_v61 = vmul.f32 %v5959_v23, %v5383_v21  ;;  %v1890_v38 = vld [vmem:[%s4842_s8 + $0x18] sm:$0xf0] }
 0x17f   : > { %v1468_v49 = vadd.f32 %v1374_v29, %v1373_v10  ;;  %v1967_v32 = vmul.f32 %v5925_v45, %v5339_v6  ;;  %v2353_v47 = vadd.f32 %v2289_v2, %v2161_v27  ;;  %v1968_v26 = vmul.f32 %v5928_v25, %v5339_v6 }
 0x180   : > { %v2354_v35 = vadd.f32 %v2290_v22, %v2162_v3  ;;  %v2482_v44 = vmul.f32 %v5970_v42, %v5383_v21  ;;  %v2095_v10 = vmul.f32 %v5938_v46, %v8630_v34  ;;  %v2096_v29 = vmul.f32 %v5941_v14, %v8630_v34 }
 0x181   : > { %1676 = vbcast.lane.b32.xlu1 %v1674_v41, 256  ;;  %1469 = vadd.xlane.f32.xlu0 %v1468_v49  ;;  %v300_v49 = vld [vmem:[%s5902_s14 + $0xa] sm:$0x3]  ;;  %v2287_v63 = vmul.f32 %v5952_v52, %v8609_v51  ;;  %v2288_v0 = vmul.f32 %v5955_v56, %v8609_v51  ;;  %v6038_v8 = vrot.slane %v1890_v38, %v5931_v59 }
 0x182   : > { %v2546_v19 = vadd.f32 %v2482_v44, %v2354_v35  ;;  %v2159_v60 = vadd.f32 %v2095_v10, %v1967_v32  ;;  %v2160_v37 = vadd.f32 %v2096_v29, %v1968_v26  ;;  %v5998_v5 = vrot.slane %v300_v49, %v8645_v20  ;;  %v301_v26 = vld [vmem:[%s5902_s14 + $0xc] sm:$0x3] }
 0x183   : > { %v2479_v10 = vmul.f32 %v5959_v23, %v8613_v55  ;;  %v2480_v29 = vmul.f32 %v5970_v42, %v8613_v55 }
 0x184   : > { %v2610_v2 = vadd.f32 %v2546_v19, %v5409_v9  ;;  %v2351_v22 = vadd.f32 %v2287_v63, %v2159_v60 }
 0x185   : > { %1684 = vbcast.lane.b32.xlu1 %v1674_v41, 272 }
 0x189   : > { %1688 = vbcast.lane.b32.xlu1 %v1674_v41, 280 }
 0x18d   : > { %1699 = vbcast.lane.b32.xlu1 %v1693_v28, 264 }
 0x191   : > { %1707 = vbcast.lane.b32.xlu1 %v1693_v28, 280 }
 0x195   : > { %1718 = vbcast.lane.b32.xlu1 %v1712_v62, 264 }
 0x197   : > { %1680 = vbcast.lane.b32.xlu0 %v1674_v41, 264  ;;  %v1889_v41 = vld [vmem:[%s4842_s8 + $0x10] sm:$0xf0] }
 0x198   : > { %v5988_v53 = vrot.slane %v1889_v41, %v5913_v54  ;;  %v5994_v18 = vrot.slane %v1889_v41, %v5919_v36  ;;  %v6018_v44 = vrot.slane %v1889_v41, %v5931_v59  ;;  %v6031_v19 = vrot.slane %v1889_v41, %v5944_v7 }
 0x199   : > { %1726 = vbcast.lane.b32.xlu1 %v1712_v62, 280 }
 0x19a   : > { %v1975_v39 = vmul.f32 %v5988_v53, %v5339_v6  ;;  %v2103_v27 = vmul.f32 %v5994_v18, %v8630_v34  ;;  %8653 = vst [vmem:[#allocation19_spill] sm:$0xff] %v6031_v19  ;;  %v2107_v4 = vmul.f32 %v5994_v18, %v8619_v43 }
 0x19b   : > { %1695 = vbcast.lane.b32.xlu0 %v1693_v28, 256 }
 0x19c   : > { %v2167_v35 = vadd.f32 %v2103_v27, %v1975_v39  ;;  %v2543_v39 = vadd.f32 %v2479_v10, %v2351_v22  ;;  %v2296_v22 = vmul.f32 %v6038_v8, %v8609_v51  ;;  %v1971_v10 = vmul.f32 %v5925_v45, %v8638_v58 }
 0x19d   : > { %1737 = vbcast.lane.b32.xlu1 %v5922_v16, 264 }
 0x19e   : > { %v2607_v41 = vadd.f32 %v2543_v39, %v5431_v31  ;;  %v2291_v39 = vmul.f32 %v5952_v52, %v5323_v15 }
 0x19f   : > { %1703 = vbcast.lane.b32.xlu0 %v1693_v28, 272  ;;  %v2545_v28 = vadd.f32 %v2481_v61, %v2353_v47  ;;  %v2352_v61 = vadd.f32 %v2288_v0, %v2160_v37  ;;  %v6015_v47 = vrot.slane %v1890_v38, %v5919_v36  ;;  %v2674_v37 = vmax.f32 %v2610_v2, 1e-06 }
 0x1a0   : > { %v6035_v0 = vrot.slane %v301_v26, %v8645_v20  ;;  %v6044_v2 = vrot.slane %v1890_v38, %v5944_v7  ;;  %v6065_v17 = vmax.f32 %v2607_v41, 1e-06 }
 0x1a1   : > { %1745 = vbcast.lane.b32.xlu1 %v5922_v16, 280  ;;  %v2609_v3 = vadd.f32 %v2545_v28, %v5409_v9  ;;  %v2104_v49 = vmul.f32 %v6015_v47, %v8630_v34  ;;  %v2295_v28 = vmul.f32 %v6018_v44, %v8609_v51  ;;  %v2544_v63 = vadd.f32 %v2480_v29, %v2352_v61  ;;  %v302_v29 = vld [vmem:[%s5902_s14 + $0xe] sm:$0x3] }
 0x1a2   : > { %v2487_v61 = vmul.f32 %v6031_v19, %v8613_v55  ;;  %v2738_v26 = vmul.f32 %v2674_v37, %v2674_v37  ;;  %v2488_v21 = vmul.f32 %v6044_v2, %v8613_v55  ;;  %v6077_v41 = vrot.slane %v302_v29, %v8645_v20 }
 0x1a3   : > { %1714 = vbcast.lane.b32.xlu0 %v1712_v62, 256  ;;  %v2673_v60 = vmax.f32 %v2609_v3, 1e-06  ;;  %v2359_v1 = vadd.f32 %v2295_v28, %v2167_v35  ;;  %v2608_v3 = vadd.f32 %v2544_v63, %v5431_v31  ;;  %v2292_v63 = vmul.f32 %v5955_v56, %v5323_v15 }
 0x1a4   : > { %v1979_v29 = vmul.f32 %v5988_v53, %v8638_v58  ;;  %v6109_v20 = vrot.slane %v1891_v33, %v5913_v54 }
 0x1a5   : > { %1756 = vbcast.lane.b32.xlu1 %v5963_v40, 264  ;;  %v2737_v35 = vmul.f32 %v2673_v60, %v2673_v60  ;;  %v2551_v28 = vadd.f32 %v2487_v61, %v2359_v1  ;;  %v6067_v9 = vmax.f32 %v2608_v3, 1e-06  ;;  %v2484_v61 = vmul.f32 %v5970_v42, %v5411_v11 }
 0x1a7   : > { %1722 = vbcast.lane.b32.xlu0 %v1712_v62, 272  ;;  %v6005_v62 = vrot.slane %v1890_v38, %v5913_v54  ;;  %v1972_v38 = vmul.f32 %v5928_v25, %v8638_v58  ;;  %v6079_v3 = vmul.f32 %v2737_v35, %v2673_v60  ;;  %v6092_v60 = vmul.f32 %v6065_v17, %v6065_v17 }
 0x1a8   : > { %v6096_v35 = vmul.f32 %v6067_v9, %v6067_v9 }
 0x1a9   : > { %1764 = vbcast.lane.b32.xlu1 %v5963_v40, 280  ;;  %v1976_v32 = vmul.f32 %v6005_v62, %v5339_v6 }
 0x1ab   : > { %1733 = vbcast.lane.b32.xlu0 %v5922_v16, 256  ;;  %v2168_v27 = vadd.f32 %v2104_v49, %v1976_v32  ;;  %v2100_v32 = vmul.f32 %v5941_v14, %v8619_v43 }
 0x1ad   : > { %1775 = vbcast.lane.b32.xlu1 %v5998_v5, 264  ;;  %v2360_v49 = vadd.f32 %v2296_v22, %v2168_v27  ;;  %v2615_v27 = vadd.f32 %v2551_v28, %v5431_v31  ;;  %v2164_v1 = vadd.f32 %v2100_v32, %v1972_v38  ;;  %v2483_v22 = vmul.f32 %v5959_v23, %v5411_v11 }
 0x1ae   : > { %v6086_v32 = vmul.f32 %v2738_v26, %v2674_v37 }
 0x1af   : > { %1741 = vbcast.lane.b32.xlu0 %v5922_v16, 272  ;;  %v2099_v16 = vmul.f32 %v5938_v46, %v8619_v43  ;;  %v2356_v28 = vadd.f32 %v2292_v63, %v2164_v1  ;;  %v6104_v37 = vmax.f32 %v2615_v27, 1e-06  ;;  %v2299_v1 = vmul.f32 %v6018_v44, %v5323_v15 }
 0x1b0   : > { %v2492_v27 = vmul.f32 %v6044_v2, %v5411_v11 }
 0x1b1   : > { %1783 = vbcast.lane.b32.xlu1 %v5998_v5, 280  ;;  %v2163_v30 = vadd.f32 %v2099_v16, %v1971_v10  ;;  %v2108_v16 = vmul.f32 %v6015_v47, %v8619_v43  ;;  %v2552_v10 = vadd.f32 %v2488_v21, %v2360_v49  ;;  %v1892_v21 = vld [vmem:[%s4842_s8 + $0x28] sm:$0xf0]  ;;  %v2548_v49 = vadd.f32 %v2484_v61, %v2356_v28 }
 0x1b2   : > { %v2101_v61 = vmul.f32 %v5938_v46, %v8625_v13  ;;  %v1974_v28 = vmul.f32 %v5928_v25, %v8624_v57 }
 0x1b3   : > { %1752 = vbcast.lane.b32.xlu0 %v5963_v40, 256  ;;  %v2355_v38 = vadd.f32 %v2291_v39, %v2163_v30  ;;  %v2616_v30 = vadd.f32 %v2552_v10, %v5431_v31  ;;  %v2171_v39 = vadd.f32 %v2107_v4, %v1979_v29  ;;  %v2491_v10 = vmul.f32 %v6031_v19, %v5411_v11 }
 0x1b4   : > { %v6119_v4 = vrot.slane %v1892_v21, %v5913_v54  ;;  %v2102_v29 = vmul.f32 %v5941_v14, %v8625_v13  ;;  %v2293_v11 = vmul.f32 %v5952_v52, %v5357_v50  ;;  %v2612_v25 = vadd.f32 %v2548_v49, %v5447_v12 }
 0x1b5   : > { %1794 = vbcast.lane.b32.xlu1 %v6035_v0, 264  ;;  %v2547_v26 = vadd.f32 %v2483_v22, %v2355_v38  ;;  %v1973_v22 = vmul.f32 %v5925_v45, %v8624_v57  ;;  %v6129_v38 = vrot.slane %v1891_v33, %v5919_v36  ;;  %v6138_v45 = vrot.slane %v1892_v21, %v5919_v36 }
 0x1b6   : > { %v2363_v54 = vadd.f32 %v2299_v1, %v2171_v39  ;;  %v2294_v13 = vmul.f32 %v5955_v56, %v5357_v50  ;;  %v6153_v52 = vrot.slane %v1891_v33, %v5931_v59  ;;  %v6156_v49 = vrot.slane %v1892_v21, %v5931_v59 }
 0x1b7   : > { %1760 = vbcast.lane.b32.xlu0 %v5963_v40, 272  ;;  %v1980_v40 = vmul.f32 %v6005_v62, %v8638_v58  ;;  %v2300_v58 = vmul.f32 %v6038_v8, %v5323_v15  ;;  %v2611_v46 = vadd.f32 %v2547_v26, %v5447_v12  ;;  %v2111_v15 = vmul.f32 %v6129_v38, %v8630_v34 }
 0x1b8   : > { %v2112_v57 = vmul.f32 %v6138_v45, %v8630_v34  ;;  %v2555_v26 = vadd.f32 %v2491_v10, %v2363_v54  ;;  %v2165_v39 = vadd.f32 %v2101_v61, %v1973_v22  ;;  %v6162_v50 = vrot.slane %v1891_v33, %v5944_v7 }
 0x1b9   : > { %1802 = vbcast.lane.b32.xlu1 %v6035_v0, 280  ;;  %v2172_v63 = vadd.f32 %v2108_v16, %v1980_v40  ;;  %v1983_v16 = vmul.f32 %v6109_v20, %v5339_v6  ;;  %v1984_v40 = vmul.f32 %v6119_v4, %v5339_v6  ;;  %v2166_v6 = vadd.f32 %v2102_v29, %v1974_v28 }
 0x1ba   : > { %v2357_v56 = vadd.f32 %v2293_v11, %v2165_v39  ;;  %v6169_v10 = vrot.slane %v1892_v21, %v5944_v7  ;;  %v2485_v11 = vmul.f32 %v5959_v23, %v8603_v24  ;;  %v1977_v33 = vmul.f32 %v5988_v53, %v5363_v48 }
 0x1bb   : > { %1771 = vbcast.lane.b32.xlu0 %v5998_v5, 256  ;;  %v2364_v14 = vadd.f32 %v2300_v58, %v2172_v63  ;;  %v2175_v1 = vadd.f32 %v2111_v15, %v1983_v16  ;;  %v2619_v58 = vadd.f32 %v2555_v26, %v5447_v12  ;;  %v2303_v63 = vmul.f32 %v6153_v52, %v8609_v51 }
 0x1bc   : > { %v2358_v54 = vadd.f32 %v2294_v13, %v2166_v6  ;;  %v2675_v61 = vmax.f32 %v2611_v46, 1e-06  ;;  %v2676_v16 = vmax.f32 %v2612_v25, 1e-06  ;;  %v2549_v13 = vadd.f32 %v2485_v11, %v2357_v56 }
 0x1bd   : > { %1813 = vbcast.lane.b32.xlu1 %v6077_v41, 264  ;;  %v2556_v36 = vadd.f32 %v2492_v27, %v2364_v14  ;;  %v2680_v27 = vmax.f32 %v2616_v30, 1e-06  ;;  %v2367_v22 = vadd.f32 %v2303_v63, %v2175_v1  ;;  %v2495_v28 = vmul.f32 %v6162_v50, %v8613_v55  ;;  %v8654_v30 = vld [vmem:[#allocation60_spill] sm:$0xff] }
 0x1be   : > { %v1978_v21 = vmul.f32 %v6005_v62, %v5363_v48  ;;  %v2105_v23 = vmul.f32 %v5994_v18, %v8654_v30  ;;  %v2683_v29 = vmax.f32 %v2619_v58, 1e-06  ;;  %v2496_v25 = vmul.f32 %v6169_v10, %v8613_v55 }
 0x1bf   : > { %1779 = vbcast.lane.b32.xlu0 %v5998_v5, 272  ;;  %v2176_v5 = vadd.f32 %v2112_v57, %v1984_v40  ;;  %v2620_v15 = vadd.f32 %v2556_v36, %v5447_v12  ;;  %v2304_v57 = vmul.f32 %v6156_v49, %v8609_v51  ;;  %v2486_v36 = vmul.f32 %v5970_v42, %v8603_v24  ;;  %v8655_v42 = vld [vmem:[#allocation16_spill] sm:$0xff] }
 0x1c0   : > { %v2613_v14 = vadd.f32 %v2549_v13, %v8655_v42  ;;  %v2559_v26 = vadd.f32 %v2495_v28, %v2367_v22  ;;  %v2106_v39 = vmul.f32 %v6015_v47, %v8654_v30  ;;  %v2169_v1 = vadd.f32 %v2105_v23, %v1977_v33 }
 0x1c1   : > { %1821 = vbcast.lane.b32.xlu1 %v6077_v41, 280  ;;  %v2368_v6 = vadd.f32 %v2304_v57, %v2176_v5  ;;  %v2684_v40 = vmax.f32 %v2620_v15, 1e-06  ;;  %v2550_v46 = vadd.f32 %v2486_v36, %v2358_v54  ;;  %v2743_v5 = vmul.f32 %v6104_v37, %v6104_v37  ;;  %v8656_v54 = vld [vmem:[#allocation61_spill] sm:$0xff] }
 0x1c2   : > { %v2744_v56 = vmul.f32 %v2680_v27, %v2680_v27  ;;  %v2739_v63 = vmul.f32 %v2675_v61, %v2675_v61  ;;  %v2623_v58 = vadd.f32 %v2559_v26, %v5431_v31  ;;  %v2170_v15 = vadd.f32 %v2106_v39, %v1978_v21 }
 0x1c3   : > { %1790 = vbcast.lane.b32.xlu0 %v6035_v0, 256  ;;  %v2560_v57 = vadd.f32 %v2496_v25, %v2368_v6  ;;  %v2297_v11 = vmul.f32 %v6018_v44, %v8656_v54  ;;  %v2740_v22 = vmul.f32 %v2676_v16, %v2676_v16  ;;  %v2747_v36 = vmul.f32 %v2683_v29, %v2683_v29  ;;  %v8657_v25 = vld [vmem:[#allocation51_spill] sm:$0xff] }
 0x1c4   : > { %v2748_v13 = vmul.f32 %v2684_v40, %v2684_v40  ;;  %v2677_v28 = vmax.f32 %v2613_v14, 1e-06  ;;  %v2298_v23 = vmul.f32 %v6038_v8, %v8656_v54  ;;  %v2799_v21 = vmul.f32 %v6092_v60, %v6065_v17 }
 0x1c5   : > { %v2624_v33 = vadd.f32 %v2560_v57, %v5431_v31  ;;  %v2361_v6 = vadd.f32 %v2297_v11, %v2169_v1  ;;  %v2800_v26 = vmul.f32 %v6096_v35, %v6067_v9  ;;  %v2807_v39 = vmul.f32 %v2743_v5, %v6104_v37 }
 0x1c6   : > { %v2687_v30 = vmax.f32 %v2623_v58, 1e-06  ;;  %v2362_v57 = vadd.f32 %v2298_v23, %v2170_v15  ;;  %v2490_v14 = vmul.f32 %v6044_v2, %v8657_v25  ;;  %v2803_v1 = vmul.f32 %v2739_v63, %v2675_v61  ;;  %v1893_v63 = vld [vmem:[%s4842_s8 + $0x30] sm:$0xf0]  ;;  %v8661_v15 = vld [vmem:[#allocation52_spill] sm:$0xff]  ;;  %v8662_v23 = vld [vmem:[#allocation53_spill] sm:$0xff] }
 0x1c7   : > { %1798 = vbcast.lane.b32.xlu0 %v6035_v0, 272  ;;  %v2614_v0 = vadd.f32 %v2550_v46, %v8655_v42  ;;  %v2489_v46 = vmul.f32 %v6031_v19, %v8657_v25  ;;  %v2808_v42 = vmul.f32 %v2744_v56, %v2680_v27  ;;  %v2804_v11 = vmul.f32 %v2740_v22, %v2676_v16 }
 0x1c8   : > { %v2688_v31 = vmax.f32 %v2624_v33, 1e-06  ;;  %v2811_v54 = vmul.f32 %v2747_v36, %v2683_v29  ;;  %v2812_v17 = vmul.f32 %v2748_v13, %v2684_v40  ;;  %v2741_v60 = vmul.f32 %v2677_v28, %v2677_v28  ;;  %v8658_v29 = vld [vmem:[#allocation44_spill] sm:$0xff] }
 0x1c9   : > { %v2678_v24 = vmax.f32 %v2614_v0, 1e-06  ;;  %v2553_v19 = vadd.f32 %v2489_v46, %v2361_v6  ;;  %v6211_v9 = vadd.f32 %v6086_v32, %v6079_v3  ;;  %v6213_v35 = vadd.f32 %v2800_v26, %v2799_v21  ;;  %v8659_v3 = vld [vmem:[#allocation85_spill] sm:$0xff]  ;;  %v1894_v46 = vld [vmem:[%s4842_s8 + $0x38] sm:$0xf0] }
 0x1ca   : > { %v2115_v37 = vmul.f32 %v6129_v38, %v8619_v43  ;;  %v6217_v27 = vadd.f32 %v2808_v42, %v2807_v39  ;;  %v2751_v61 = vmul.f32 %v2687_v30, %v2687_v30  ;;  %v2554_v16 = vadd.f32 %v2490_v14, %v2362_v57 }
 0x1cb   : > { %1809 = vbcast.lane.b32.xlu0 %v6077_v41, 256  ;;  %v2752_v5 = vmul.f32 %v2688_v31, %v2688_v31  ;;  %v1987_v40 = vmul.f32 %v6109_v20, %v8658_v29  ;;  %v2116_v56 = vmul.f32 %v6138_v45, %v8619_v43  ;;  %v2307_v32 = vmul.f32 %v6153_v52, %v8659_v3 }
 0x1cc   : > { %v6226_v0 = vadd.f32 %v2804_v11, %v2803_v1  ;;  %v6228_v58 = vadd.f32 %v2812_v17, %v2811_v54  ;;  %v6230_v42 = vmul.f32 %v2741_v60, %v2677_v28  ;;  %v2617_v22 = vadd.f32 %v2553_v19, %v8661_v15  ;;  %v8663_v28 = vld [vmem:[#allocation17_spill] sm:$0xff] }
 0x1cd   : > { %v1988_v36 = vmul.f32 %v6119_v4, %v8658_v29  ;;  %v2179_v13 = vadd.f32 %v2115_v37, %v1987_v40  ;;  %v2308_v33 = vmul.f32 %v6156_v49, %v8659_v3  ;;  %v2499_v6 = vmul.f32 %v6162_v50, %v8662_v23  ;;  %v8665_v60 = vld [vmem:[#allocation81_spill] sm:$0xff] }
 0x1ce   : > { %8660 = vst [vmem:[#allocation14_spill] sm:$0xff] %v6226_v0  ;;  %v6242_v26 = vmul.f32 %v2751_v61, %v2687_v30  ;;  %v2618_v54 = vadd.f32 %v2554_v16, %v8661_v15  ;;  %v6246_v39 = vrot.slane %v1893_v63, %v8663_v28  ;;  %v6248_v19 = vmul.f32 %v2752_v5, %v2688_v31  ;;  %v8666_v31 = vld [vmem:[#allocation54_spill] sm:$0xff]  ;;  %v8667_v5 = vld [vmem:[#allocation55_spill] sm:$0xff] }
 0x1cf   : > { %1817 = vbcast.lane.b32.xlu0 %v6077_v41, 272  ;;  %v2742_v41 = vmul.f32 %v2678_v24, %v2678_v24  ;;  %v2180_v57 = vadd.f32 %v2116_v56, %v1988_v36  ;;  %v2371_v14 = vadd.f32 %v2307_v32, %v2179_v13  ;;  %v2500_v1 = vmul.f32 %v6169_v10, %v8662_v23 }
 0x1d0   : > { %v6252_v11 = vmax.f32 %v2617_v22, 1e-06  ;;  %v6255_v17 = vrot.slane %v1894_v46, %v8663_v28  ;;  %v6260_v37 = vrot.slane %v1893_v63, %v8665_v60  ;;  %v1981_v16 = vmul.f32 %v5988_v53, %v8666_v31 }
 0x1d1   : > { %v6240_v21 = vmul.f32 %v2742_v41, %v2678_v24  ;;  %v8664_v24 = vld [vmem:[#allocation90_spill] sm:$0xff]  ;;  %v2372_v41 = vadd.f32 %v2308_v33, %v2180_v57  ;;  %v2563_v61 = vadd.f32 %v2499_v6, %v2371_v14  ;;  %v2109_v40 = vmul.f32 %v5994_v18, %v8667_v5  ;;  %v8668_v18 = vld [vmem:[#allocation91_spill] sm:$0xff] }
 0x1d2   : > { %v1991_v30 = vmul.f32 %v6246_v39, %v8664_v24  ;;  %v1992_v56 = vmul.f32 %v6255_v17, %v8664_v24  ;;  %v6269_v32 = vrot.slane %v1894_v46, %v8665_v60  ;;  %v2119_v22 = vmul.f32 %v6260_v37, %v8630_v34 }
 0x1d3   : > { %v6274_v36 = vrot.slane %v1893_v63, %v5931_v59  ;;  %v2564_v13 = vadd.f32 %v2500_v1, %v2372_v41  ;;  %v1982_v33 = vmul.f32 %v6005_v62, %v8666_v31  ;;  %v2110_v53 = vmul.f32 %v6015_v47, %v8667_v5 }
 0x1d4   : > { %v2301_v6 = vmul.f32 %v6018_v44, %v8668_v18  ;;  %v2120_v57 = vmul.f32 %v6269_v32, %v8630_v34  ;;  %v2183_v14 = vadd.f32 %v2119_v22, %v1991_v30  ;;  %v6285_v60 = vrot.slane %v1894_v46, %v5931_v59 }
 0x1d5   : > { %v2311_v24 = vmul.f32 %v6274_v36, %v8609_v51  ;;  %v2627_v1 = vadd.f32 %v2563_v61, %v5447_v12  ;;  %v2628_v62 = vadd.f32 %v2564_v13, %v5447_v12  ;;  %v2173_v41 = vadd.f32 %v2109_v40, %v1981_v16  ;;  %v8669_v13 = vld [vmem:[#allocation60_spill] sm:$0xff] }
 0x1d6   : > { %v2302_v47 = vmul.f32 %v6038_v8, %v8668_v18  ;;  %v2184_v28 = vadd.f32 %v2120_v57, %v1992_v56  ;;  %v2312_v44 = vmul.f32 %v6285_v60, %v8609_v51  ;;  %v6296_v30 = vrot.slane %v1893_v63, %v5944_v7  ;;  %v8671_v57 = vld [vmem:[#allocation19_spill] sm:$0xff] }
 0x1d7   : > { %v2375_v34 = vadd.f32 %v2311_v24, %v2183_v14  ;;  %v6298_v22 = vmax.f32 %v2618_v54, 1e-06  ;;  %v2174_v59 = vadd.f32 %v2110_v53, %v1982_v33  ;;  %v6301_v0 = vrot.slane %v1894_v46, %v5944_v7  ;;  %v8670_v53 = vld [vmem:[#allocation78_spill] sm:$0xff] }
 0x1d8   : > { %v1985_v61 = vmul.f32 %v6109_v20, %v5363_v48  ;;  %v2365_v16 = vadd.f32 %v2301_v6, %v2173_v41  ;;  %v2376_v40 = vadd.f32 %v2312_v44, %v2184_v28  ;;  %v2503_v8 = vmul.f32 %v6296_v30, %v8613_v55 }
 0x1d9   : > { %v1986_v24 = vmul.f32 %v6119_v4, %v5363_v48  ;;  %v2691_v56 = vmax.f32 %v2627_v1, 1e-06  ;;  %v2366_v63 = vadd.f32 %v2302_v47, %v2174_v59  ;;  %v2504_v54 = vmul.f32 %v6301_v0, %v8613_v55  ;;  %v8672_v59 = vld [vmem:[#allocation61_spill] sm:$0xff]  ;;  %v8673_v55 = vld [vmem:[#allocation66_spill] sm:$0xff] }
 0x1da   : > { %v2113_v46 = vmul.f32 %v6129_v38, %v8669_v13  ;;  %v2692_v33 = vmax.f32 %v2628_v62, 1e-06  ;;  %v2493_v14 = vmul.f32 %v8671_v57, %v8670_v53  ;;  %v2567_v6 = vadd.f32 %v2503_v8, %v2375_v34  ;;  %v6325_v8 = vpop.xlane.xlu1 %1379 }
 0x1db   : > { %v2114_v28 = vmul.f32 %v6138_v45, %v8669_v13  ;;  %v2494_v41 = vmul.f32 %v6044_v2, %v8670_v53  ;;  %v2568_v44 = vadd.f32 %v2504_v54, %v2376_v40  ;;  %v2305_v47 = vmul.f32 %v6153_v52, %v8672_v59  ;;  %8674 = vst [vmem:[#allocation15_spill] sm:$0xff] %v6325_v8 }
 0x1dc   : > { %v2177_v1 = vadd.f32 %v2113_v46, %v1985_v61  ;;  %v2557_v48 = vadd.f32 %v2493_v14, %v2365_v16  ;;  %v2631_v62 = vadd.f32 %v2567_v6, %v8673_v55  ;;  %v2306_v34 = vmul.f32 %v6156_v49, %v8672_v59 }
 0x1dd   : > { %v2178_v7 = vadd.f32 %v2114_v28, %v1986_v24  ;;  %v2558_v57 = vadd.f32 %v2494_v41, %v2366_v63  ;;  %v2632_v13 = vadd.f32 %v2568_v44, %v8673_v55  ;;  %v2497_v61 = vmul.f32 %v6162_v50, %v8657_v25 }
 0x1de   : > { %v2369_v2 = vadd.f32 %v2305_v47, %v2177_v1  ;;  %v2745_v40 = vmul.f32 %v6252_v11, %v6252_v11  ;;  %v2498_v24 = vmul.f32 %v6169_v10, %v8657_v25  ;;  %v6337_v46 = vadd.f32 %v6240_v21, %v6230_v42 }
 0x1df   : > { %v2370_v54 = vadd.f32 %v2306_v34, %v2178_v7  ;;  %v2695_v14 = vmax.f32 %v2631_v62, 1e-06  ;;  %v2123_v6 = vmul.f32 %v6260_v37, %v8619_v43  ;;  %v2887_v28 = vadd.f32 %v6248_v19, %v6242_v26  ;;  %v6356_v19 = vpop.xlane.xlu1 %1388 }
 0x1e0   : > { %v2696_v7 = vmax.f32 %v2632_v13, 1e-06  ;;  %v2124_v41 = vmul.f32 %v6269_v32, %v8619_v43  ;;  %v2755_v42 = vmul.f32 %v2691_v56, %v2691_v56  ;;  %v2756_v21 = vmul.f32 %v2692_v33, %v2692_v33  ;;  %8676 = vst [vmem:[#allocation20_spill] sm:$0xff] %v6356_v19 }
 0x1e1   : > { %v2561_v44 = vadd.f32 %v2497_v61, %v2369_v2  ;;  %v1995_v1 = vmul.f32 %v6246_v39, %v8658_v29  ;;  %v6352_v47 = vmul.f32 %v2745_v40, %v6252_v11  ;;  %v2562_v62 = vadd.f32 %v2498_v24, %v2370_v54  ;;  %v6360_v2 = vpop.xlane.xlu0 %1376 }
 0x1e2   : > { %v1996_v26 = vmul.f32 %v6255_v17, %v8658_v29  ;;  %v2759_v34 = vmul.f32 %v2695_v14, %v2695_v14  ;;  %v2315_v8 = vmul.f32 %v6274_v36, %v8659_v3  ;;  %8677 = vst [vmem:[#allocation58_spill] sm:$0xff] %v6360_v2  ;;  %v2760_v61 = vmul.f32 %v2696_v7, %v2696_v7 }
 0x1e3   : > { %v2316_v40 = vmul.f32 %v6285_v60, %v8659_v3  ;;  %v2819_v54 = vmul.f32 %v2755_v42, %v2691_v56  ;;  %v2820_v24 = vmul.f32 %v2756_v21, %v2692_v33  ;;  %v2626_v19 = vadd.f32 %v2562_v62, %v8661_v15  ;;  %v6378_v42 = vpop.xlane.xlu1 %1394 }
 0x1e4   : > { %v2188_v11 = vadd.f32 %v2124_v41, %v1996_v26  ;;  %v2823_v26 = vmul.f32 %v2759_v34, %v2695_v14  ;;  %v1989_v29 = vmul.f32 %v6109_v20, %v8666_v31  ;;  %v2824_v56 = vmul.f32 %v2760_v61, %v2696_v7  ;;  %8678 = vst [vmem:[#allocation21_spill] sm:$0xff] %v6378_v42 }
 0x1e5   : > { %2867 = vadd.xlane.f32.xlu1 %v6211_v9  ;;  %v8675_v9 = vld [vmem:[#allocation16_spill] sm:$0xff]  ;;  %v2118_v62 = vmul.f32 %v6138_v45, %v8667_v5  ;;  %v6384_v20 = vpop.xlane.xlu0 %1382  ;;  %v2690_v34 = vmax.f32 %v2626_v19, 1e-06 }
 0x1e6   : > { %v2621_v16 = vadd.f32 %v2557_v48, %v8675_v9  ;;  %v2622_v63 = vadd.f32 %v2558_v57, %v8675_v9  ;;  %v2746_v48 = vmul.f32 %v6298_v22, %v6298_v22  ;;  %v2187_v57 = vadd.f32 %v2123_v6, %v1995_v1  ;;  %8679 = vst [vmem:[#allocation59_spill] sm:$0xff] %v6384_v20 }
 0x1e7   : > { %v2380_v2 = vadd.f32 %v2316_v40, %v2188_v11  ;;  %v2310_v11 = vmul.f32 %v6156_v49, %v8668_v18  ;;  %v1895_v40 = vld [vmem:[%s4842_s8 + $0x40] sm:$0xf0] }
 0x1e8   : > { %v2686_v13 = vmax.f32 %v2622_v63, 1e-06  ;;  %v2625_v63 = vadd.f32 %v2561_v44, %v8661_v15  ;;  %v2379_v6 = vadd.f32 %v2315_v8, %v2187_v57  ;;  %v1990_v8 = vmul.f32 %v6119_v4, %v8666_v31 }
 0x1e9   : > { %2876 = vadd.xlane.f32.xlu1 %v6217_v27  ;;  %v2685_v27 = vmax.f32 %v2621_v16, 1e-06  ;;  %v2507_v16 = vmul.f32 %v6296_v30, %v8662_v23  ;;  %v2810_v21 = vmul.f32 %v2746_v48, %v6298_v22  ;;  %v2893_v4 = vadd.f32 %v2820_v24, %v2819_v54 }
 0x1ea   : > { %v2750_v41 = vmul.f32 %v2686_v13, %v2686_v13  ;;  %v2689_v44 = vmax.f32 %v2625_v63, 1e-06  ;;  %v2899_v48 = vadd.f32 %v2824_v56, %v2823_v26  ;;  %v2182_v61 = vadd.f32 %v2118_v62, %v1990_v8  ;;  %v6407_v56 = vpop.xlane.xlu0 %1385 }
 0x1eb   : > { %v2749_v1 = vmul.f32 %v2685_v27, %v2685_v27  ;;  %v2571_v3 = vadd.f32 %v2507_v16, %v2379_v6  ;;  %v1896_v16 = vld [vmem:[%s4842_s8 + $0x48] sm:$0xf0]  ;;  %v2502_v63 = vmul.f32 %v6169_v10, %v8670_v53  ;;  %v6399_v6 = vpop.xlane.xlu1 %1400  ;;  %8683 = vst [vmem:[#allocation56_spill] sm:$0xff] %v6407_v56 }
 0x1ec   : > { %v2814_v57 = vmul.f32 %v2750_v41, %v2686_v13  ;;  %v2753_v54 = vmul.f32 %v2689_v44, %v2689_v44  ;;  %v2501_v13 = vmul.f32 %v6162_v50, %v8670_v53  ;;  %8681 = vst [vmem:[#allocation83_spill] sm:$0xff] %v6399_v6  ;;  %v2878_v50 = vadd.f32 %v2810_v21, %v6352_v47  ;;  %v8684_v10 = vld [vmem:[#allocation90_spill] sm:$0xff] }
 0x1ed   : > { %2882 = vadd.xlane.f32.xlu1 %v6228_v58  ;;  %v2508_v58 = vmul.f32 %v6301_v0, %v8662_v23  ;;  %v2635_v14 = vadd.f32 %v2571_v3, %v5447_v12  ;;  %v2813_v7 = vmul.f32 %v2749_v1, %v2685_v27  ;;  %v2309_v3 = vmul.f32 %v6153_v52, %v8668_v18 }
 0x1ee   : > { %2864 = vadd.xlane.f32.xlu0 %v6213_v35  ;;  %v2117_v35 = vmul.f32 %v6129_v38, %v8667_v5  ;;  %v2374_v52 = vadd.f32 %v2310_v11, %v2182_v61 }
 0x1ef   : > { %v2572_v33 = vadd.f32 %v2508_v58, %v2380_v2  ;;  %v2699_v2 = vmax.f32 %v2635_v14, 1e-06  ;;  %v8682_v58 = vld [vmem:[#allocation17_spill] sm:$0xff]  ;;  %v2884_v21 = vadd.f32 %v2814_v57, %v2813_v7 }
 0x1f0   : > { %v2181_v22 = vadd.f32 %v2117_v35, %v1989_v29  ;;  %v2754_v29 = vmul.f32 %v2690_v34, %v2690_v34  ;;  %v6402_v41 = vrot.slane %v1895_v40, %v8682_v58  ;;  %v6405_v26 = vrot.slane %v1896_v16, %v8682_v58 }
 0x1f1   : > { %2888 = vadd.xlane.f32.xlu1 %v2887_v28  ;;  %v8680_v28 = vld [vmem:[#allocation14_spill] sm:$0xff]  ;;  %v2636_v38 = vadd.f32 %v2572_v33, %v5447_v12  ;;  %v2763_v27 = vmul.f32 %v2699_v2, %v2699_v2  ;;  %v2566_v33 = vadd.f32 %v2502_v63, %v2374_v52 }
 0x1f2   : > { %2870 = vadd.xlane.f32.xlu0 %v8680_v28  ;;  %v2373_v19 = vadd.f32 %v2309_v3, %v2181_v22  ;;  %v1999_v35 = vmul.f32 %v6402_v41, %v8684_v10  ;;  %v2000_v14 = vmul.f32 %v6405_v26, %v8684_v10  ;;  %v2818_v22 = vmul.f32 %v2754_v29, %v2690_v34  ;;  %v8690_v63 = vld [vmem:[#allocation18_spill] sm:$0xff] }
 0x1f3   : > { %v2700_v45 = vmax.f32 %v2636_v38, 1e-06  ;;  %v2827_v1 = vmul.f32 %v2763_v27, %v2699_v2  ;;  %v2630_v28 = vadd.f32 %v2566_v33, %v8675_v9  ;;  %v2817_v2 = vmul.f32 %v2753_v54, %v2689_v44  ;;  %v8687_v27 = vld [vmem:[#allocation82_spill] sm:$0xff]  ;;  %v6434_v44 = vpop.xlane.xlu0 %1391 }
 0x1f4   : > { %v2565_v49 = vadd.f32 %v2501_v13, %v2373_v19  ;;  %v6427_v19 = vrot.slane %v1895_v40, %v8687_v27  ;;  %v6429_v13 = vpop.xlane.xlu1 %1406  ;;  %v6432_v52 = vrot.slane %v1896_v16, %v8687_v27  ;;  %8689 = vst [vmem:[#allocation57_spill] sm:$0xff] %v6434_v44 }
 0x1f5   : > { %2894 = vadd.xlane.f32.xlu1 %v2893_v4  ;;  %v2764_v24 = vmul.f32 %v2700_v45, %v2700_v45  ;;  %v8685_v4 = vld [vmem:[#allocation81_spill] sm:$0xff]  ;;  %8688 = vst [vmem:[#allocation84_spill] sm:$0xff] %v6429_v13 }
 0x1f6   : > { %2873 = vadd.xlane.f32.xlu0 %v6337_v46  ;;  %v2629_v8 = vadd.f32 %v2565_v49, %v8675_v9  ;;  %v6417_v38 = vrot.slane %v1895_v40, %v8685_v4  ;;  %v6420_v47 = vrot.slane %v1896_v16, %v8685_v4  ;;  %v2319_v54 = vmul.f32 %v6427_v19, %v8609_v51 }
 0x1f7   : > { %v2828_v46 = vmul.f32 %v2764_v24, %v2700_v45  ;;  %v8686_v45 = vld [vmem:[#allocation45_spill] sm:$0xff]  ;;  %v2320_v29 = vmul.f32 %v6432_v52, %v8609_v51  ;;  %v6444_v49 = vrot.slane %v1896_v16, %v8690_v63 }
 0x1f8   : > { %v2693_v3 = vmax.f32 %v2629_v8, 1e-06  ;;  %v2127_v61 = vmul.f32 %v6417_v38, %v8686_v45  ;;  %v2128_v11 = vmul.f32 %v6420_v47, %v8686_v45  ;;  %v6454_v16 = vpop.xlane.xlu1 %1412 }
 0x1f9   : > { %2900 = vadd.xlane.f32.xlu1 %v2899_v48  ;;  %v2905_v62 = vadd.f32 %v2828_v46, %v2827_v1  ;;  %v2694_v48 = vmax.f32 %v2630_v28, 1e-06  ;;  %v6441_v1 = vrot.slane %v1895_v40, %v8690_v63  ;;  %v8691_v28 = vld [vmem:[#allocation76_spill] sm:$0xff]  ;;  %8693 = vst [vmem:[#allocation86_spill] sm:$0xff] %v6454_v16 }
 0x1fa   : > { %2879 = vadd.xlane.f32.xlu0 %v2878_v50  ;;  %v2757_v24 = vmul.f32 %v2693_v3, %v2693_v3  ;;  %v2191_v34 = vadd.f32 %v2127_v61, %v1999_v35  ;;  %v2192_v57 = vadd.f32 %v2128_v11, %v2000_v14  ;;  %v2890_v50 = vadd.f32 %v2818_v22, %v2817_v2 }
 0x1fb   : > { %v2758_v7 = vmul.f32 %v2694_v48, %v2694_v48  ;;  %v2511_v35 = vmul.f32 %v6441_v1, %v8691_v28  ;;  %v2512_v14 = vmul.f32 %v6444_v49, %v8691_v28 }
 0x1fc   : > { %v2821_v46 = vmul.f32 %v2757_v24, %v2693_v3  ;;  %v2383_v8 = vadd.f32 %v2319_v54, %v2191_v34  ;;  %v8694_v3 = vld [vmem:[#allocation60_spill] sm:$0xff]  ;;  %v6460_v24 = vpop.xlane.xlu0 %1397  ;;  %v2313_v34 = vmul.f32 %v6274_v36, %v8672_v59  ;;  %v2505_v54 = vmul.f32 %v6296_v30, %v8657_v25 }
 0x1fd   : > { %2906 = vadd.xlane.f32.xlu1 %v2905_v62  ;;  %v2822_v33 = vmul.f32 %v2758_v7, %v2694_v48  ;;  %v2384_v62 = vadd.f32 %v2320_v29, %v2192_v57  ;;  %v2121_v48 = vmul.f32 %v6260_v37, %v8694_v3  ;;  %v2122_v11 = vmul.f32 %v6269_v32, %v8694_v3 }
 0x1fe   : > { %2885 = vadd.xlane.f32.xlu0 %v2884_v21  ;;  %v8692_v21 = vld [vmem:[#allocation50_spill] sm:$0xff]  ;;  %v2575_v2 = vadd.f32 %v2511_v35, %v2383_v8  ;;  %8695 = vst [vmem:[#allocation87_spill] sm:$0xff] %v6460_v24  ;;  %v2314_v57 = vmul.f32 %v6285_v60, %v8672_v59  ;;  %v2506_v35 = vmul.f32 %v6301_v0, %v8657_v25  ;;  %v6472_v24 = vpop.xlane.xlu1 %1418 }
 0x1ff   : > { %v1993_v61 = vmul.f32 %v6246_v39, %v8692_v21  ;;  %v1994_v40 = vmul.f32 %v6255_v17, %v8692_v21  ;;  %v2576_v22 = vadd.f32 %v2512_v14, %v2384_v62  ;;  %v2896_v7 = vadd.f32 %v2822_v33, %v2821_v46  ;;  %8696 = vst [vmem:[#allocation79_spill] sm:$0xff] %v6472_v24 }
 0x200   : > { %v2639_v29 = vadd.f32 %v2575_v2, %v8673_v55  ;;  %v6474_v6 = vpop.xlane.xlu0 %1403 }
 0x201   : > { %v2185_v8 = vadd.f32 %v2121_v48, %v1993_v61  ;;  %v2186_v62 = vadd.f32 %v2122_v11, %v1994_v40  ;;  %8697 = vst [vmem:[#allocation67_spill] sm:$0xff] %v6474_v6  ;;  %v2131_v61 = vmul.f32 %v6417_v38, %v8619_v43  ;;  %v8698_v48 = vld [vmem:[#allocation44_spill] sm:$0xff] }
 0x202   : > { %2891 = vadd.xlane.f32.xlu0 %v2890_v50  ;;  %v2640_v50 = vadd.f32 %v2576_v22, %v8673_v55  ;;  %v2703_v46 = vmax.f32 %v2639_v29, 1e-06  ;;  %v2003_v11 = vmul.f32 %v6402_v41, %v8698_v48 }
 0x203   : > { %v2377_v14 = vadd.f32 %v2313_v34, %v2185_v8  ;;  %v2378_v16 = vadd.f32 %v2314_v57, %v2186_v62  ;;  %v8699_v62 = vld [vmem:[#allocation85_spill] sm:$0xff] }
 0x204   : > { %v2704_v33 = vmax.f32 %v2640_v50, 1e-06  ;;  %v2767_v13 = vmul.f32 %v2703_v46, %v2703_v46 }
 0x205   : > { %v2569_v56 = vadd.f32 %v2505_v54, %v2377_v14  ;;  %v2570_v2 = vadd.f32 %v2506_v35, %v2378_v16  ;;  %v2004_v54 = vmul.f32 %v6405_v26, %v8698_v48  ;;  %v2195_v16 = vadd.f32 %v2131_v61, %v2003_v11  ;;  %v6490_v35 = vpop.xlane.xlu1 %1424  ;;  %v6496_v14 = vpop.xlane.xlu0 %1409 }
 0x206   : > { %2897 = vadd.xlane.f32.xlu0 %v2896_v7  ;;  %v2768_v44 = vmul.f32 %v2704_v33, %v2704_v33  ;;  %v2831_v40 = vmul.f32 %v2767_v13, %v2703_v46  ;;  %v2132_v7 = vmul.f32 %v6420_v47, %v8619_v43  ;;  %v2323_v13 = vmul.f32 %v6427_v19, %v8699_v62 }
 0x207   : > { %v2633_v34 = vadd.f32 %v2569_v56, %v8661_v15  ;;  %v2634_v57 = vadd.f32 %v2570_v2, %v8661_v15  ;;  %8700 = vst [vmem:[#allocation80_spill] sm:$0xff] %v6490_v35  ;;  %v2515_v56 = vmul.f32 %v6441_v1, %v8662_v23  ;;  %8701 = vst [vmem:[#allocation68_spill] sm:$0xff] %v6496_v14 }
 0x208   : > { %v2832_v22 = vmul.f32 %v2768_v44, %v2704_v33  ;;  %v2324_v44 = vmul.f32 %v6432_v52, %v8699_v62  ;;  %v2196_v46 = vadd.f32 %v2132_v7, %v2004_v54  ;;  %v2516_v33 = vmul.f32 %v6444_v49, %v8662_v23 }
 0x209   : > { %v2697_v50 = vmax.f32 %v2633_v34, 1e-06  ;;  %v2698_v8 = vmax.f32 %v2634_v57, 1e-06  ;;  %v1997_v11 = vmul.f32 %v6246_v39, %v8666_v31  ;;  %v1998_v34 = vmul.f32 %v6255_v17, %v8666_v31 }
 0x20a   : > { %v2911_v29 = vadd.f32 %v2832_v22, %v2831_v40  ;;  %v2387_v40 = vadd.f32 %v2323_v13, %v2195_v16  ;;  %v2388_v22 = vadd.f32 %v2324_v44, %v2196_v46  ;;  %v2125_v7 = vmul.f32 %v6260_v37, %v8667_v5  ;;  %v6511_v37 = vpop.xlane.xlu1 %1430  ;;  %v1897_v46 = vld [vmem:[%s4842_s8 + $0x50] sm:$0xf0] }
 0x20b   : > { %v2761_v2 = vmul.f32 %v2697_v50, %v2697_v50  ;;  %v2762_v61 = vmul.f32 %v2698_v8, %v2698_v8  ;;  %v2126_v14 = vmul.f32 %v6269_v32, %v8667_v5  ;;  %v2317_v16 = vmul.f32 %v6274_v36, %v8668_v18  ;;  %8702 = vst [vmem:[#allocation69_spill] sm:$0xff] %v6511_v37 }
 0x20c   : > { %2912 = vadd.xlane.f32.xlu1 %v2911_v29  ;;  %v2579_v54 = vadd.f32 %v2515_v56, %v2387_v40  ;;  %v2580_v35 = vadd.f32 %v2516_v33, %v2388_v22  ;;  %v2189_v24 = vadd.f32 %v2125_v7, %v1997_v11  ;;  %v2318_v17 = vmul.f32 %v6285_v60, %v8668_v18  ;;  %v6517_v56 = vpop.xlane.xlu0 %1415  ;;  %v1898_v40 = vld [vmem:[%s4842_s8 + $0x58] sm:$0xf0] }
 0x20d   : > { %v2825_v57 = vmul.f32 %v2761_v2, %v2697_v50  ;;  %v2826_v29 = vmul.f32 %v2762_v61, %v2698_v8  ;;  %v2190_v8 = vadd.f32 %v2126_v14, %v1998_v34  ;;  %v2509_v32 = vmul.f32 %v6296_v30, %v8670_v53  ;;  %8703 = vst [vmem:[#allocation70_spill] sm:$0xff] %v6517_v56 }
 0x20e   : > { %v2643_v39 = vadd.f32 %v2579_v54, %v5447_v12  ;;  %v2644_v50 = vadd.f32 %v2580_v35, %v5447_v12  ;;  %v2381_v44 = vadd.f32 %v2317_v16, %v2189_v24  ;;  %v2510_v61 = vmul.f32 %v6301_v0, %v8670_v53  ;;  %v6534_v0 = vpop.xlane.xlu1 %1436 }
 0x20f   : > { %v2902_v13 = vadd.f32 %v2826_v29, %v2825_v57  ;;  %v2382_v2 = vadd.f32 %v2318_v17, %v2190_v8  ;;  %v6523_v35 = vrot.slane %v1897_v46, %v8682_v58  ;;  %v6527_v34 = vrot.slane %v1898_v40, %v8682_v58  ;;  %8704 = vst [vmem:[#allocation24_spill] sm:$0xff] %v6534_v0 }
 0x210   : > { %v2707_v36 = vmax.f32 %v2643_v39, 1e-06  ;;  %v2708_v33 = vmax.f32 %v2644_v50, 1e-06  ;;  %v2573_v60 = vadd.f32 %v2509_v32, %v2381_v44  ;;  %v6532_v57 = vrot.slane %v1897_v46, %v8685_v4 }
 0x211   : > { %2903 = vadd.xlane.f32.xlu0 %v2902_v13  ;;  %v2574_v14 = vadd.f32 %v2510_v61, %v2382_v2  ;;  %v2007_v7 = vmul.f32 %v6523_v35, %v8684_v10  ;;  %v6537_v13 = vpop.xlane.xlu0 %1421  ;;  %v2008_v39 = vmul.f32 %v6527_v34, %v8684_v10  ;;  %v6542_v17 = vrot.slane %v1898_v40, %v8685_v4 }
 0x212   : > { %v2771_v22 = vmul.f32 %v2707_v36, %v2707_v36  ;;  %v2772_v24 = vmul.f32 %v2708_v33, %v2708_v33  ;;  %v2637_v30 = vadd.f32 %v2573_v60, %v8675_v9  ;;  %8705 = vst [vmem:[#allocation25_spill] sm:$0xff] %v6537_v13  ;;  %v2135_v50 = vmul.f32 %v6532_v57, %v8686_v45 }
 0x213   : > { %v2638_v54 = vadd.f32 %v2574_v14, %v8675_v9  ;;  %v6547_v8 = vrot.slane %v1897_v46, %v8687_v27  ;;  %v6552_v61 = vrot.slane %v1898_v40, %v8687_v27  ;;  %v6557_v14 = vrot.slane %v1897_v46, %v8690_v63 }
 0x214   : > { %v2835_v11 = vmul.f32 %v2771_v22, %v2707_v36  ;;  %v2836_v29 = vmul.f32 %v2772_v24, %v2708_v33  ;;  %v2701_v16 = vmax.f32 %v2637_v30, 1e-06  ;;  %v2136_v33 = vmul.f32 %v6542_v17, %v8686_v45 }
 0x215   : > { %v2702_v32 = vmax.f32 %v2638_v54, 1e-06  ;;  %v2199_v2 = vadd.f32 %v2135_v50, %v2007_v7  ;;  %v2327_v60 = vmul.f32 %v6547_v8, %v8609_v51  ;;  %v6562_v54 = vrot.slane %v1898_v40, %v8690_v63  ;;  %v6564_v7 = vpop.xlane.xlu1 %1442 }
 0x216   : > { %v2917_v44 = vadd.f32 %v2836_v29, %v2835_v11  ;;  %v2765_v36 = vmul.f32 %v2701_v16, %v2701_v16  ;;  %v2200_v30 = vadd.f32 %v2136_v33, %v2008_v39  ;;  %v2328_v11 = vmul.f32 %v6552_v61, %v8609_v51  ;;  %8706 = vst [vmem:[#allocation26_spill] sm:$0xff] %v6564_v7 }
 0x217   : > { %v2766_v22 = vmul.f32 %v2702_v32, %v2702_v32  ;;  %v2391_v29 = vadd.f32 %v2327_v60, %v2199_v2  ;;  %v2519_v0 = vmul.f32 %v6557_v14, %v8691_v28  ;;  %v2520_v46 = vmul.f32 %v6562_v54, %v8691_v28 }
 0x218   : > { %2918 = vadd.xlane.f32.xlu1 %v2917_v44  ;;  %v2829_v24 = vmul.f32 %v2765_v36, %v2701_v16  ;;  %v6568_v44 = vpop.xlane.xlu0 %1427  ;;  %v2392_v16 = vadd.f32 %v2328_v11, %v2200_v30  ;;  %v2001_v39 = vmul.f32 %v6402_v41, %v8692_v21  ;;  %v2002_v36 = vmul.f32 %v6405_v26, %v8692_v21 }
 0x219   : > { %v2830_v50 = vmul.f32 %v2766_v22, %v2702_v32  ;;  %8707 = vst [vmem:[#allocation88_spill] sm:$0xff] %v6568_v44  ;;  %v2583_v33 = vadd.f32 %v2519_v0, %v2391_v29  ;;  %v2129_v32 = vmul.f32 %v6417_v38, %v8694_v3  ;;  %v2130_v2 = vmul.f32 %v6420_v47, %v8694_v3  ;;  %v6594_v44 = vpop.xlane.xlu1 %1448 }
 0x21a   : > { %v2584_v60 = vadd.f32 %v2520_v46, %v2392_v16  ;;  %v2321_v22 = vmul.f32 %v6427_v19, %v8672_v59  ;;  %v2322_v30 = vmul.f32 %v6432_v52, %v8672_v59  ;;  %v2513_v11 = vmul.f32 %v6441_v1, %v8657_v25  ;;  %8708 = vst [vmem:[#allocation89_spill] sm:$0xff] %v6594_v44 }
 0x21b   : > { %v2908_v40 = vadd.f32 %v2830_v50, %v2829_v24  ;;  %v2647_v24 = vadd.f32 %v2583_v33, %v8673_v55  ;;  %v2193_v0 = vadd.f32 %v2129_v32, %v2001_v39  ;;  %v2194_v29 = vadd.f32 %v2130_v2, %v2002_v36 }
 0x21c   : > { %v2514_v50 = vmul.f32 %v6444_v49, %v8657_v25  ;;  %v2648_v7 = vadd.f32 %v2584_v60, %v8673_v55  ;;  %v2011_v16 = vmul.f32 %v6523_v35, %v8698_v48  ;;  %v2012_v46 = vmul.f32 %v6527_v34, %v8698_v48  ;;  %v6598_v36 = vpop.xlane.xlu0 %1433 }
 0x21d   : > { %2909 = vadd.xlane.f32.xlu0 %v2908_v40  ;;  %v2711_v13 = vmax.f32 %v2647_v24, 1e-06  ;;  %v2385_v37 = vadd.f32 %v2321_v22, %v2193_v0  ;;  %v2386_v40 = vadd.f32 %v2322_v30, %v2194_v29  ;;  %v2139_v39 = vmul.f32 %v6532_v57, %v8619_v43  ;;  %8709 = vst [vmem:[#allocation27_spill] sm:$0xff] %v6598_v36 }
 0x21e   : > { %v2712_v33 = vmax.f32 %v2648_v7, 1e-06  ;;  %v2140_v32 = vmul.f32 %v6542_v17, %v8619_v43  ;;  %v2331_v2 = vmul.f32 %v6547_v8, %v8699_v62  ;;  %v2332_v60 = vmul.f32 %v6552_v61, %v8699_v62 }
 0x21f   : > { %v2775_v56 = vmul.f32 %v2711_v13, %v2711_v13  ;;  %v2577_v44 = vadd.f32 %v2513_v11, %v2385_v37  ;;  %v2578_v24 = vadd.f32 %v2514_v50, %v2386_v40  ;;  %v2203_v22 = vadd.f32 %v2139_v39, %v2011_v16  ;;  %v6614_v11 = vpop.xlane.xlu1 %1454 }
 0x220   : > { %v2776_v30 = vmul.f32 %v2712_v33, %v2712_v33  ;;  %v2204_v0 = vadd.f32 %v2140_v32, %v2012_v46  ;;  %v2523_v29 = vmul.f32 %v6557_v14, %v8662_v23  ;;  %v2524_v7 = vmul.f32 %v6562_v54, %v8662_v23  ;;  %8710 = vst [vmem:[#allocation72_spill] sm:$0xff] %v6614_v11 }
 0x221   : > { %v2839_v36 = vmul.f32 %v2775_v56, %v2711_v13  ;;  %v2641_v6 = vadd.f32 %v2577_v44, %v8661_v15  ;;  %v2642_v20 = vadd.f32 %v2578_v24, %v8661_v15  ;;  %v2395_v42 = vadd.f32 %v2331_v2, %v2203_v22  ;;  %v6618_v56 = vpop.xlane.xlu0 %1439  ;;  %v1900_v24 = vld [vmem:[%s4842_s8 + $0x68] sm:$0xf0] }
 0x222   : > { %v2840_v55 = vmul.f32 %v2776_v30, %v2712_v33  ;;  %v2396_v28 = vadd.f32 %v2332_v60, %v2204_v0  ;;  %v2005_v37 = vmul.f32 %v6402_v41, %v8666_v31  ;;  %v2006_v40 = vmul.f32 %v6405_v26, %v8666_v31  ;;  %8711 = vst [vmem:[#allocation73_spill] sm:$0xff] %v6618_v56 }
 0x223   : > { %v2705_v50 = vmax.f32 %v2641_v6, 1e-06  ;;  %v2706_v16 = vmax.f32 %v2642_v20, 1e-06  ;;  %v2587_v46 = vadd.f32 %v2523_v29, %v2395_v42  ;;  %v2133_v39 = vmul.f32 %v6417_v38, %v8667_v5  ;;  %v1899_v38 = vld [vmem:[%s4842_s8 + $0x60] sm:$0xf0]  ;;  %v6636_v29 = vpop.xlane.xlu1 %1460 }
 0x224   : > { %v2923_v13 = vadd.f32 %v2840_v55, %v2839_v36  ;;  %v2588_v44 = vadd.f32 %v2524_v7, %v2396_v28  ;;  %v2134_v41 = vmul.f32 %v6420_v47, %v8667_v5  ;;  %v2325_v42 = vmul.f32 %v6427_v19, %v8668_v18  ;;  %8712 = vst [vmem:[#allocation28_spill] sm:$0xff] %v6636_v29 }
 0x225   : > { %v2769_v33 = vmul.f32 %v2705_v50, %v2705_v50  ;;  %v2770_v32 = vmul.f32 %v2706_v16, %v2706_v16  ;;  %v2651_v20 = vadd.f32 %v2587_v46, %v5447_v12  ;;  %v2197_v26 = vadd.f32 %v2133_v39, %v2005_v37 }
 0x226   : > { %2924 = vadd.xlane.f32.xlu1 %v2923_v13  ;;  %v2652_v6 = vadd.f32 %v2588_v44, %v5447_v12  ;;  %v2198_v55 = vadd.f32 %v2134_v41, %v2006_v40  ;;  %v2326_v28 = vmul.f32 %v6432_v52, %v8668_v18  ;;  %v2517_v47 = vmul.f32 %v6441_v1, %v8670_v53 }
 0x227   : > { %v2833_v36 = vmul.f32 %v2769_v33, %v2705_v50  ;;  %v2834_v2 = vmul.f32 %v2770_v32, %v2706_v16  ;;  %v2715_v60 = vmax.f32 %v2651_v20, 1e-06  ;;  %v2389_v30 = vadd.f32 %v2325_v42, %v2197_v26  ;;  %v6641_v50 = vpop.xlane.xlu0 %1445 }
 0x228   : > { %v2716_v22 = vmax.f32 %v2652_v6, 1e-06  ;;  %v2390_v0 = vadd.f32 %v2326_v28, %v2198_v55  ;;  %v2518_v19 = vmul.f32 %v6444_v49, %v8670_v53  ;;  %v6639_v52 = vrot.slane %v1899_v38, %v8682_v58  ;;  %8713 = vst [vmem:[#allocation29_spill] sm:$0xff] %v6641_v50 }
 0x229   : > { %v2914_v7 = vadd.f32 %v2834_v2, %v2833_v36  ;;  %v2779_v37 = vmul.f32 %v2715_v60, %v2715_v60  ;;  %v2581_v46 = vadd.f32 %v2517_v47, %v2389_v30  ;;  %v6644_v1 = vrot.slane %v1900_v24, %v8682_v58  ;;  %v6671_v47 = vpop.xlane.xlu1 %1466 }
 0x22a   : > { %v2780_v16 = vmul.f32 %v2716_v22, %v2716_v22  ;;  %v2582_v40 = vadd.f32 %v2518_v19, %v2390_v0  ;;  %v2017_v49 = vmul.f32 %v6639_v52, %v8692_v21  ;;  %v6649_v44 = vrot.slane %v1899_v38, %v8685_v4  ;;  %8714 = vst [vmem:[#allocation62_spill] sm:$0xff] %v6671_v47 }
 0x22b   : > { %2915 = vadd.xlane.f32.xlu0 %v2914_v7  ;;  %v2843_v13 = vmul.f32 %v2779_v37, %v2715_v60  ;;  %v6652_v39 = vrot.slane %v1900_v24, %v8685_v4  ;;  %v2645_v33 = vadd.f32 %v2581_v46, %v8675_v9  ;;  %v2018_v20 = vmul.f32 %v6644_v1, %v8692_v21  ;;  %v6677_v7 = vpop.xlane.xlu0 %1451 }
 0x22c   : > { %v2844_v41 = vmul.f32 %v2780_v16, %v2716_v22  ;;  %v2646_v32 = vadd.f32 %v2582_v40, %v8675_v9  ;;  %v2145_v42 = vmul.f32 %v6649_v44, %v8694_v3  ;;  %v6663_v26 = vrot.slane %v1899_v38, %v8687_v27  ;;  %8715 = vst [vmem:[#allocation77_spill] sm:$0xff] %v6677_v7 }
 0x22d   : > { %v2146_v6 = vmul.f32 %v6652_v39, %v8694_v3  ;;  %v6666_v55 = vrot.slane %v1900_v24, %v8687_v27  ;;  %v2709_v36 = vmax.f32 %v2645_v33, 1e-06  ;;  %v6669_v60 = vrot.slane %v1899_v38, %v8690_v63 }
 0x22e   : > { %v2929_v28 = vadd.f32 %v2844_v41, %v2843_v13  ;;  %v2710_v2 = vmax.f32 %v2646_v32, 1e-06  ;;  %v2209_v22 = vadd.f32 %v2145_v42, %v2017_v49  ;;  %v2337_v0 = vmul.f32 %v6663_v26, %v8672_v59 }
 0x22f   : > { %v2210_v30 = vadd.f32 %v2146_v6, %v2018_v20  ;;  %v2338_v19 = vmul.f32 %v6666_v55, %v8672_v59  ;;  %v2773_v37 = vmul.f32 %v2709_v36, %v2709_v36  ;;  %v6680_v46 = vrot.slane %v1900_v24, %v8690_v63 }
 0x230   : > { %2930 = vadd.xlane.f32.xlu1 %v2929_v28  ;;  %v2774_v16 = vmul.f32 %v2710_v2, %v2710_v2  ;;  %v2529_v38 = vmul.f32 %v6669_v60, %v8657_v25  ;;  %v2401_v40 = vadd.f32 %v2337_v0, %v2209_v22  ;;  %v2009_v49 = vmul.f32 %v6523_v35, %v8692_v21  ;;  %v6700_v0 = vpop.permute.xlu1 %1676 }
 0x231   : > { %v2402_v13 = vadd.f32 %v2338_v19, %v2210_v30  ;;  %v2837_v41 = vmul.f32 %v2773_v37, %v2709_v36  ;;  %v2530_v32 = vmul.f32 %v6680_v46, %v8657_v25  ;;  %v2010_v20 = vmul.f32 %v6527_v34, %v8692_v21  ;;  %8716 = vst [vmem:[#allocation32_spill] sm:$0xff] %v6700_v0 }
 0x232   : > { %v2838_v33 = vmul.f32 %v2774_v16, %v2710_v2  ;;  %v2593_v42 = vadd.f32 %v2529_v38, %v2401_v40  ;;  %v2137_v24 = vmul.f32 %v6532_v57, %v8694_v3  ;;  %v2138_v6 = vmul.f32 %v6542_v17, %v8694_v3  ;;  %v6705_v40 = vpop.xlane.xlu0 %1457 }
 0x233   : > { %v2329_v28 = vmul.f32 %v6547_v8, %v8672_v59  ;;  %v2594_v30 = vadd.f32 %v2530_v32, %v2402_v13  ;;  %v2330_v36 = vmul.f32 %v6552_v61, %v8672_v59  ;;  %v2521_v2 = vmul.f32 %v6557_v14, %v8657_v25  ;;  %8717 = vst [vmem:[#allocation63_spill] sm:$0xff] %v6705_v40 }
 0x234   : > { %v2920_v22 = vadd.f32 %v2838_v33, %v2837_v41  ;;  %v2657_v19 = vadd.f32 %v2593_v42, %v8661_v15  ;;  %v2201_v37 = vadd.f32 %v2137_v24, %v2009_v49  ;;  %v2202_v16 = vadd.f32 %v2138_v6, %v2010_v20 }
 0x235   : > { %v2522_v38 = vmul.f32 %v6562_v54, %v8657_v25  ;;  %v2658_v13 = vadd.f32 %v2594_v30, %v8661_v15  ;;  %v2019_v41 = vmul.f32 %v6639_v52, %v8698_v48  ;;  %v2020_v33 = vmul.f32 %v6644_v1, %v8698_v48 }
 0x236   : > { %2921 = vadd.xlane.f32.xlu0 %v2920_v22  ;;  %v2721_v32 = vmax.f32 %v2657_v19, 1e-06  ;;  %v2393_v0 = vadd.f32 %v2329_v28, %v2201_v37  ;;  %v2394_v47 = vadd.f32 %v2330_v36, %v2202_v16  ;;  %v2147_v49 = vmul.f32 %v6649_v44, %v8619_v43  ;;  %v6724_v16 = vpop.permute.xlu1 %1684  ;;  %v6728_v56 = vpop.xlane.xlu0 %1463 }
 0x237   : > { %v2722_v20 = vmax.f32 %v2658_v13, 1e-06  ;;  %v2148_v42 = vmul.f32 %v6652_v39, %v8619_v43  ;;  %v2339_v24 = vmul.f32 %v6663_v26, %v8699_v62  ;;  %v2340_v6 = vmul.f32 %v6666_v55, %v8699_v62  ;;  %8718 = vst [vmem:[#allocation33_spill] sm:$0xff] %v6724_v16  ;;  %8719 = vst [vmem:[#allocation34_spill] sm:$0xff] %v6728_v56 }
 0x238   : > { %v2785_v22 = vmul.f32 %v2721_v32, %v2721_v32  ;;  %v2585_v30 = vadd.f32 %v2521_v2, %v2393_v0  ;;  %v2586_v40 = vadd.f32 %v2522_v38, %v2394_v47  ;;  %v2211_v7 = vadd.f32 %v2147_v49, %v2019_v41 }
 0x239   : > { %v2786_v19 = vmul.f32 %v2722_v20, %v2722_v20  ;;  %v2212_v28 = vadd.f32 %v2148_v42, %v2020_v33  ;;  %v2531_v36 = vmul.f32 %v6669_v60, %v8662_v23  ;;  %v2532_v37 = vmul.f32 %v6680_v46, %v8662_v23 }
 0x23a   : > { %v2849_v13 = vmul.f32 %v2785_v22, %v2721_v32  ;;  %v2649_v29 = vadd.f32 %v2585_v30, %v8661_v15  ;;  %v2650_v50 = vadd.f32 %v2586_v40, %v8661_v15  ;;  %v2403_v11 = vadd.f32 %v2339_v24, %v2211_v7  ;;  %v6750_v16 = vpop.xlane.xlu0 %1469 }
 0x23b   : > { %v2850_v47 = vmul.f32 %v2786_v19, %v2722_v20  ;;  %v2404_v2 = vadd.f32 %v2340_v6, %v2212_v28  ;;  %v2015_v0 = vmul.f32 %v6639_v52, %v8684_v10  ;;  %v2016_v49 = vmul.f32 %v6644_v1, %v8684_v10  ;;  %v1901_v19 = vld [vmem:[%s4842_s8 + $0x70] sm:$0xf0]  ;;  %v6745_v28 = vpop.permute.xlu1 %1688 }
 0x23c   : > { %v2713_v38 = vmax.f32 %v2649_v29, 1e-06  ;;  %v2714_v41 = vmax.f32 %v2650_v50, 1e-06  ;;  %v2595_v33 = vadd.f32 %v2531_v36, %v2403_v11  ;;  %v2143_v40 = vmul.f32 %v6649_v44, %v8686_v45  ;;  %8720 = vst [vmem:[#allocation35_spill] sm:$0xff] %v6745_v28 }
 0x23d   : > { %v2938_v32 = vadd.f32 %v2850_v47, %v2849_v13  ;;  %v2596_v42 = vadd.f32 %v2532_v37, %v2404_v2  ;;  %v2144_v7 = vmul.f32 %v6652_v39, %v8686_v45  ;;  %v2335_v29 = vmul.f32 %v6663_v26, %v8609_v51  ;;  %v8721_v47 = vld [vmem:[#allocation76_spill] sm:$0xff] }
 0x23e   : > { %v2777_v20 = vmul.f32 %v2713_v38, %v2713_v38  ;;  %v2778_v24 = vmul.f32 %v2714_v41, %v2714_v41  ;;  %v2659_v6 = vadd.f32 %v2595_v33, %v5447_v12  ;;  %v2207_v50 = vadd.f32 %v2143_v40, %v2015_v0  ;;  %v1902_v33 = vld [vmem:[%s4842_s8 + $0x78] sm:$0xf0] }
 0x23f   : > { %2939 = vadd.xlane.f32.xlu1 %v2938_v32  ;;  %v2660_v11 = vadd.f32 %v2596_v42, %v5447_v12  ;;  %v2208_v22 = vadd.f32 %v2144_v7, %v2016_v49  ;;  %v2336_v30 = vmul.f32 %v6666_v55, %v8609_v51  ;;  %v2527_v2 = vmul.f32 %v6669_v60, %v8721_v47 }
 0x240   : > { %v2841_v36 = vmul.f32 %v2777_v20, %v2713_v38  ;;  %v2842_v37 = vmul.f32 %v2778_v24, %v2714_v41  ;;  %v2723_v13 = vmax.f32 %v2659_v6, 1e-06  ;;  %v2399_v56 = vadd.f32 %v2335_v29, %v2207_v50 }
 0x241   : > { %v2724_v32 = vmax.f32 %v2660_v11, 1e-06  ;;  %v2400_v42 = vadd.f32 %v2336_v30, %v2208_v22  ;;  %v2528_v0 = vmul.f32 %v6680_v46, %v8721_v47  ;;  %v6755_v7 = vrot.slane %v1901_v19, %v8682_v58  ;;  %v8722_v30 = vld [vmem:[#allocation66_spill] sm:$0xff] }
 0x242   : > { %v2926_v49 = vadd.f32 %v2842_v37, %v2841_v36  ;;  %v2787_v40 = vmul.f32 %v2723_v13, %v2723_v13  ;;  %v2591_v41 = vadd.f32 %v2527_v2, %v2399_v56  ;;  %v6758_v24 = vrot.slane %v1902_v33, %v8682_v58  ;;  %v6772_v37 = vpop.permute.xlu1 %1699 }
 0x243   : > { %v2788_v38 = vmul.f32 %v2724_v32, %v2724_v32  ;;  %v2592_v20 = vadd.f32 %v2528_v0, %v2400_v42  ;;  %v2025_v29 = vmul.f32 %v6755_v7, %v8692_v21  ;;  %v6763_v11 = vrot.slane %v1901_v19, %v8685_v4  ;;  %8723 = vst [vmem:[#allocation74_spill] sm:$0xff] %v6772_v37 }
 0x244   : > { %2927 = vadd.xlane.f32.xlu0 %v2926_v49  ;;  %v2851_v6 = vmul.f32 %v2787_v40, %v2723_v13  ;;  %v6766_v50 = vrot.slane %v1902_v33, %v8685_v4  ;;  %v2655_v36 = vadd.f32 %v2591_v41, %v8722_v30  ;;  %v2026_v58 = vmul.f32 %v6758_v24, %v8692_v21 }
 0x245   : > { %v2852_v22 = vmul.f32 %v2788_v38, %v2724_v32  ;;  %v2656_v56 = vadd.f32 %v2592_v20, %v8722_v30  ;;  %v2153_v13 = vmul.f32 %v6763_v11, %v8694_v3  ;;  %v6779_v42 = vrot.slane %v1901_v19, %v8687_v27  ;;  %v6784_v32 = vpop.permute.xlu0 %1680 }
 0x246   : > { %v2154_v2 = vmul.f32 %v6766_v50, %v8694_v3  ;;  %v6782_v4 = vrot.slane %v1902_v33, %v8687_v27  ;;  %v2719_v49 = vmax.f32 %v2655_v36, 1e-06  ;;  %v6787_v21 = vrot.slane %v1901_v19, %v8690_v63 }
 0x247   : > { %v2941_v0 = vadd.f32 %v2852_v22, %v2851_v6  ;;  %v2720_v40 = vmax.f32 %v2656_v56, 1e-06  ;;  %v2217_v38 = vadd.f32 %v2153_v13, %v2025_v29  ;;  %v2345_v20 = vmul.f32 %v6779_v42, %v8672_v59  ;;  %v6804_v13 = vpop.permute.xlu1 %1707 }
 0x248   : > { %v2218_v41 = vadd.f32 %v2154_v2, %v2026_v58  ;;  %v2346_v3 = vmul.f32 %v6782_v4, %v8672_v59  ;;  %v2783_v37 = vmul.f32 %v2719_v49, %v2719_v49  ;;  %v6794_v28 = vrot.slane %v1902_v33, %v8690_v63 }
 0x249   : > { %2942 = vadd.xlane.f32.xlu1 %v2941_v0  ;;  %v2784_v27 = vmul.f32 %v2720_v40, %v2720_v40  ;;  %v2537_v6 = vmul.f32 %v6787_v21, %v8657_v25  ;;  %v2409_v22 = vadd.f32 %v2345_v20, %v2217_v38  ;;  %v2013_v29 = vmul.f32 %v6523_v35, %v8666_v31 }
 0x24a   : > { %v2410_v19 = vadd.f32 %v2346_v3, %v2218_v41  ;;  %v2847_v36 = vmul.f32 %v2783_v37, %v2719_v49  ;;  %v2538_v58 = vmul.f32 %v6794_v28, %v8657_v25  ;;  %v2014_v59 = vmul.f32 %v6527_v34, %v8666_v31  ;;  %v6812_v37 = vpop.permute.xlu0 %1695 }
 0x24b   : > { %v2848_v56 = vmul.f32 %v2784_v27, %v2720_v40  ;;  %v2601_v63 = vadd.f32 %v2537_v6, %v2409_v22  ;;  %v2141_v33 = vmul.f32 %v6532_v57, %v8667_v5  ;;  %v2142_v2 = vmul.f32 %v6542_v17, %v8667_v5 }
 0x24c   : > { %v2333_v35 = vmul.f32 %v6547_v8, %v8668_v18  ;;  %v2602_v49 = vadd.f32 %v2538_v58, %v2410_v19  ;;  %v2334_v25 = vmul.f32 %v6552_v61, %v8668_v18  ;;  %v2525_v57 = vmul.f32 %v6557_v14, %v8670_v53  ;;  %v6834_v19 = vpop.permute.xlu1 %1718 }
 0x24d   : > { %v2935_v0 = vadd.f32 %v2848_v56, %v2847_v36  ;;  %v2665_v34 = vadd.f32 %v2601_v63, %v8661_v15  ;;  %v2205_v40 = vadd.f32 %v2141_v33, %v2013_v29  ;;  %v2206_v38 = vadd.f32 %v2142_v2, %v2014_v59 }
 0x24e   : > { %v2666_v17 = vadd.f32 %v2602_v49, %v8661_v15  ;;  %v2526_v8 = vmul.f32 %v6562_v54, %v8670_v53  ;;  %v2027_v41 = vmul.f32 %v6755_v7, %v8698_v48  ;;  %v2028_v20 = vmul.f32 %v6758_v24, %v8698_v48  ;;  %v6836_v58 = vpop.permute.xlu0 %1703 }
 0x24f   : > { %2936 = vadd.xlane.f32.xlu0 %v2935_v0  ;;  %v2729_v61 = vmax.f32 %v2665_v34, 1e-06  ;;  %v2397_v3 = vadd.f32 %v2333_v35, %v2205_v40  ;;  %v2398_v27 = vadd.f32 %v2334_v25, %v2206_v38  ;;  %v2155_v6 = vmul.f32 %v6763_v11, %v8619_v43 }
 0x250   : > { %v2730_v22 = vmax.f32 %v2666_v17, 1e-06  ;;  %v2156_v14 = vmul.f32 %v6766_v50, %v8619_v43  ;;  %v2347_v15 = vmul.f32 %v6779_v42, %v8699_v62  ;;  %v2348_v54 = vmul.f32 %v6782_v4, %v8699_v62 }
 0x251   : > { %v2793_v29 = vmul.f32 %v2729_v61, %v2729_v61  ;;  %v2589_v48 = vadd.f32 %v2525_v57, %v2397_v3  ;;  %v2590_v36 = vadd.f32 %v2526_v8, %v2398_v27  ;;  %v2219_v56 = vadd.f32 %v2155_v6, %v2027_v41 }
 0x252   : > { %v2794_v59 = vmul.f32 %v2730_v22, %v2730_v22  ;;  %v2220_v63 = vadd.f32 %v2156_v14, %v2028_v20  ;;  %v2539_v33 = vmul.f32 %v6787_v21, %v8662_v23  ;;  %v2540_v43 = vmul.f32 %v6794_v28, %v8662_v23  ;;  %v6857_v14 = vpop.permute.xlu0 %1714 }
 0x253   : > { %v2857_v2 = vmul.f32 %v2793_v29, %v2729_v61  ;;  %v2653_v35 = vadd.f32 %v2589_v48, %v8675_v9  ;;  %v2654_v62 = vadd.f32 %v2590_v36, %v8675_v9  ;;  %v2411_v0 = vadd.f32 %v2347_v15, %v2219_v56  ;;  %v6852_v61 = vpop.permute.xlu1 %1726 }
 0x254   : > { %v2858_v49 = vmul.f32 %v2794_v59, %v2730_v22  ;;  %v2412_v25 = vadd.f32 %v2348_v54, %v2220_v63  ;;  %v2023_v34 = vmul.f32 %v6755_v7, %v8684_v10  ;;  %v2024_v17 = vmul.f32 %v6758_v24, %v8684_v10 }
 0x255   : > { %v2717_v40 = vmax.f32 %v2653_v35, 1e-06  ;;  %v2718_v38 = vmax.f32 %v2654_v62, 1e-06  ;;  %v2603_v57 = vadd.f32 %v2539_v33, %v2411_v0  ;;  %v2151_v23 = vmul.f32 %v6763_v11, %v8686_v45 }
 0x256   : > { %v2950_v8 = vadd.f32 %v2858_v49, %v2857_v2  ;;  %v2604_v41 = vadd.f32 %v2540_v43, %v2412_v25  ;;  %v2152_v20 = vmul.f32 %v6766_v50, %v8686_v45  ;;  %v2343_v22 = vmul.f32 %v6779_v42, %v8609_v51 }
 0x257   : > { %v2781_v3 = vmul.f32 %v2717_v40, %v2717_v40  ;;  %v2782_v27 = vmul.f32 %v2718_v38, %v2718_v38  ;;  %v2667_v6 = vadd.f32 %v2603_v57, %v5447_v12  ;;  %v2215_v15 = vadd.f32 %v2151_v23, %v2023_v34  ;;  %v6868_v49 = vpop.permute.xlu1 %1737 }
 0x258   : > { %2951 = vadd.xlane.f32.xlu1 %v2950_v8  ;;  %v2668_v10 = vadd.f32 %v2604_v41, %v5447_v12  ;;  %v2216_v54 = vadd.f32 %v2152_v20, %v2024_v17  ;;  %v2344_v29 = vmul.f32 %v6782_v4, %v8609_v51  ;;  %v2535_v56 = vmul.f32 %v6787_v21, %v8721_v47 }
 0x259   : > { %v2845_v45 = vmul.f32 %v2781_v3, %v2717_v40  ;;  %v2846_v48 = vmul.f32 %v2782_v27, %v2718_v38  ;;  %v2731_v36 = vmax.f32 %v2667_v6, 1e-06  ;;  %v2407_v63 = vadd.f32 %v2343_v22, %v2215_v15  ;;  %v6876_v38 = vpop.permute.xlu0 %1722 }
 0x25a   : > { %v2732_v59 = vmax.f32 %v2668_v10, 1e-06  ;;  %v2408_v33 = vadd.f32 %v2344_v29, %v2216_v54  ;;  %v2536_v43 = vmul.f32 %v6794_v28, %v8721_v47  ;;  %v2021_v51 = vmul.f32 %v6639_v52, %v8666_v31 }
 0x25b   : > { %v2932_v2 = vadd.f32 %v2846_v48, %v2845_v45  ;;  %v2795_v35 = vmul.f32 %v2731_v36, %v2731_v36  ;;  %v2599_v62 = vadd.f32 %v2535_v56, %v2407_v63  ;;  %v2022_v34 = vmul.f32 %v6644_v1, %v8666_v31  ;;  %v6892_v15 = vpop.permute.xlu1 %1745 }
 0x25c   : > { %v2796_v12 = vmul.f32 %v2732_v59, %v2732_v59  ;;  %v2600_v0 = vadd.f32 %v2536_v43, %v2408_v33  ;;  %v2149_v40 = vmul.f32 %v6649_v44, %v8667_v5  ;;  %v2150_v47 = vmul.f32 %v6652_v39, %v8667_v5 }
 0x25d   : > { %2933 = vadd.xlane.f32.xlu0 %v2932_v2  ;;  %v2859_v25 = vmul.f32 %v2795_v35, %v2731_v36  ;;  %v2663_v17 = vadd.f32 %v2599_v62, %v8722_v30  ;;  %v2341_v8 = vmul.f32 %v6663_v26, %v8668_v18  ;;  %v2342_v1 = vmul.f32 %v6666_v55, %v8668_v18 }
 0x25e   : > { %v2860_v57 = vmul.f32 %v2796_v12, %v2732_v59  ;;  %v2664_v52 = vadd.f32 %v2600_v0, %v8722_v30  ;;  %v2213_v41 = vadd.f32 %v2149_v40, %v2021_v51  ;;  %v2214_v23 = vadd.f32 %v2150_v47, %v2022_v34 }
 0x25f   : > { %v2727_v44 = vmax.f32 %v2663_v17, 1e-06  ;;  %v2533_v6 = vmul.f32 %v6669_v60, %v8670_v53  ;;  %v2534_v22 = vmul.f32 %v6680_v46, %v8670_v53  ;;  %v2029_v26 = vmul.f32 %v6755_v7, %v8666_v31  ;;  %v6898_v46 = vpop.permute.xlu0 %1733  ;;  %v6910_v35 = vpop.permute.xlu1 %1756 }
 0x260   : > { %v2953_v20 = vadd.f32 %v2860_v57, %v2859_v25  ;;  %v2728_v3 = vmax.f32 %v2664_v52, 1e-06  ;;  %v2405_v27 = vadd.f32 %v2341_v8, %v2213_v41  ;;  %v2406_v39 = vadd.f32 %v2342_v1, %v2214_v23  ;;  %8724 = vst [vmem:[#allocation75_spill] sm:$0xff] %v6910_v35  ;;  %v4593_v52 = vld [vmem:[%s5902_s14] sm:$0x3]  ;;  %v8727_v8 = vld [vmem:[#allocation11_spill] sm:$0xff] }
 0x261   : > { %v2791_v30 = vmul.f32 %v2727_v44, %v2727_v44  ;;  %v2030_v55 = vmul.f32 %v6758_v24, %v8666_v31  ;;  %v2157_v45 = vmul.f32 %v6763_v11, %v8667_v5  ;;  %v2158_v60 = vmul.f32 %v6766_v50, %v8667_v5 }
 0x262   : > { %2954 = vadd.xlane.f32.xlu1 %v2953_v20  ;;  %v2792_v10 = vmul.f32 %v2728_v3, %v2728_v3  ;;  %v2597_v54 = vadd.f32 %v2533_v6, %v2405_v27  ;;  %v2598_v29 = vadd.f32 %v2534_v22, %v2406_v39  ;;  %v2349_v7 = vmul.f32 %v6779_v42, %v8668_v18  ;;  %v4594_v39 = vld [vmem:[%s5902_s14 + $0x2] sm:$0x3] }
 0x263   : > { %v2855_v48 = vmul.f32 %v2791_v30, %v2727_v44  ;;  %v2350_v31 = vmul.f32 %v6782_v4, %v8668_v18  ;;  %v2221_v59 = vadd.f32 %v2157_v45, %v2029_v26  ;;  %v2222_v63 = vadd.f32 %v2158_v60, %v2030_v55  ;;  %v6912_v0 = vpop.permute.xlu0 %1741  ;;  %v6916_v47 = vpop.permute.xlu1 %1764  ;;  %v8733_v30 = vld [vmem:[#allocation15_spill] sm:$0xff]  ;;  %v4595_v26 = vld [vmem:[%s5902_s14 + $0x4] sm:$0x3]  ;;  %v8736_v45 = vld [vmem:[#allocation58_spill] sm:$0xff] }
 0x264   : > { %v2856_v36 = vmul.f32 %v2792_v10, %v2728_v3  ;;  %v2661_v24 = vadd.f32 %v2597_v54, %v8675_v9  ;;  %v2662_v56 = vadd.f32 %v2598_v29, %v8675_v9  ;;  %v2541_v5 = vmul.f32 %v6787_v21, %v8670_v53  ;;  %8725 = vst [vmem:[#allocation71_spill] sm:$0xff] %v6912_v0 }
 0x265   : > { %v2542_v50 = vmul.f32 %v6794_v28, %v8670_v53  ;;  %v2413_v2 = vadd.f32 %v2349_v7, %v2221_v59  ;;  %v2414_v42 = vadd.f32 %v2350_v31, %v2222_v63  ;;  %8726 = vst [vmem:[#allocation30_spill] sm:$0xff] %v6916_v47  ;;  %v3154_v41 = vrot.slane %v4593_v52, %v8727_v8  ;;  %v4596_v31 = vld [vmem:[%s5902_s14 + $0x6] sm:$0x3] }
 0x266   : > { %v2947_v11 = vadd.f32 %v2856_v36, %v2855_v48  ;;  %v2725_v33 = vmax.f32 %v2661_v24, 1e-06  ;;  %v2726_v43 = vmax.f32 %v2662_v56, 1e-06  ;;  %v3173_v6 = vrot.slane %v4594_v39, %v8727_v8  ;;  %v8737_v48 = vld [vmem:[#allocation20_spill] sm:$0xff]  ;;  %v8740_v59 = vld [vmem:[#allocation21_spill] sm:$0xff] }
 0x267   : > { %v2605_v12 = vadd.f32 %v2541_v5, %v2413_v2  ;;  %v2606_v62 = vadd.f32 %v2542_v50, %v2414_v42  ;;  %v6920_v23 = vpop.permute.xlu0 %1752  ;;  %v1472_v10 = vmul.f32 0.00390625, %v8733_v30  ;;  %v3192_v55 = vrot.slane %v4595_v26, %v8727_v8  ;;  %v8767_v47 = vld [vmem:[#allocation29_spill] sm:$0xff] }
 0x268   : > { %2948 = vadd.xlane.f32.xlu0 %v2947_v11  ;;  %v2789_v18 = vmul.f32 %v2725_v33, %v2725_v33  ;;  %v2790_v4 = vmul.f32 %v2726_v43, %v2726_v43  ;;  %8728 = vst [vmem:[#allocation31_spill] sm:$0xff] %v6920_v23  ;;  %v1471_v60 = vmul.f32 0.00390625, %v8736_v45  ;;  %v1475_v36 = vmul.f32 0.00390625, %v8737_v48  ;;  %v8741_v11 = vld [vmem:[#allocation59_spill] sm:$0xff]  ;;  %v8751_v48 = vld [vmem:[#allocation84_spill] sm:$0xff] }
 0x269   : > { %v2669_v21 = vadd.f32 %v2605_v12, %v8675_v9  ;;  %v2670_v53 = vadd.f32 %v2606_v62, %v8675_v9  ;;  %v6922_v9 = vpop.permute.xlu1 %1775  ;;  %4335 = vlog2.f32 %v1472_v10  ;;  %v6945_v24 = vrot.slane %v4596_v31, %v8727_v8  ;;  %v8745_v62 = vld [vmem:[#allocation56_spill] sm:$0xff]  ;;  %v8750_v10 = vld [vmem:[#allocation10_spill] sm:$0xff] }
 0x26a   : > { %v2853_v51 = vmul.f32 %v2789_v18, %v2725_v33  ;;  %v2854_v25 = vmul.f32 %v2790_v4, %v2726_v43  ;;  %8729 = vst [vmem:[#allocation64_spill] sm:$0xff] %v6922_v9  ;;  %4337 = vlog2.f32 %v1471_v60  ;;  %v1477_v63 = vmul.f32 0.00390625, %v8740_v59  ;;  %v4597_v43 = vld [vmem:[%s5902_s14 + $0x8] sm:$0x3]  ;;  %v8744_v18 = vld [vmem:[#allocation83_spill] sm:$0xff] }
 0x26b   : > { %v2733_v34 = vmax.f32 %v2669_v21, 1e-06  ;;  %v2734_v40 = vmax.f32 %v2670_v53, 1e-06  ;;  %v6924_v3 = vpop.permute.xlu0 %1760  ;;  %4339 = vlog2.f32 %v1475_v36  ;;  %v1473_v5 = vmul.f32 0.00390625, %v8741_v11  ;;  %v8752_v59 = vld [vmem:[#allocation87_spill] sm:$0xff] }
 0x26c   : > { %v2944_v28 = vadd.f32 %v2854_v25, %v2853_v51  ;;  %8730 = vst [vmem:[#allocation65_spill] sm:$0xff] %v6924_v3  ;;  %4341 = vlog2.f32 %v1477_v63  ;;  %v6958_v2 = vrot.slane %v4597_v43, %v8727_v8  ;;  %v1479_v4 = vmul.f32 0.00390625, %v8744_v18 }
 0x26d   : > { %v2797_v57 = vmul.f32 %v2733_v34, %v2733_v34  ;;  %v2798_v17 = vmul.f32 %v2734_v40, %v2734_v40  ;;  %v6926_v27 = vpop.permute.xlu1 %1783  ;;  %4343 = vlog2.f32 %v1473_v5  ;;  %v1474_v51 = vmul.f32 0.00390625, %v8745_v62  ;;  %v8753_v5 = vld [vmem:[#allocation86_spill] sm:$0xff] }
 0x26e   : > { %2945 = vadd.xlane.f32.xlu0 %v2944_v28  ;;  %8731 = vst [vmem:[#allocation22_spill] sm:$0xff] %v6926_v27  ;;  %4345 = vlog2.f32 %v1479_v4  ;;  %v1481_v36 = vmul.f32 0.00390625, %v8751_v48  ;;  %v1478_v63 = vmul.f32 0.00390625, %v8752_v59  ;;  %v1483_v43 = vmul.f32 0.00390625, %v8753_v5  ;;  %v8758_v48 = vld [vmem:[#allocation70_spill] sm:$0xff]  ;;  %v8759_v59 = vld [vmem:[#allocation69_spill] sm:$0xff] }
 0x26f   : > { %v2861_v1 = vmul.f32 %v2797_v57, %v2733_v34  ;;  %v2862_v20 = vmul.f32 %v2798_v17, %v2734_v40  ;;  %v6930_v22 = vpop.permute.xlu0 %1771  ;;  %4347 = vlog2.f32 %v1474_v51  ;;  %v4598_v57 = vld [vmem:[%s5902_s14 + $0xa] sm:$0x3]  ;;  %v8754_v51 = vld [vmem:[#allocation67_spill] sm:$0xff] }
 0x270   : > { %8732 = vst [vmem:[#allocation23_spill] sm:$0xff] %v6930_v22  ;;  %v6970_v17 = vrot.slane %v4598_v57, %v8727_v8 }
 0x271   : > { %v2956_v44 = vadd.f32 %v2862_v20, %v2861_v1  ;;  %v6935_v54 = vpop.permute.xlu1 %1794  ;;  %v8748_v1 = vld [vmem:[#allocation57_spill] sm:$0xff] }
 0x272   : > { %8734 = vst [vmem:[#allocation36_spill] sm:$0xff] %v6935_v54  ;;  %v1476_v20 = vmul.f32 0.00390625, %v8748_v1 }
 0x273   : > { %3156 = vbcast.lane.b32.xlu1 %v3154_v41, 256  ;;  %2957 = vadd.xlane.f32.xlu0 %v2956_v44  ;;  %v6937_v29 = vpop.permute.xlu0 %1779  ;;  %v6978_v44 = vld [vmem:[%s8314_s3] sm:$0xf] }
 0x274   : > { %8735 = vst [vmem:[#allocation37_spill] sm:$0xff] %v6937_v29  ;;  %v6985_v26 = vrot.slane %v6978_v44, %v8750_v10  ;;  %4349 = vlog2.f32 %v1476_v20  ;;  %v6998_v4 = vrot.slane %v6978_v44, %v8727_v8  ;;  %v8757_v10 = vld [vmem:[#allocation80_spill] sm:$0xff] }
 0x275   : > { %v6941_v7 = vpop.permute.xlu1 %1802 }
 0x276   : > { %8738 = vst [vmem:[#allocation38_spill] sm:$0xff] %v6941_v7  ;;  %v4336_v42 = vpop.eup %4335 }
 0x277   : > { %3164 = vbcast.lane.b32.xlu1 %v3154_v41, 272  ;;  %v6947_v56 = vpop.permute.xlu0 %1790  ;;  %v1506_v12 = vmul.f32 0.6931472, %v4336_v42  ;;  %v4338_v21 = vpop.eup %4337 }
 0x278   : > { %8739 = vst [vmem:[#allocation39_spill] sm:$0xff] %v6947_v56  ;;  %v4340_v28 = vpop.eup %4339  ;;  %v1504_v40 = vmul.f32 0.6931472, %v4338_v21  ;;  %v1480_v21 = vmul.f32 0.00390625, %v8754_v51  ;;  %v8770_v56 = vld [vmem:[#allocation62_spill] sm:$0xff] }
 0x279   : > { %v6952_v50 = vpop.permute.xlu1 %1813  ;;  %v1568_v34 = vmul.f32 0.33333334, %v1506_v12  ;;  %v4342_v45 = vpop.eup %4341  ;;  %v1501_v54 = vmul.f32 0.00390625, %v8770_v56 }
 0x27a   : > { %8742 = vst [vmem:[#allocation40_spill] sm:$0xff] %v6952_v50  ;;  %v1567_v30 = vmul.f32 0.33333334, %v1504_v40  ;;  %v4344_v31 = vpop.eup %4343  ;;  %v1516_v18 = vmul.f32 0.6931472, %v4342_v45  ;;  %v1487_v45 = vmul.f32 0.00390625, %v8757_v10 }
 0x27b   : > { %3168 = vbcast.lane.b32.xlu1 %v3154_v41, 280  ;;  %v6954_v33 = vpop.permute.xlu0 %1798  ;;  %v1508_v62 = vmul.f32 0.6931472, %v4344_v31  ;;  %v4346_v40 = vpop.eup %4345 }
 0x27c   : > { %8743 = vst [vmem:[#allocation41_spill] sm:$0xff] %v6954_v33  ;;  %v1573_v57 = vmul.f32 0.33333334, %v1516_v18  ;;  %v1520_v31 = vmul.f32 0.6931472, %v4346_v40 }
 0x27d   : > { %v6962_v25 = vpop.permute.xlu1 %1821 }
 0x27e   : > { %8746 = vst [vmem:[#allocation46_spill] sm:$0xff] %v6962_v25 }
 0x27f   : > { %3179 = vbcast.lane.b32.xlu1 %v3173_v6, 264  ;;  %v6965_v53 = vpop.permute.xlu0 %1809 }
 0x280   : > { %8747 = vst [vmem:[#allocation47_spill] sm:$0xff] %v6965_v53 }
 0x281   : > { %v6972_v52 = vpop.xlane.xlu1 %2867 }
 0x283   : > { %3194 = vbcast.lane.b32.xlu1 %v3192_v55, 256  ;;  %v6980_v39 = vpop.permute.xlu0 %1817 }
 0x284   : > { %8749 = vst [vmem:[#allocation42_spill] sm:$0xff] %v6980_v39  ;;  %v1494_v39 = vmul.f32 0.00390625, %v8767_v47  ;;  %v8769_v47 = vld [vmem:[#allocation77_spill] sm:$0xff] }
 0x285   : > { %v6989_v11 = vpop.xlane.xlu1 %2876 }
 0x287   : > { %3187 = vbcast.lane.b32.xlu1 %v3173_v6, 280  ;;  %v6992_v42 = vpop.xlane.xlu0 %2864 }
 0x289   : > { %3160 = vbcast.lane.b32.xlu0 %v3154_v41, 264  ;;  %v1512_v41 = vmul.f32 0.6931472, %v4340_v28  ;;  %v8755_v28 = vld [vmem:[#allocation79_spill] sm:$0xff]  ;;  %v7005_v20 = vpop.xlane.xlu1 %2882 }
 0x28b   : > { %3213 = vbcast.lane.b32.xlu1 %v6945_v24, 256  ;;  %v1571_v60 = vmul.f32 0.33333334, %v1512_v41  ;;  %v8756_v41 = vld [vmem:[#allocation68_spill] sm:$0xff] }
 0x28c   : > { %v1482_v1 = vmul.f32 0.00390625, %v8756_v41 }
 0x28d   : > { %3175 = vbcast.lane.b32.xlu0 %v3173_v6, 256  ;;  %v1607_v12 = vmul.f32 1.442695, %v1571_v60  ;;  %v7008_v60 = vpop.xlane.xlu0 %2870 }
 0x28f   : > { %3206 = vbcast.lane.b32.xlu1 %v3192_v55, 280 }
 0x291   : > { %3183 = vbcast.lane.b32.xlu0 %v3173_v6, 272  ;;  %v1601_v6 = vmul.f32 1.442695, %v1568_v34  ;;  %v1485_v34 = vmul.f32 0.00390625, %v8755_v28  ;;  %v1575_v28 = vmul.f32 0.33333334, %v1520_v31 }
 0x292   : > { %v8764_v31 = vld [vmem:[#allocation89_spill] sm:$0xff] }
 0x293   : > { %3232 = vbcast.lane.b32.xlu1 %v6958_v2, 256  ;;  %4351 = vpow2.f32 %v1601_v6  ;;  %v4348_v6 = vpop.eup %4347 }
 0x294   : > { %4353 = vlog2.f32 %v1481_v36  ;;  %v1484_v36 = vmul.f32 0.00390625, %v8758_v48  ;;  %v1510_v5 = vmul.f32 0.6931472, %v4348_v6 }
 0x295   : > { %3198 = vbcast.lane.b32.xlu0 %v3192_v55, 264  ;;  %4355 = vlog2.f32 %v1478_v63  ;;  %v1489_v63 = vmul.f32 0.00390625, %v8759_v59  ;;  %v1495_v59 = vmul.f32 0.00390625, %v8764_v31 }
 0x296   : > { %4357 = vlog2.f32 %v1483_v43  ;;  %v4599_v43 = vld [vmem:[%s5902_s14 + $0xc] sm:$0x3]  ;;  %v1570_v41 = vmul.f32 0.33333334, %v1510_v5 }
 0x297   : > { %3225 = vbcast.lane.b32.xlu1 %v6945_v24, 280 }
 0x298   : > { %v1605_v5 = vmul.f32 1.442695, %v1570_v41  ;;  %v8766_v41 = vld [vmem:[#allocation72_spill] sm:$0xff] }
 0x299   : > { %3202 = vbcast.lane.b32.xlu0 %v3192_v55, 272  ;;  %v1599_v55 = vmul.f32 1.442695, %v1567_v30  ;;  %v1569_v30 = vmul.f32 0.33333334, %v1508_v62  ;;  %v8760_v62 = vld [vmem:[#allocation25_spill] sm:$0xff] }
 0x29a   : > { %v1486_v51 = vmul.f32 0.00390625, %v8760_v62 }
 0x29b   : > { %3251 = vbcast.lane.b32.xlu1 %v6970_v17, 256  ;;  %4359 = vpow2.f32 %v1599_v55  ;;  %v7016_v55 = vrot.slane %v4599_v43, %v8727_v8  ;;  %v1603_v18 = vmul.f32 1.442695, %v1569_v30  ;;  %v1615_v43 = vmul.f32 1.442695, %v1575_v28 }
 0x29c   : > { %4361 = vpow2.f32 %v1607_v12  ;;  %v4350_v12 = vpop.eup %4349 }
 0x29d   : > { %3217 = vbcast.lane.b32.xlu0 %v6945_v24, 264  ;;  %4363 = vlog2.f32 %v1480_v21  ;;  %v7019_v21 = vpop.xlane.xlu1 %2888  ;;  %v1514_v10 = vmul.f32 0.6931472, %v4350_v12 }
 0x29e   : > { %4365 = vlog2.f32 %v1485_v34  ;;  %v8761_v34 = vld [vmem:[#allocation24_spill] sm:$0xff] }
 0x29f   : > { %3502 = vbcast.lane.b32.xlu1 %v6985_v26, 256  ;;  %4367 = vlog2.f32 %v1482_v1  ;;  %v1491_v40 = vmul.f32 0.00390625, %v8761_v34  ;;  %v8762_v1 = vld [vmem:[#allocation88_spill] sm:$0xff]  ;;  %v1572_v62 = vmul.f32 0.33333334, %v1514_v10 }
 0x2a0   : > { %4369 = vlog2.f32 %v1487_v45  ;;  %v1488_v6 = vmul.f32 0.00390625, %v8762_v1  ;;  %v7027_v30 = vpop.eup %4351  ;;  %v8763_v45 = vld [vmem:[#allocation26_spill] sm:$0xff]  ;;  %v8768_v10 = vld [vmem:[#allocation28_spill] sm:$0xff] }
 0x2a1   : > { %3221 = vbcast.lane.b32.xlu0 %v6945_v24, 272  ;;  %v1611_v24 = vmul.f32 1.442695, %v1573_v57  ;;  %4371 = vlog2.f32 %v1484_v36  ;;  %v7022_v57 = vpop.xlane.xlu0 %2873  ;;  %v1493_v48 = vmul.f32 0.00390625, %v8763_v45  ;;  %v4354_v36 = vpop.eup %4353 }
 0x2a2   : > { %4373 = vlog2.f32 %v1489_v63  ;;  %v4356_v63 = vpop.eup %4355  ;;  %v1524_v12 = vmul.f32 0.6931472, %v4354_v36  ;;  %v4600_v36 = vld [vmem:[%s5902_s14 + $0xe] sm:$0x3] }
 0x2a3   : > { %3558 = vbcast.lane.b32.xlu1 %v6998_v4, 256  ;;  %4375 = vpow2.f32 %v1611_v24  ;;  %v4358_v24 = vpop.eup %4357 }
 0x2a4   : > { %4377 = vpow2.f32 %v1603_v18  ;;  %v1528_v31 = vmul.f32 0.6931472, %v4358_v24 }
 0x2a5   : > { %3236 = vbcast.lane.b32.xlu0 %v6958_v2, 264  ;;  %4379 = vlog2.f32 %v1486_v51  ;;  %v8765_v51 = vld [vmem:[#allocation73_spill] sm:$0xff]  ;;  %v7038_v1 = vpop.xlane.xlu0 %2879 }
 0x2a6   : > { %4381 = vlog2.f32 %v1491_v40  ;;  %v1492_v34 = vmul.f32 0.00390625, %v8765_v51  ;;  %v1518_v40 = vmul.f32 0.6931472, %v4356_v63  ;;  %v7049_v51 = vrot.slane %v4600_v36, %v8727_v8 }
 0x2a7   : > { %3244 = vbcast.lane.b32.xlu1 %v6958_v2, 280  ;;  %4383 = vlog2.f32 %v1488_v6  ;;  %v1497_v6 = vmul.f32 0.00390625, %v8766_v41  ;;  %v1577_v63 = vmul.f32 0.33333334, %v1524_v12  ;;  %v1609_v41 = vmul.f32 1.442695, %v1572_v62 }
 0x2a8   : > { %v7035_v18 = vpop.eup %4359  ;;  %4385 = vlog2.f32 %v1493_v48  ;;  %v1499_v48 = vmul.f32 0.00390625, %v8768_v10  ;;  %v1574_v24 = vmul.f32 0.33333334, %v1518_v40  ;;  %v1579_v33 = vmul.f32 0.33333334, %v1528_v31  ;;  %v8771_v62 = vld [vmem:[#allocation63_spill] sm:$0xff] }
 0x2a9   : > { %3240 = vbcast.lane.b32.xlu0 %v6958_v2, 272  ;;  %v7033_v2 = vpop.xlane.xlu1 %2894  ;;  %v7040_v28 = vpop.eup %4361  ;;  %4387 = vlog2.f32 %v1495_v59  ;;  %v8772_v31 = vld [vmem:[#allocation34_spill] sm:$0xff] }
 0x2aa   : > { %v4364_v45 = vpop.eup %4363  ;;  %4389 = vpow2.f32 %v1615_v43  ;;  %v7055_v8 = vpop.xlane.xlu0 %2885  ;;  %v1623_v22 = vmul.f32 1.442695, %v1579_v33 }
 0x2ab   : > { %3270 = vbcast.lane.b32.xlu1 %v7016_v55, 256  ;;  %v4366_v25 = vpop.eup %4365  ;;  %4391 = vpow2.f32 %v1605_v5  ;;  %v1522_v53 = vmul.f32 0.6931472, %v4364_v45  ;;  %v1496_v5 = vmul.f32 0.00390625, %v8769_v47  ;;  %v1500_v47 = vmul.f32 0.00390625, %v8772_v31 }
 0x2ac   : > { %v4368_v59 = vpop.eup %4367  ;;  %4393 = vlog2.f32 %v1492_v34  ;;  %v1532_v7 = vmul.f32 0.6931472, %v4366_v25  ;;  %v1498_v34 = vmul.f32 0.00390625, %v8771_v62 }
 0x2ad   : > { %3255 = vbcast.lane.b32.xlu0 %v6970_v17, 264  ;;  %v4370_v43 = vpop.eup %4369  ;;  %4395 = vlog2.f32 %v1497_v6  ;;  %v7052_v50 = vpop.xlane.xlu1 %2900  ;;  %v1526_v12 = vmul.f32 0.6931472, %v4368_v59  ;;  %v1619_v6 = vmul.f32 1.442695, %v1577_v63  ;;  %v8773_v63 = vld [vmem:[#allocation12_spill] sm:$0xff] }
 0x2ae   : > { %v4372_v10 = vpop.eup %4371  ;;  %4397 = vlog2.f32 %v1494_v39  ;;  %v1536_v45 = vmul.f32 0.6931472, %v4370_v43  ;;  %v1576_v39 = vmul.f32 0.33333334, %v1522_v53  ;;  %v1581_v29 = vmul.f32 0.33333334, %v1532_v7 }
 0x2af   : > { %3510 = vbcast.lane.b32.xlu1 %v6985_v26, 272  ;;  %v4374_v36 = vpop.eup %4373  ;;  %4399 = vlog2.f32 %v1499_v48  ;;  %v1530_v56 = vmul.f32 0.6931472, %v4372_v10  ;;  %v1613_v48 = vmul.f32 1.442695, %v1574_v24  ;;  %v7069_v53 = vrot.slane %v6978_v44, %v8773_v63 }
 0x2b0   : > { %v7060_v40 = vpop.eup %4375  ;;  %4401 = vpow2.f32 %v1609_v41  ;;  %v1540_v62 = vmul.f32 0.6931472, %v4374_v36  ;;  %v1578_v9 = vmul.f32 0.33333334, %v1526_v12  ;;  %v1583_v24 = vmul.f32 0.33333334, %v1536_v45 }
 0x2b1   : > { %3506 = vbcast.lane.b32.xlu0 %v6985_v26, 264  ;;  %v7062_v25 = vpop.eup %4377  ;;  %4403 = vlog2.f32 %v1496_v5  ;;  %v7071_v41 = vpop.xlane.xlu1 %2906  ;;  %v1502_v7 = vmul.f32 0.00390625, %v6750_v16  ;;  %v1617_v5 = vmul.f32 1.442695, %v1576_v39  ;;  %v1580_v10 = vmul.f32 0.33333334, %v1530_v56 }
 0x2b2   : > { %v4380_v59 = vpop.eup %4379  ;;  %4405 = vlog2.f32 %v1501_v54  ;;  %v7074_v54 = vpop.xlane.xlu0 %2891  ;;  %v1585_v12 = vmul.f32 0.33333334, %v1540_v62  ;;  %v1621_v63 = vmul.f32 1.442695, %v1578_v9  ;;  %v1631_v45 = vmul.f32 1.442695, %v1583_v24 }
 0x2b3   : > { %3263 = vbcast.lane.b32.xlu1 %v6970_v17, 280  ;;  %v4382_v27 = vpop.eup %4381  ;;  %4407 = vlog2.f32 %v1498_v34  ;;  %v1534_v36 = vmul.f32 0.6931472, %v4380_v59  ;;  %v2960_v24 = vmul.f32 0.00390625, %v6972_v52 }
 0x2b4   : > { %v4384_v43 = vpop.eup %4383  ;;  %4409 = vpow2.f32 %v1619_v6  ;;  %v1544_v34 = vmul.f32 0.6931472, %v4382_v27  ;;  %v1635_v9 = vmul.f32 1.442695, %v1585_v12 }
 0x2b5   : > { %3562 = vbcast.lane.b32.xlu0 %v6998_v4, 264  ;;  %v4386_v33 = vpop.eup %4385  ;;  %4411 = vlog2.f32 %v1500_v47  ;;  %v1538_v6 = vmul.f32 0.6931472, %v4384_v43  ;;  %v1625_v47 = vmul.f32 1.442695, %v1580_v10  ;;  %v7082_v27 = vpop.xlane.xlu1 %2912  ;;  %v2959_v10 = vmul.f32 0.00390625, %v6992_v42 }
 0x2b6   : > { %4413 = vpow2.f32 %v1613_v48  ;;  %v1548_v39 = vmul.f32 0.6931472, %v4386_v33  ;;  %v7084_v62 = vpop.xlane.xlu0 %2897 }
 0x2b7   : > { %3289 = vbcast.lane.b32.xlu1 %v7049_v51, 256  ;;  %4415 = vpow2.f32 %v1623_v22  ;;  %v1587_v22 = vmul.f32 0.33333334, %v1544_v34  ;;  %v1584_v3 = vmul.f32 0.33333334, %v1538_v6 }
 0x2b8   : > { %4417 = vlog2.f32 %v1502_v7  ;;  %v1589_v33 = vmul.f32 0.33333334, %v1548_v39 }
 0x2b9   : > { %3259 = vbcast.lane.b32.xlu0 %v6970_v17, 272  ;;  %v4388_v17 = vpop.eup %4387  ;;  %4419 = vpow2.f32 %v1617_v5  ;;  %v1639_v35 = vmul.f32 1.442695, %v1587_v22  ;;  %v7095_v42 = vpop.xlane.xlu1 %2918 }
 0x2ba   : > { %v7076_v31 = vpop.eup %4389  ;;  %v1552_v59 = vmul.f32 0.6931472, %v4388_v17  ;;  %v1643_v39 = vmul.f32 1.442695, %v1589_v33 }
 0x2bb   : > { %3514 = vbcast.lane.b32.xlu1 %v6985_v26, 280  ;;  %v1627_v26 = vmul.f32 1.442695, %v1581_v29  ;;  %v7080_v16 = vpop.eup %4391  ;;  %v1582_v29 = vmul.f32 0.33333334, %v1534_v36 }
 0x2bc   : > { %v4394_v56 = vpop.eup %4393 }
 0x2bd   : > { %3274 = vbcast.lane.b32.xlu0 %v7016_v55, 264  ;;  %v4396_v48 = vpop.eup %4395  ;;  %4421 = vpow2.f32 %v1627_v26  ;;  %v1546_v5 = vmul.f32 0.6931472, %v4394_v56  ;;  %v1629_v17 = vmul.f32 1.442695, %v1582_v29  ;;  %v7097_v29 = vpop.xlane.xlu0 %2903 }
 0x2be   : > { %v4398_v43 = vpop.eup %4397  ;;  %4423 = vpow2.f32 %v1621_v63  ;;  %v1591_v26 = vmul.f32 0.33333334, %v1552_v59  ;;  %v1556_v12 = vmul.f32 0.6931472, %v4396_v48  ;;  %v8774_v63 = vld [vmem:[#allocation27_spill] sm:$0xff] }
 0x2bf   : > { %3646 = vbcast.lane.b32.xlu1 %v7069_v53, 256  ;;  %v4400_v7 = vpop.eup %4399  ;;  %4425 = vpow2.f32 %v1631_v45  ;;  %v1490_v52 = vmul.f32 0.00390625, %v8774_v63  ;;  %v1550_v6 = vmul.f32 0.6931472, %v4398_v43  ;;  %v1633_v56 = vmul.f32 1.442695, %v1584_v3 }
 0x2c0   : > { %v7090_v36 = vpop.eup %4401  ;;  %4427 = vpow2.f32 %v1625_v47  ;;  %v1560_v0 = vmul.f32 0.6931472, %v4400_v7  ;;  %v1588_v47 = vmul.f32 0.33333334, %v1546_v5  ;;  %v1647_v48 = vmul.f32 1.442695, %v1591_v26 }
 0x2c1   : > { %3566 = vbcast.lane.b32.xlu0 %v6998_v4, 272  ;;  %v4404_v34 = vpop.eup %4403  ;;  %4429 = vpow2.f32 %v1635_v9  ;;  %v1593_v9 = vmul.f32 0.33333334, %v1556_v12  ;;  %v2963_v7 = vmul.f32 0.00390625, %v6989_v11  ;;  %v8775_v5 = vld [vmem:[#allocation13_spill] sm:$0xff] }
 0x2c2   : > { %v4406_v23 = vpop.eup %4405  ;;  %4431 = vlog2.f32 %v2960_v24  ;;  %v1554_v22 = vmul.f32 0.6931472, %v4404_v34  ;;  %v1595_v3 = vmul.f32 0.33333334, %v1560_v0  ;;  %v1641_v26 = vmul.f32 1.442695, %v1588_v47 }
 0x2c3   : > { %3282 = vbcast.lane.b32.xlu1 %v7016_v55, 280  ;;  %v4408_v45 = vpop.eup %4407  ;;  %4433 = vlog2.f32 %v2959_v10  ;;  %v1564_v24 = vmul.f32 0.6931472, %v4406_v23  ;;  %v7108_v10 = vrot.slane %v6978_v44, %v8775_v5  ;;  %v1651_v11 = vmul.f32 1.442695, %v1593_v9 }
 0x2c4   : > { %v7099_v59 = vpop.eup %4409  ;;  %4435 = vpow2.f32 %v1629_v17  ;;  %v1558_v33 = vmul.f32 0.6931472, %v4408_v45  ;;  %v1592_v12 = vmul.f32 0.33333334, %v1554_v22  ;;  %v7116_v45 = vpop.xlane.xlu0 %2909  ;;  %v1655_v5 = vmul.f32 1.442695, %v1595_v3 }
 0x2c5   : > { %3278 = vbcast.lane.b32.xlu0 %v7016_v55, 272  ;;  %v4412_v43 = vpop.eup %4411  ;;  %4437 = vlog2.f32 %v1490_v52  ;;  %v1590_v55 = vmul.f32 0.33333334, %v1550_v6  ;;  %v1597_v6 = vmul.f32 0.33333334, %v1564_v24  ;;  %v2961_v9 = vmul.f32 0.00390625, %v7008_v60 }
 0x2c6   : > { %v7102_v63 = vpop.eup %4413  ;;  %4439 = vpow2.f32 %v1639_v35  ;;  %v1562_v34 = vmul.f32 0.6931472, %v4412_v43  ;;  %v7112_v35 = vpop.xlane.xlu1 %2924  ;;  %v1649_v43 = vmul.f32 1.442695, %v1592_v12 }
 0x2c7   : > { %3654 = vbcast.lane.b32.xlu1 %v7069_v53, 272  ;;  %v7110_v17 = vpop.eup %4415  ;;  %4441 = vpow2.f32 %v1633_v56  ;;  %v1645_v52 = vmul.f32 1.442695, %v1590_v55  ;;  %v1594_v56 = vmul.f32 0.33333334, %v1558_v33 }
 0x2c8   : > { %v4418_v23 = vpop.eup %4417  ;;  %4443 = vpow2.f32 %v1643_v39  ;;  %v1596_v55 = vmul.f32 0.33333334, %v1562_v34 }
 0x2c9   : > { %3293 = vbcast.lane.b32.xlu0 %v7049_v51, 264  ;;  %v7114_v0 = vpop.eup %4419  ;;  %4445 = vlog2.f32 %v2963_v7  ;;  %v1566_v47 = vmul.f32 0.6931472, %v4418_v23  ;;  %v7136_v23 = vpop.xlane.xlu0 %2915 }
 0x2ca   : > { %v7118_v44 = vpop.eup %4421  ;;  %4447 = vpow2.f32 %v1647_v48  ;;  %v1659_v48 = vmul.f32 1.442695, %v1597_v6  ;;  %v7132_v3 = vpop.xlane.xlu1 %2930  ;;  %v1657_v12 = vmul.f32 1.442695, %v1596_v55 }
 0x2cb   : > { %3658 = vbcast.lane.b32.xlu1 %v7069_v53, 280  ;;  %v7122_v39 = vpop.eup %4423  ;;  %4449 = vpow2.f32 %v1641_v26  ;;  %v1598_v33 = vmul.f32 0.33333334, %v1566_v47  ;;  %v2965_v26 = vmul.f32 0.00390625, %v7005_v20 }
 0x2cc   : > { %v7125_v22 = vpop.eup %4425  ;;  %4451 = vpow2.f32 %v1651_v11 }
 0x2cd   : > { %3570 = vbcast.lane.b32.xlu0 %v6998_v4, 280  ;;  %v7127_v24 = vpop.eup %4427  ;;  %4453 = vpow2.f32 %v1645_v52  ;;  %v1653_v4 = vmul.f32 1.442695, %v1594_v56  ;;  %v2962_v52 = vmul.f32 0.00390625, %v7022_v57  ;;  %v1661_v20 = vmul.f32 1.442695, %v1598_v33 }
 0x2ce   : > { %v7129_v7 = vpop.eup %4429  ;;  %4455 = vpow2.f32 %v1655_v5  ;;  %v2967_v5 = vmul.f32 0.00390625, %v7019_v21  ;;  %v7148_v55 = vpop.xlane.xlu1 %2939  ;;  %v2971_v33 = vmul.f32 0.00390625, %v7052_v50 }
 0x2cf   : > { %3738 = vbcast.lane.b32.xlu1 %v7108_v10, 264  ;;  %v4432_v60 = vpop.eup %4431  ;;  %4457 = vlog2.f32 %v2961_v9  ;;  %v7153_v21 = vpop.xlane.xlu0 %2921 }
 0x2d0   : > { %v4434_v11 = vpop.eup %4433  ;;  %4459 = vpow2.f32 %v1649_v43  ;;  %v2994_v6 = vmul.f32 0.6931472, %v4432_v60  ;;  %v2964_v43 = vmul.f32 0.00390625, %v7038_v1 }
 0x2d1   : > { %3650 = vbcast.lane.b32.xlu0 %v7069_v53, 264  ;;  %v7138_v34 = vpop.eup %4435  ;;  %4461 = vpow2.f32 %v1659_v48  ;;  %v2992_v47 = vmul.f32 0.6931472, %v4434_v11  ;;  %v2969_v48 = vmul.f32 0.00390625, %v7033_v2  ;;  %v2973_v11 = vmul.f32 0.00390625, %v7071_v41 }
 0x2d2   : > { %v4438_v53 = vpop.eup %4437  ;;  %4463 = vpow2.f32 %v1653_v4  ;;  %v2966_v2 = vmul.f32 0.00390625, %v7055_v8 }
 0x2d3   : > { %3746 = vbcast.lane.b32.xlu1 %v7108_v10, 280  ;;  %v7143_v56 = vpop.eup %4439  ;;  %4465 = vlog2.f32 %v2965_v26  ;;  %v1542_v60 = vmul.f32 0.6931472, %v4438_v53  ;;  %v3055_v1 = vmul.f32 0.33333334, %v2992_v47  ;;  %v7173_v8 = vpop.xlane.xlu0 %2927 }
 0x2d4   : > { %8776 = vst [vmem:[#allocation43_spill] sm:$0xff] %v7143_v56  ;;  %v7145_v9 = vpop.eup %4441  ;;  %4467 = vpow2.f32 %v1657_v12  ;;  %v3056_v56 = vmul.f32 0.33333334, %v2994_v6  ;;  %v2968_v6 = vmul.f32 0.00390625, %v7074_v54 }
 0x2d5   : > { %3297 = vbcast.lane.b32.xlu0 %v7049_v51, 272  ;;  %v7150_v57 = vpop.eup %4443  ;;  %4469 = vlog2.f32 %v2962_v52  ;;  %v3087_v47 = vmul.f32 1.442695, %v3055_v1 }
 0x2d6   : > { %v4446_v4 = vpop.eup %4445  ;;  %4471 = vlog2.f32 %v2967_v5  ;;  %v3089_v5 = vmul.f32 1.442695, %v3056_v56  ;;  %v2975_v56 = vmul.f32 0.00390625, %v7082_v27 }
 0x2d7   : > { %v7157_v26 = vpop.eup %4447  ;;  %4473 = vpow2.f32 %v1661_v20  ;;  %v3000_v53 = vmul.f32 0.6931472, %v4446_v4  ;;  %v7169_v20 = vpop.xlane.xlu1 %2942 }
 0x2d8   : > { %v7160_v12 = vpop.eup %4449  ;;  %4475 = vlog2.f32 %v2964_v43 }
 0x2d9   : > { %3301 = vbcast.lane.b32.xlu0 %v7049_v51, 280  ;;  %v7163_v52 = vpop.eup %4451  ;;  %4477 = vlog2.f32 %v2969_v48  ;;  %v1586_v51 = vmul.f32 0.33333334, %v1542_v60  ;;  %v2970_v48 = vmul.f32 0.00390625, %v7084_v62  ;;  %v3059_v4 = vmul.f32 0.33333334, %v3000_v53 }
 0x2da   : > { %8777 = vst [vmem:[#allocation48_spill] sm:$0xff] %v7163_v52  ;;  %v7166_v50 = vpop.eup %4453  ;;  %4479 = vlog2.f32 %v2971_v33  ;;  %v8779_v52 = vld [vmem:[#allocation32_spill] sm:$0xff] }
 0x2db   : > { %v7171_v41 = vpop.eup %4455  ;;  %4481 = vlog2.f32 %v2973_v11  ;;  %v7181_v33 = vmul.f32 1.442695, %v1586_v51  ;;  %v7185_v1 = vmul.f32 %v7035_v18, %v8779_v52  ;;  %v2972_v11 = vmul.f32 0.00390625, %v7097_v29 }
 0x2dc   : > { %v4458_v43 = vpop.eup %4457  ;;  %4483 = vlog2.f32 %v2966_v2  ;;  %v8780_v2 = vld [vmem:[#allocation33_spill] sm:$0xff]  ;;  %v7202_v29 = vmul.f32 %v7027_v30, %v6784_v32  ;;  %v7219_v30 = vmul.f32 %v7102_v63, %v6804_v13  ;;  %v7235_v13 = vmul.f32 %v7076_v31, %v6857_v14 }
 0x2dd   : > { %3734 = vbcast.lane.b32.xlu0 %v7108_v10, 256  ;;  %v7176_v54 = vpop.eup %4459  ;;  %4485 = vlog2.f32 %v2968_v6  ;;  %8778 = vst [vmem:[#allocation49_spill] sm:$0xff] %v7181_v33  ;;  %v7193_v53 = vmul.f32 %v7062_v25, %v8780_v2  ;;  %v2996_v27 = vmul.f32 0.6931472, %v4458_v43  ;;  %v2977_v6 = vmul.f32 0.00390625, %v7095_v42  ;;  %v8781_v33 = vld [vmem:[#allocation35_spill] sm:$0xff]  ;;  %v2937_v43 = vpop.xlane.xlu0 %2936 }
 0x2de   : > { %v7179_v60 = vpop.eup %4461  ;;  %4487 = vpow2.f32 %v3089_v5  ;;  %v7198_v18 = vmul.f32 %v7080_v16, %v8781_v33  ;;  %v8782_v5 = vld [vmem:[#allocation74_spill] sm:$0xff]  ;;  %v7215_v42 = vmul.f32 %v7040_v28, %v6812_v37  ;;  %v3095_v16 = vmul.f32 1.442695, %v3059_v4 }
 0x2df   : > { %v7189_v62 = vpop.eup %4463  ;;  %4489 = vpow2.f32 %v3087_v47  ;;  %v7211_v47 = vmul.f32 %v7090_v36, %v8782_v5  ;;  %v2979_v36 = vmul.f32 0.00390625, %v7112_v35  ;;  %v3057_v33 = vmul.f32 0.33333334, %v2996_v27 }
 0x2e0   : > { %v4466_v51 = vpop.eup %4465  ;;  %4491 = vlog2.f32 %v2970_v48  ;;  %v2976_v37 = vmul.f32 0.00390625, %v7136_v23  ;;  %v7231_v4 = vmul.f32 %v7114_v0, %v6834_v19  ;;  %v7240_v63 = vmul.f32 %v7122_v39, %v6852_v61 }
 0x2e1   : > { %3742 = vbcast.lane.b32.xlu0 %v7108_v10, 272  ;;  %v2974_v10 = vmul.f32 0.00390625, %v7116_v45  ;;  %v7205_v52 = vpop.xlane.xlu1 %2951  ;;  %v7207_v25 = vpop.eup %4467  ;;  %4493 = vlog2.f32 %v2975_v56  ;;  %v7223_v45 = vmul.f32 %v7060_v40, %v6836_v58  ;;  %v3004_v2 = vmul.f32 0.6931472, %v4466_v51 }
 0x2e2   : > { %v4470_v32 = vpop.eup %4469  ;;  %4495 = vlog2.f32 %v2972_v11  ;;  %v2981_v58 = vmul.f32 0.00390625, %v7132_v3  ;;  %v2978_v23 = vmul.f32 0.00390625, %v7153_v21  ;;  %v7245_v19 = vmul.f32 %v7099_v59, %v6876_v38 }
 0x2e3   : > { %v4472_v48 = vpop.eup %4471  ;;  %4497 = vlog2.f32 %v2977_v6  ;;  %v2998_v35 = vmul.f32 0.6931472, %v4470_v32  ;;  %v2984_v14 = vmul.f32 0.00390625, %v7148_v55  ;;  %v7252_v61 = vmul.f32 %v7127_v24, %v6868_v49 }
 0x2e4   : > { %v7227_v28 = vpop.eup %4473  ;;  %4499 = vlog2.f32 %v2974_v10  ;;  %v3008_v0 = vmul.f32 0.6931472, %v4472_v48  ;;  %v3091_v39 = vmul.f32 1.442695, %v3057_v33  ;;  %v3061_v11 = vmul.f32 0.33333334, %v3004_v2 }
 0x2e5   : > { %v4476_v40 = vpop.eup %4475  ;;  %4501 = vpow2.f32 %v3095_v16  ;;  %8783 = vst [vmem:[#allocation51_spill] sm:$0xff] %v7252_v61  ;;  %v7256_v38 = vmul.f32 %v7110_v17, %v6898_v46  ;;  %v2980_v55 = vmul.f32 0.00390625, %v7173_v8  ;;  %v3058_v51 = vmul.f32 0.33333334, %v2998_v35 }
 0x2e6   : > { %v4478_v56 = vpop.eup %4477  ;;  %4503 = vlog2.f32 %v2979_v36  ;;  %v2934_v21 = vpop.xlane.xlu0 %2933  ;;  %v3002_v59 = vmul.f32 0.6931472, %v4476_v40  ;;  %v2985_v49 = vmul.f32 0.00390625, %v7169_v20  ;;  %v7262_v5 = vmul.f32 %v7138_v34, %v6892_v15  ;;  %v8785_v36 = vld [vmem:[#allocation71_spill] sm:$0xff] }
 0x2e7   : > { %v4480_v3 = vpop.eup %4479  ;;  %4505 = vlog2.f32 %v2976_v37  ;;  %v3012_v10 = vmul.f32 0.6931472, %v4478_v56  ;;  %v3063_v16 = vmul.f32 0.33333334, %v3008_v0  ;;  %v2983_v32 = vmul.f32 0.00390625, %v2937_v43  ;;  %v8787_v43 = vld [vmem:[#allocation75_spill] sm:$0xff] }
 0x2e8   : > { %v4482_v27 = vpop.eup %4481  ;;  %4507 = vlog2.f32 %v2981_v58  ;;  %8784 = vst [vmem:[#allocation52_spill] sm:$0xff] %v7262_v5  ;;  %v7270_v8 = vmul.f32 %v7118_v44, %v8785_v36  ;;  %v3099_v48 = vmul.f32 1.442695, %v3061_v11  ;;  %v3016_v33 = vmul.f32 0.6931472, %v4480_v3  ;;  %v8789_v56 = vld [vmem:[#allocation31_spill] sm:$0xff] }
 0x2e9   : > { %v4484_v6 = vpop.eup %4483  ;;  %4509 = vlog2.f32 %v2978_v23  ;;  %v3060_v2 = vmul.f32 0.33333334, %v3002_v59  ;;  %v3020_v37 = vmul.f32 0.6931472, %v4482_v27  ;;  %v2988_v15 = vmul.f32 0.00390625, %v7205_v52  ;;  %v8790_v36 = vld [vmem:[#allocation65_spill] sm:$0xff] }
 0x2ea   : > { %v4486_v24 = vpop.eup %4485  ;;  %4511 = vlog2.f32 %v2984_v14  ;;  %8786 = vst [vmem:[#allocation53_spill] sm:$0xff] %v7270_v8  ;;  %v7277_v58 = vmul.f32 %v7145_v9, %v8787_v43  ;;  %v3093_v40 = vmul.f32 1.442695, %v3058_v51  ;;  %v3065_v35 = vmul.f32 0.33333334, %v3012_v10 }
 0x2eb   : > { %v7248_v31 = vpop.xlane.xlu1 %2954  ;;  %v7266_v17 = vpop.eup %4487  ;;  %4513 = vpow2.f32 %v3091_v39  ;;  %v7281_v0 = vmul.f32 %v7125_v22, %v8789_v56  ;;  %v3103_v14 = vmul.f32 1.442695, %v3063_v16  ;;  %v3006_v3 = vmul.f32 0.6931472, %v4484_v6 }
 0x2ec   : > { %v7272_v20 = vpop.eup %4489  ;;  %4515 = vlog2.f32 %v2980_v55  ;;  %8788 = vst [vmem:[#allocation54_spill] sm:$0xff] %v7277_v58  ;;  %v3067_v11 = vmul.f32 0.33333334, %v3016_v33  ;;  %v3010_v27 = vmul.f32 0.6931472, %v4486_v24  ;;  %v2982_v9 = vmul.f32 0.00390625, %v2934_v21 }
 0x2ed   : > { %v4492_v34 = vpop.eup %4491  ;;  %4517 = vlog2.f32 %v2985_v49  ;;  %v3097_v55 = vmul.f32 1.442695, %v3060_v2  ;;  %v3069_v51 = vmul.f32 0.33333334, %v3020_v37  ;;  %v7287_v22 = vmul.f32 %v7129_v7, %v8790_v36  ;;  %v8792_v36 = vld [vmem:[#allocation64_spill] sm:$0xff]  ;;  %v8795_v58 = vld [vmem:[#allocation43_spill] sm:$0xff] }
 0x2ee   : > { %v4494_v23 = vpop.eup %4493  ;;  %4519 = vlog2.f32 %v2983_v32  ;;  %v3014_v10 = vmul.f32 0.6931472, %v4492_v34  ;;  %v3107_v6 = vmul.f32 1.442695, %v3065_v35  ;;  %v2989_v21 = vmul.f32 0.00390625, %v7248_v31 }
 0x2ef   : > { %v7264_v46 = vpop.permute.xlu1 %3156  ;;  %v4496_v52 = vpop.eup %4495  ;;  %4521 = vpow2.f32 %v3099_v48  ;;  %8791 = vst [vmem:[#allocation55_spill] sm:$0xff] %v7287_v22  ;;  %v3024_v16 = vmul.f32 0.6931472, %v4494_v23  ;;  %v3062_v48 = vmul.f32 0.33333334, %v3006_v3 }
 0x2f0   : > { %v4498_v59 = vpop.eup %4497  ;;  %4523 = vlog2.f32 %v2988_v15  ;;  %v3018_v33 = vmul.f32 0.6931472, %v4496_v52  ;;  %v3111_v37 = vmul.f32 1.442695, %v3067_v11  ;;  %v3064_v15 = vmul.f32 0.33333334, %v3010_v27 }
 0x2f1   : > { %v2949_v44 = vpop.xlane.xlu0 %2948  ;;  %v4500_v49 = vpop.eup %4499  ;;  %4525 = vpow2.f32 %v3093_v40  ;;  %v3028_v34 = vmul.f32 0.6931472, %v4498_v59  ;;  %v3115_v40 = vmul.f32 1.442695, %v3069_v51  ;;  %v3066_v35 = vmul.f32 0.33333334, %v3014_v10 }
 0x2f2   : > { %v7289_v32 = vpop.eup %4501  ;;  %4527 = vpow2.f32 %v3103_v14  ;;  %v3022_v23 = vmul.f32 0.6931472, %v4500_v49  ;;  %v7296_v14 = vmul.f32 %v7160_v12, %v8792_v36  ;;  %v3071_v31 = vmul.f32 0.33333334, %v3024_v16 }
 0x2f3   : > { %v7283_v39 = vpop.permute.xlu1 %3164  ;;  %v4504_v2 = vpop.eup %4503  ;;  %4529 = vlog2.f32 %v2982_v9  ;;  %v2987_v3 = vmul.f32 0.00390625, %v2949_v44  ;;  %v3101_v22 = vmul.f32 1.442695, %v3062_v48  ;;  %v3068_v11 = vmul.f32 0.33333334, %v3018_v33  ;;  %v8794_v44 = vld [vmem:[#allocation23_spill] sm:$0xff] }
 0x2f4   : > { %v4506_v7 = vpop.eup %4505  ;;  %4531 = vpow2.f32 %v3097_v55  ;;  %8793 = vst [vmem:[#allocation91_spill] sm:$0xff] %v7296_v14  ;;  %v3032_v27 = vmul.f32 0.6931472, %v4504_v2  ;;  %v3105_v55 = vmul.f32 1.442695, %v3064_v15  ;;  %v7304_v48 = vmul.f32 %v8795_v58, %v8794_v44 }
 0x2f5   : > { %v4508_v56 = vpop.eup %4507  ;;  %4533 = vpow2.f32 %v3107_v6  ;;  %v3073_v51 = vmul.f32 0.33333334, %v3028_v34  ;;  %v3026_v10 = vmul.f32 0.6931472, %v4506_v7  ;;  %v3109_v12 = vmul.f32 1.442695, %v3066_v35 }
 0x2f6   : > { %v4510_v52 = vpop.eup %4509  ;;  %4535 = vlog2.f32 %v2989_v21  ;;  %v3070_v36 = vmul.f32 0.33333334, %v3022_v23  ;;  %v3036_v6 = vmul.f32 0.6931472, %v4508_v56  ;;  %v3119_v33 = vmul.f32 1.442695, %v3071_v31 }
 0x2f7   : > { %v7292_v24 = vpop.permute.xlu1 %3168  ;;  %v2946_v43 = vpop.xlane.xlu0 %2945  ;;  %4537 = vpow2.f32 %v3111_v37  ;;  %v3030_v21 = vmul.f32 0.6931472, %v4510_v52  ;;  %v3113_v37 = vmul.f32 1.442695, %v3068_v11  ;;  %v3075_v15 = vmul.f32 0.33333334, %v3032_v27 }
 0x2f8   : > { %v4512_v59 = vpop.eup %4511  ;;  %4539 = vpow2.f32 %v3115_v40  ;;  %v8796_v35 = vld [vmem:[#allocation22_spill] sm:$0xff]  ;;  %v3123_v56 = vmul.f32 1.442695, %v3073_v51  ;;  %v3072_v58 = vmul.f32 0.33333334, %v3026_v10 }
 0x2f9   : > { %v7300_v49 = vpop.eup %4513  ;;  %4541 = vlog2.f32 %v2987_v3  ;;  %v3042_v34 = vmul.f32 0.6931472, %v4512_v59  ;;  %v7310_v23 = vmul.f32 %v7166_v50, %v8796_v35  ;;  %v3117_v31 = vmul.f32 1.442695, %v3070_v36 }
 0x2fa   : > { %v4516_v16 = vpop.eup %4515  ;;  %4543 = vpow2.f32 %v3101_v22  ;;  %v3077_v3 = vmul.f32 0.33333334, %v3036_v6  ;;  %v3074_v11 = vmul.f32 0.33333334, %v3030_v21  ;;  %v2986_v59 = vmul.f32 0.00390625, %v2946_v43  ;;  %v8799_v6 = vld [vmem:[#allocation36_spill] sm:$0xff] }
 0x2fb   : > { %v7298_v9 = vpop.permute.xlu1 %3179  ;;  %v4518_v8 = vpop.eup %4517  ;;  %8797 = vst [vmem:[#allocation78_spill] sm:$0xff] %v7310_v23  ;;  %4545 = vpow2.f32 %v3105_v55  ;;  %v3034_v52 = vmul.f32 0.6931472, %v4516_v16  ;;  %v3127_v50 = vmul.f32 1.442695, %v3075_v15  ;;  %v7326_v16 = vmul.f32 %v7176_v54, %v8799_v6  ;;  %v8801_v54 = vld [vmem:[#allocation38_spill] sm:$0xff] }
 0x2fc   : > { %v2958_v2 = vpop.xlane.xlu0 %2957  ;;  %v4520_v40 = vpop.eup %4519  ;;  %4547 = vpow2.f32 %v3109_v12  ;;  %v3044_v27 = vmul.f32 0.6931472, %v4518_v8  ;;  %v3080_v35 = vmul.f32 0.33333334, %v3042_v34  ;;  %v8798_v12 = vld [vmem:[#allocation37_spill] sm:$0xff]  ;;  %v8800_v34 = vld [vmem:[#allocation39_spill] sm:$0xff] }
 0x2fd   : > { %v7312_v44 = vpop.eup %4521  ;;  %4549 = vpow2.f32 %v3119_v33  ;;  %v3040_v55 = vmul.f32 0.6931472, %v4520_v40  ;;  %v7322_v36 = vmul.f32 %v7150_v57, %v8798_v12  ;;  %v3121_v8 = vmul.f32 1.442695, %v3072_v58  ;;  %v8804_v6 = vld [vmem:[#allocation48_spill] sm:$0xff] }
 0x2fe   : > { %v4524_v22 = vpop.eup %4523  ;;  %4551 = vpow2.f32 %v3113_v37  ;;  %v3131_v33 = vmul.f32 1.442695, %v3077_v3  ;;  %v3076_v21 = vmul.f32 0.33333334, %v3034_v52  ;;  %v7330_v40 = vmul.f32 %v7157_v26, %v8800_v34 }
 0x2ff   : > { %v7306_v7 = vpop.permute.xlu1 %3194  ;;  %v4526_v5 = vpop.eup %4525  ;;  %4553 = vpow2.f32 %v3123_v56  ;;  %v3050_v37 = vmul.f32 0.6931472, %v4524_v22  ;;  %v3125_v23 = vmul.f32 1.442695, %v3074_v11  ;;  %v3081_v61 = vmul.f32 0.33333334, %v3044_v27 }
 0x300   : > { %v7314_v14 = vpop.permute.xlu0 %3160  ;;  %v7318_v10 = vpop.eup %4527  ;;  %4555 = vpow2.f32 %v3117_v31  ;;  %v7338_v56 = vmul.f32 %v7189_v62, %v8801_v54  ;;  %v3137_v58 = vmul.f32 1.442695, %v3080_v35  ;;  %v3079_v31 = vmul.f32 0.33333334, %v3040_v55  ;;  %v8806_v55 = vld [vmem:[#allocation40_spill] sm:$0xff] }
 0x301   : > { %v4530_v43 = vpop.eup %4529  ;;  %4557 = vlog2.f32 %v2986_v59  ;;  %v3335_v22 = vmul.f32 %v7272_v20, %v7264_v46  ;;  %v2990_v11 = vmul.f32 0.00390625, %v2958_v2  ;;  %v8803_v59 = vld [vmem:[#allocation41_spill] sm:$0xff]  ;;  %v3129_v62 = vmul.f32 1.442695, %v3076_v21 }
 0x302   : > { %v4532_v15 = vpop.eup %4531  ;;  %8802 = vst [vmem:[#allocation19_spill] sm:$0xff] %v7338_v56  ;;  %4559 = vpow2.f32 %v3127_v50  ;;  %v3038_v26 = vmul.f32 0.6931472, %v4530_v43  ;;  %v7348_v34 = vmul.f32 %v8804_v6, %v8803_v59  ;;  %v3084_v50 = vmul.f32 0.33333334, %v3050_v37  ;;  %v8808_v43 = vld [vmem:[#allocation47_spill] sm:$0xff] }
 0x303   : > { %v7316_v51 = vpop.permute.xlu1 %3187  ;;  %v7334_v12 = vpop.eup %4533  ;;  %4561 = vpow2.f32 %v3121_v8  ;;  %v7354_v54 = vmul.f32 %v7207_v25, %v8806_v55  ;;  %v3139_v8 = vmul.f32 1.442695, %v3081_v61  ;;  %v3337_v46 = vmul.f32 %v7300_v49, %v7283_v39  ;;  %v8809_v49 = vld [vmem:[#allocation46_spill] sm:$0xff] }
 0x304   : > { %v7332_v57 = vpop.permute.xlu0 %3175  ;;  %v4536_v52 = vpop.eup %4535  ;;  %8805 = vst [vmem:[#allocation61_spill] sm:$0xff] %v7348_v34  ;;  %4563 = vpow2.f32 %v3131_v33  ;;  %v7362_v59 = vmul.f32 %v7171_v41, %v8808_v43  ;;  %v3135_v33 = vmul.f32 1.442695, %v3079_v31  ;;  %v3078_v25 = vmul.f32 0.33333334, %v3038_v26 }
 0x305   : > { %v7344_v27 = vpop.eup %4537  ;;  %8807 = vst [vmem:[#allocation16_spill] sm:$0xff] %v7354_v54  ;;  %4565 = vpow2.f32 %v3125_v23  ;;  %v3052_v21 = vmul.f32 0.6931472, %v4536_v52  ;;  %v7367_v23 = vsub.f32 %v7185_v1, %v3335_v22  ;;  %v3338_v61 = vmul.f32 %v4526_v5, %v7292_v24  ;;  %v8811_v52 = vld [vmem:[#allocation42_spill] sm:$0xff] }
 0x306   : > { %v7350_v35 = vpop.eup %4539  ;;  %4567 = vpow2.f32 %v3137_v58  ;;  %v7374_v55 = vmul.f32 %v7227_v28, %v8809_v49  ;;  %v3145_v41 = vmul.f32 1.442695, %v3084_v50  ;;  %v3340_v58 = vmul.f32 %v4532_v15, %v7298_v9 }
 0x307   : > { %v7340_v3 = vpop.permute.xlu1 %3213  ;;  %v4542_v2 = vpop.eup %4541  ;;  %4569 = vlog2.f32 %v2990_v11  ;;  %v7381_v26 = vmul.f32 %v7179_v60, %v8811_v52  ;;  %v7384_v5 = vsub.f32 %v7193_v53, %v3337_v46  ;;  %v3085_v28 = vmul.f32 0.33333334, %v3052_v21 }
 0x308   : > { %v7358_v20 = vpop.permute.xlu0 %3183  ;;  %v4544_v6 = vpop.eup %4543  ;;  %8810 = vst [vmem:[#allocation14_spill] sm:$0xff] %v7374_v55  ;;  %4571 = vpow2.f32 %v3129_v62  ;;  %v3048_v11 = vmul.f32 0.6931472, %v4542_v2  ;;  %v7389_v62 = vadd.f32 %v3335_v22, %v7185_v1  ;;  %v3343_v9 = vmul.f32 %v7318_v10, %v7306_v7 }
 0x309   : > { %v7370_v39 = vpop.eup %4545  ;;  %8812 = vst [vmem:[#allocation17_spill] sm:$0xff] %v7381_v26  ;;  %4573 = vpow2.f32 %v3139_v8  ;;  %8813 = vst [vmem:[#allocation90_spill] sm:$0xff] %v7384_v5  ;;  %v3133_v60 = vmul.f32 1.442695, %v3078_v25  ;;  %v7397_v8 = vmul.f32 %v7367_v23, %v7367_v23  ;;  %v7400_v2 = vmul.f32 %v3335_v22, %v7185_v1 }
 0x30a   : > { %v7377_v31 = vpop.eup %4547  ;;  %4575 = vpow2.f32 %v3135_v33  ;;  %v7403_v33 = vsub.f32 %v7198_v18, %v3338_v61  ;;  %v7408_v49 = vadd.f32 %v3337_v46, %v7193_v53  ;;  %v7411_v7 = vmul.f32 %v3337_v46, %v7193_v53 }
 0x30b   : > { %v7364_v37 = vpop.permute.xlu1 %3206  ;;  %v4550_v43 = vpop.eup %4549  ;;  %8814 = vst [vmem:[#allocation81_spill] sm:$0xff] %v7397_v8  ;;  %8815 = vst [vmem:[#allocation45_spill] sm:$0xff] %v7400_v2  ;;  %4577 = vpow2.f32 %v3145_v41  ;;  %v7414_v10 = vsub.f32 %v7211_v47, %v3340_v58  ;;  %v3083_v52 = vmul.f32 0.33333334, %v3048_v11  ;;  %v7418_v1 = vmul.f32 %v7384_v5, %v7384_v5 }
 0x30c   : > { %v7386_v24 = vpop.permute.xlu0 %3198  ;;  %v7393_v50 = vpop.eup %4551  ;;  %8816 = vst [vmem:[#allocation82_spill] sm:$0xff] %v7403_v33  ;;  %8817 = vst [vmem:[#allocation18_spill] sm:$0xff] %v7411_v7  ;;  %v7421_v22 = vadd.f32 %v3338_v61, %v7198_v18  ;;  %v3336_v41 = vmul.f32 %v7266_v17, %v7314_v14  ;;  %v3147_v53 = vmul.f32 1.442695, %v3085_v28  ;;  %v7428_v46 = vmul.f32 %v3338_v61, %v7198_v18 }
 0x30d   : > { %v7405_v21 = vpop.eup %4553  ;;  %8818 = vst [vmem:[#allocation50_spill] sm:$0xff] %v7418_v1  ;;  %v7431_v7 = vsub.f32 %v7235_v13, %v3343_v9  ;;  %v3342_v11 = vmul.f32 %v4544_v6, %v7316_v51  ;;  %4579 = vpow2.f32 %v3133_v60  ;;  %v7436_v54 = vmul.f32 %v7403_v33, %v7403_v33 }
 0x30e   : > { %v4556_v25 = vpop.eup %4555  ;;  %8819 = vst [vmem:[#allocation60_spill] sm:$0xff] %v7421_v22  ;;  %8820 = vst [vmem:[#allocation44_spill] sm:$0xff] %v7428_v46  ;;  %v7439_v17 = vadd.f32 %v3340_v58, %v7211_v47  ;;  %v7445_v18 = vmul.f32 %v7414_v10, %v7414_v10  ;;  %v7448_v61 = vmul.f32 %v3340_v58, %v7211_v47  ;;  %v3143_v46 = vmul.f32 1.442695, %v3083_v52 }
 0x30f   : > { %v3233_v15 = vpop.permute.xlu1 %3232  ;;  %v4558_v55 = vpop.eup %4557  ;;  %8821 = vst [vmem:[#allocation85_spill] sm:$0xff] %v7436_v54  ;;  %v3339_v51 = vmul.f32 %v7289_v32, %v7332_v57  ;;  %v3347_v6 = vmul.f32 %v7344_v27, %v7340_v3  ;;  %4581 = vpow2.f32 %v3147_v53  ;;  %v7466_v47 = vmul.f32 %v7431_v7, %v7431_v7 }
 0x310   : > { %v7425_v2 = vpop.permute.xlu0 %3202  ;;  %v4560_v1 = vpop.eup %4559  ;;  %8823 = vst [vmem:[#allocation66_spill] sm:$0xff] %v7445_v18  ;;  %8824 = vst [vmem:[#allocation11_spill] sm:$0xff] %v7448_v61  ;;  %v3046_v54 = vmul.f32 0.6931472, %v4558_v55  ;;  %v7469_v32 = vmul.f32 %v3343_v9, %v7235_v13  ;;  %v7472_v57 = vsub.f32 %v7219_v30, %v3342_v11  ;;  %v7477_v55 = vadd.f32 %v3336_v41, %v7202_v29 }
 0x311   : > { %v4562_v28 = vpop.eup %4561  ;;  %v7480_v58 = vmul.f32 %v3336_v41, %v7202_v29  ;;  %v7482_v52 = vmul.f32 %v4550_v43, %v3233_v15  ;;  %v3411_v5 = vsub.f32 %v7256_v38, %v3347_v6  ;;  %4583 = vpow2.f32 %v3143_v46 }
 0x312   : > { %v7454_v60 = vpop.eup %4563  ;;  %8825 = vst [vmem:[#allocation15_spill] sm:$0xff] %v7469_v32  ;;  %8826 = vst [vmem:[#allocation58_spill] sm:$0xff] %v7472_v57  ;;  %v7493_v32 = vmul.f32 %v3342_v11, %v7219_v30  ;;  %v3379_v46 = vadd.f32 %v3347_v6, %v7256_v38 }
 0x313   : > { %v3226_v26 = vpop.permute.xlu1 %3225  ;;  %v7462_v18 = vpop.eup %4565  ;;  %8827 = vst [vmem:[#allocation20_spill] sm:$0xff] %v7480_v58  ;;  %v3383_v56 = vadd.f32 %v7482_v52, %v7281_v0 }
 0x314   : > { %v7441_v14 = vmul.f32 %v4556_v25, %v3226_v26  ;;  %v7457_v26 = vsub.f32 %v7202_v29, %v3336_v41  ;;  %v3375_v25 = vadd.f32 %v3343_v9, %v7235_v13  ;;  %v7460_v33 = vpop.permute.xlu0 %3217  ;;  %v7474_v27 = vpop.eup %4567  ;;  %v7487_v13 = vsub.f32 %v7215_v42, %v3339_v51  ;;  %8829 = vst [vmem:[#allocation59_spill] sm:$0xff] %v7493_v32 }
 0x315   : > { %v4570_v61 = vpop.eup %4569  ;;  %v7490_v9 = vadd.f32 %v3342_v11, %v7219_v30  ;;  %v3082_v29 = vmul.f32 0.33333334, %v3046_v54  ;;  %v7509_v30 = vadd.f32 %v3339_v51, %v7215_v42  ;;  %v3341_v11 = vmul.f32 %v7312_v44, %v7358_v20 }
 0x316   : > { %8822 = vst [vmem:[#allocation76_spill] sm:$0xff] %v7441_v14  ;;  %v7496_v8 = vpop.eup %4571  ;;  %v7500_v43 = vmul.f32 %v7457_v26, %v7457_v26  ;;  %v7515_v54 = vmul.f32 %v7472_v57, %v7472_v57  ;;  %v3054_v58 = vmul.f32 0.6931472, %v4570_v61  ;;  %v7528_v44 = vmul.f32 %v7487_v13, %v7487_v13 }
 0x317   : > { %v3252_v3 = vpop.permute.xlu1 %3251  ;;  %8828 = vst [vmem:[#allocation21_spill] sm:$0xff] %v7490_v9  ;;  %v7506_v41 = vpop.eup %4573  ;;  %v7530_v20 = vmul.f32 %v3411_v5, %v3411_v5 }
 0x318   : > { %v7484_v53 = vmul.f32 %v4560_v1, %v3252_v3  ;;  %8830 = vst [vmem:[#allocation83_spill] sm:$0xff] %v7500_v43  ;;  %v7502_v15 = vpop.permute.xlu0 %3221  ;;  %8831 = vst [vmem:[#allocation56_spill] sm:$0xff] %v7506_v41  ;;  %v4576_v32 = vpop.eup %4575  ;;  %v7521_v43 = vmul.f32 %v3339_v51, %v7215_v42  ;;  %v3141_v42 = vmul.f32 1.442695, %v3082_v29  ;;  %v3346_v51 = vmul.f32 %v7377_v31, %v7364_v37 }
 0x319   : > { %8832 = vst [vmem:[#allocation57_spill] sm:$0xff] %v7515_v54  ;;  %8834 = vst [vmem:[#allocation84_spill] sm:$0xff] %v7528_v44  ;;  %v7533_v54 = vmul.f32 %v3347_v6, %v7256_v38  ;;  %v7536_v61 = vpop.eup %4577  ;;  %v7543_v44 = vadd.f32 %v3341_v11, %v7223_v45  ;;  %v3344_v38 = vmul.f32 %v7370_v39, %v7386_v24 }
 0x31a   : > { %v3387_v1 = vadd.f32 %v7484_v53, %v7304_v48  ;;  %8833 = vst [vmem:[#allocation10_spill] sm:$0xff] %v7521_v43  ;;  %8836 = vst [vmem:[#allocation86_spill] sm:$0xff] %v7536_v61  ;;  %v3415_v6 = vsub.f32 %v7281_v0, %v7482_v52  ;;  %v7554_v37 = vsub.f32 %v7223_v45, %v3341_v11  ;;  %4585 = vpow2.f32 %v3141_v42 }
 0x31b   : > { %v7518_v3 = vpop.permute.xlu1 %3502  ;;  %8835 = vst [vmem:[#allocation87_spill] sm:$0xff] %v7533_v54  ;;  %v3086_v54 = vmul.f32 0.33333334, %v3054_v58  ;;  %v7562_v39 = vmul.f32 %v3341_v11, %v7223_v45  ;;  %v3345_v24 = vmul.f32 %v7334_v12, %v7425_v2  ;;  %v7582_v11 = vsub.f32 %v7231_v4, %v3344_v38 }
 0x31c   : > { %v3528_v34 = vmul.f32 %v7518_v3, %v3375_v25  ;;  %v3532_v57 = vmul.f32 %v7518_v3, %v3379_v46  ;;  %v3237_v43 = vpop.permute.xlu0 %3236  ;;  %v3536_v25 = vmul.f32 %v7518_v3, %v3383_v56  ;;  %v3540_v22 = vmul.f32 %v7518_v3, %v3387_v1  ;;  %v7559_v1 = vpop.eup %4579 }
 0x31d   : > { %v7549_v46 = vmul.f32 %v4562_v28, %v3237_v43  ;;  %8837 = vst [vmem:[#allocation67_spill] sm:$0xff] %v7562_v39  ;;  %v7568_v28 = vsub.f32 %v7304_v48, %v7484_v53  ;;  %v7572_v43 = vadd.f32 %v3346_v51, %v7240_v63  ;;  %v7591_v9 = vpop.eup %4581  ;;  %v3149_v41 = vmul.f32 1.442695, %v3086_v54 }
 0x31e   : > { %8840 = vst [vmem:[#allocation80_spill] sm:$0xff] %v7591_v9  ;;  %v7611_v54 = vadd.f32 %v3344_v38, %v7231_v4  ;;  %v7622_v42 = vmul.f32 %v7482_v52, %v7281_v0  ;;  %v7639_v0 = vmul.f32 %v3345_v24, %v7245_v19 }
 0x31f   : > { %v7551_v29 = vpop.permute.xlu1 %3558  ;;  %8838 = vst [vmem:[#allocation79_spill] sm:$0xff] %v7572_v43  ;;  %4587 = vpow2.f32 %v3149_v41  ;;  %v8856_v41 = vld [vmem:[#allocation91_spill] sm:$0xff] }
 0x320   : > { %v3584_v56 = vmul.f32 %v7551_v29, %v7431_v7  ;;  %v3588_v31 = vmul.f32 %v7551_v29, %v3411_v5  ;;  %v3592_v58 = vmul.f32 %v7551_v29, %v3415_v6  ;;  %v7575_v7 = vsub.f32 %v7240_v63, %v3346_v51  ;;  %v3241_v5 = vpop.permute.xlu0 %3240  ;;  %8848 = vst [vmem:[#allocation73_spill] sm:$0xff] %v7622_v42  ;;  %v8860_v42 = vld [vmem:[#allocation55_spill] sm:$0xff] }
 0x321   : > { %v7585_v12 = vmul.f32 %v7405_v21, %v3241_v5  ;;  %v3596_v43 = vmul.f32 %v7551_v29, %v7568_v28  ;;  %v7601_v21 = vmul.f32 %v7554_v37, %v7554_v37  ;;  %8850 = vst [vmem:[#allocation29_spill] sm:$0xff] %v7639_v0 }
 0x322   : > { %8839 = vst [vmem:[#allocation68_spill] sm:$0xff] %v7575_v7  ;;  %v7577_v61 = vadd.f32 %v3584_v56, %v3528_v34  ;;  %v7579_v45 = vadd.f32 %v3588_v31, %v3532_v57  ;;  %v7587_v39 = vadd.f32 %v3592_v58, %v3536_v25  ;;  %v7594_v34 = vmul.f32 %v3346_v51, %v7240_v63  ;;  %v7624_v58 = vpop.eup %4583 }
 0x323   : > { %v3245_v2 = vpop.permute.xlu1 %3244  ;;  %8843 = vst [vmem:[#allocation25_spill] sm:$0xff] %v7601_v21  ;;  %v7604_v25 = vsub.f32 %v7245_v19, %v3345_v24  ;;  %v3348_v56 = vmul.f32 %v7393_v50, %v7460_v33  ;;  %v7608_v31 = vadd.f32 %v3596_v43, %v3540_v22  ;;  %v7614_v63 = vmul.f32 %v3344_v38, %v7231_v4 }
 0x324   : > { %8841 = vst [vmem:[#allocation70_spill] sm:$0xff] %v7594_v34  ;;  %v7597_v57 = vmul.f32 %v7462_v18, %v3245_v2  ;;  %v7618_v18 = vmul.f32 %v7575_v7, %v7575_v7  ;;  %v3256_v51 = vpop.permute.xlu0 %3255  ;;  %v7628_v50 = vmul.f32 %v7582_v11, %v7582_v11  ;;  %v7630_v33 = vmul.f32 %v3415_v6, %v3415_v6  ;;  %v8852_v6 = vld [vmem:[#allocation51_spill] sm:$0xff] }
 0x325   : > { %8844 = vst [vmem:[#allocation24_spill] sm:$0xff] %v7604_v25  ;;  %8845 = vst [vmem:[#allocation88_spill] sm:$0xff] %v7608_v31  ;;  %v3349_v4 = vmul.f32 %v7350_v35, %v7502_v15  ;;  %v3356_v22 = vmul.f32 %v7496_v8, %v3256_v51  ;;  %v7636_v43 = vadd.f32 %v3345_v24, %v7245_v19  ;;  %v8853_v35 = vld [vmem:[#allocation52_spill] sm:$0xff] }
 0x326   : > { %8842 = vst [vmem:[#allocation69_spill] sm:$0xff] %v7597_v57  ;;  %8846 = vst [vmem:[#allocation26_spill] sm:$0xff] %v7614_v63  ;;  %v7643_v5 = vmul.f32 %v7604_v25, %v7604_v25  ;;  %v3380_v2 = vadd.f32 %v3348_v56, %v8852_v6  ;;  %v3412_v57 = vsub.f32 %v8852_v6, %v3348_v56 }
 0x327   : > { %8847 = vst [vmem:[#allocation89_spill] sm:$0xff] %v7618_v18  ;;  %8849 = vst [vmem:[#allocation72_spill] sm:$0xff] %v7628_v50  ;;  %v3271_v38 = vpop.permute.xlu1 %3270  ;;  %v7649_v8 = vsub.f32 %v8853_v35, %v7441_v14  ;;  %v7652_v15 = vmul.f32 %v3348_v56, %v8852_v6  ;;  %v3388_v51 = vadd.f32 %v3356_v22, %v8856_v41  ;;  %v8859_v6 = vld [vmem:[#allocation54_spill] sm:$0xff] }
 0x328   : > { %v3359_v52 = vmul.f32 %v4576_v32, %v3271_v38  ;;  %8851 = vst [vmem:[#allocation28_spill] sm:$0xff] %v7643_v5  ;;  %v7655_v19 = vpop.permute.xlu0 %3506  ;;  %v8857_v38 = vld [vmem:[#allocation53_spill] sm:$0xff]  ;;  %v7665_v14 = vmul.f32 %v7484_v53, %v7304_v48  ;;  %v3576_v56 = vmul.f32 %v7551_v29, %v7367_v23  ;;  %v3384_v35 = vadd.f32 %v7549_v46, %v8859_v6 }
 0x329   : > { %8854 = vst [vmem:[#allocation77_spill] sm:$0xff] %v7649_v8  ;;  %8855 = vst [vmem:[#allocation62_spill] sm:$0xff] %v7652_v15  ;;  %v3381_v0 = vadd.f32 %v3349_v4, %v8857_v38  ;;  %v7661_v34 = vsub.f32 %v8857_v38, %v3349_v4  ;;  %v3385_v31 = vadd.f32 %v7585_v12, %v8860_v42 }
 0x32a   : > { %v3391_v32 = vadd.f32 %v3359_v52, %v7330_v40  ;;  %v3423_v24 = vsub.f32 %v7330_v40, %v3359_v52  ;;  %8858 = vst [vmem:[#allocation63_spill] sm:$0xff] %v7665_v14  ;;  %v3416_v18 = vsub.f32 %v8859_v6, %v7549_v46  ;;  %v3420_v48 = vsub.f32 %v8856_v41, %v3356_v22 }
 0x32b   : > { %v7667_v8 = vpop.permute.xlu1 %3510  ;;  %v3533_v53 = vmul.f32 %v7655_v19, %v3380_v2  ;;  %v3537_v15 = vmul.f32 %v7655_v19, %v3384_v35  ;;  %v3541_v7 = vmul.f32 %v7655_v19, %v3388_v51  ;;  %v7693_v5 = vmul.f32 %v3412_v57, %v3412_v57  ;;  %v7707_v51 = vpop.eup %4585 }
 0x32c   : > { %v3544_v63 = vmul.f32 %v7518_v3, %v3391_v32  ;;  %v3600_v50 = vmul.f32 %v7551_v29, %v3423_v24  ;;  %v7682_v14 = vmul.f32 %v7667_v8, %v3381_v0  ;;  %v7684_v23 = vpop.permute.xlu0 %3562  ;;  %v7690_v32 = vmul.f32 %v7667_v8, %v3385_v31 }
 0x32d   : > { %v3520_v2 = vmul.f32 %v7518_v3, %v7389_v62  ;;  %v3580_v0 = vmul.f32 %v7551_v29, %v7487_v13  ;;  %v3589_v25 = vmul.f32 %v7684_v23, %v3412_v57  ;;  %v3597_v35 = vmul.f32 %v7684_v23, %v3420_v48 }
 0x32e   : > { %v7686_v9 = vadd.f32 %v3600_v50, %v3544_v63  ;;  %8862 = vst [vmem:[#allocation12_spill] sm:$0xff] %v7690_v32  ;;  %v7702_v63 = vsub.f32 %v8860_v42, %v7585_v12  ;;  %v3593_v50 = vmul.f32 %v7684_v23, %v3416_v18  ;;  %v7714_v62 = vmul.f32 %v7568_v28, %v7568_v28 }
 0x32f   : > { %v3264_v21 = vpop.permute.xlu1 %3263  ;;  %v3524_v13 = vmul.f32 %v7518_v3, %v7509_v30  ;;  %v7718_v57 = vadd.f32 %v3589_v25, %v3533_v53  ;;  %v7732_v28 = vmul.f32 %v3416_v18, %v3416_v18  ;;  %v7737_v53 = vadd.f32 %v3597_v35, %v3541_v7 }
 0x330   : > { %8861 = vst [vmem:[#allocation34_spill] sm:$0xff] %v7686_v9  ;;  %v3358_v31 = vmul.f32 %v7559_v1, %v3264_v21  ;;  %v7710_v9 = vmul.f32 %v3349_v4, %v8857_v38  ;;  %v7722_v1 = vmul.f32 %v7661_v34, %v7661_v34  ;;  %v7726_v21 = vmul.f32 %v7549_v46, %v8859_v6  ;;  %v3260_v32 = vpop.permute.xlu0 %3259 }
 0x331   : > { %8864 = vst [vmem:[#allocation13_spill] sm:$0xff] %v7718_v57  ;;  %v7728_v4 = vadd.f32 %v3576_v56, %v3520_v2  ;;  %v7730_v38 = vadd.f32 %v3593_v50, %v3537_v15  ;;  %v7735_v25 = vadd.f32 %v3580_v0, %v3524_v13  ;;  %8865 = vst [vmem:[#allocation32_spill] sm:$0xff] %v7737_v53  ;;  %v7751_v56 = vpop.eup %4587 }
 0x332   : > { %8863 = vst [vmem:[#allocation27_spill] sm:$0xff] %v7710_v9  ;;  %v3357_v9 = vmul.f32 %v7454_v60, %v3260_v32  ;;  %v7741_v57 = vmul.f32 %v7702_v63, %v7702_v63  ;;  %v7745_v46 = vmul.f32 %v7585_v12, %v8860_v42  ;;  %v7748_v15 = vmul.f32 %v3356_v22, %v8856_v41 }
 0x333   : > { %v3290_v30 = vpop.permute.xlu1 %3289  ;;  %v7753_v60 = vmul.f32 %v3420_v48, %v3420_v48  ;;  %v7756_v7 = vmul.f32 %v3359_v52, %v7330_v40  ;;  %v3521_v32 = vmul.f32 %v7655_v19, %v7477_v55  ;;  %v3529_v22 = vmul.f32 %v7655_v19, %v7611_v54 }
 0x334   : > { %v3363_v18 = vmul.f32 %v7624_v58, %v3290_v30  ;;  %v3389_v6 = vadd.f32 %v3357_v9, %v7322_v36  ;;  %v3275_v2 = vpop.permute.xlu0 %3274  ;;  %v3525_v58 = vmul.f32 %v7655_v19, %v7439_v17  ;;  %v3577_v52 = vmul.f32 %v7684_v23, %v7457_v26  ;;  %v8867_v26 = vld [vmem:[#allocation78_spill] sm:$0xff] }
 0x335   : > { %v3360_v41 = vmul.f32 %v7474_v27, %v3275_v2  ;;  %v3581_v55 = vmul.f32 %v7684_v23, %v7414_v10  ;;  %v7777_v0 = vmul.f32 %v3423_v24, %v3423_v24  ;;  %v3585_v27 = vmul.f32 %v7684_v23, %v7582_v11 }
 0x336   : > { %v3395_v12 = vadd.f32 %v3363_v18, %v7362_v59  ;;  %v3427_v42 = vsub.f32 %v7362_v59, %v3363_v18  ;;  %v7775_v48 = vmul.f32 %v7667_v8, %v3389_v6  ;;  %v7786_v13 = vsub.f32 %v8867_v26, %v3358_v31 }
 0x337   : > { %v7768_v40 = vpop.permute.xlu1 %3514  ;;  %v3392_v54 = vadd.f32 %v3360_v41, %v7326_v16  ;;  %v3424_v35 = vsub.f32 %v7326_v16, %v3360_v41  ;;  %v3526_v10 = vmul.f32 %v7667_v8, %v7543_v44  ;;  %v7791_v24 = vsub.f32 %v7322_v36, %v3357_v9 }
 0x338   : > { %8866 = vst [vmem:[#allocation33_spill] sm:$0xff] %v7775_v48  ;;  %v3548_v17 = vmul.f32 %v7518_v3, %v3395_v12  ;;  %v3604_v50 = vmul.f32 %v7551_v29, %v3427_v42  ;;  %8868 = vst [vmem:[#allocation35_spill] sm:$0xff] %v7786_v13  ;;  %v7793_v30 = vpop.permute.xlu0 %3566  ;;  %v3522_v29 = vmul.f32 %v7667_v8, %v7408_v49 }
 0x339   : > { %8869 = vst [vmem:[#allocation74_spill] sm:$0xff] %v7791_v24  ;;  %v3530_v11 = vmul.f32 %v7667_v8, %v7636_v43  ;;  %v3545_v6 = vmul.f32 %v7655_v19, %v3392_v54  ;;  %v3601_v2 = vmul.f32 %v7684_v23, %v3424_v35  ;;  %v7805_v44 = vadd.f32 %v3577_v52, %v3521_v32  ;;  %v8879_v52 = vld [vmem:[#allocation56_spill] sm:$0xff] }
 0x33a   : > { %v7795_v3 = vadd.f32 %v3604_v50, %v3548_v17  ;;  %v7807_v48 = vadd.f32 %v3581_v55, %v3525_v58  ;;  %v7810_v53 = vadd.f32 %v3358_v31, %v8867_v26  ;;  %v7813_v17 = vmul.f32 %v3358_v31, %v8867_v26  ;;  %v8880_v26 = vld [vmem:[#allocation21_spill] sm:$0xff] }
 0x33b   : > { %v7803_v12 = vpop.permute.xlu1 %3646  ;;  %v7815_v49 = vadd.f32 %v3585_v27, %v3529_v22  ;;  %v7820_v50 = vmul.f32 %v3357_v9, %v7322_v36  ;;  %v7822_v54 = vadd.f32 %v3601_v2, %v3545_v6  ;;  %v7826_v32 = vmul.f32 %v7786_v13, %v7786_v13  ;;  %v8894_v13 = vld [vmem:[#allocation25_spill] sm:$0xff] }
 0x33c   : > { %8870 = vst [vmem:[#allocation71_spill] sm:$0xff] %v7795_v3  ;;  %8871 = vst [vmem:[#allocation75_spill] sm:$0xff] %v7810_v53  ;;  %v3672_v43 = vmul.f32 %v7803_v12, %v7466_v47  ;;  %v3676_v58 = vmul.f32 %v7803_v12, %v7530_v20  ;;  %v7832_v31 = vmul.f32 %v7791_v24, %v7791_v24  ;;  %v3279_v36 = vpop.permute.xlu0 %3278 }
 0x33d   : > { %8872 = vst [vmem:[#allocation31_spill] sm:$0xff] %v7813_v17  ;;  %8873 = vst [vmem:[#allocation65_spill] sm:$0xff] %v7820_v50  ;;  %v7834_v22 = vmul.f32 %v3427_v42, %v3427_v42  ;;  %v7837_v47 = vmul.f32 %v3363_v18, %v7362_v59  ;;  %v3361_v55 = vmul.f32 %v8879_v52, %v3279_v36  ;;  %v8883_v36 = vld [vmem:[#allocation61_spill] sm:$0xff]  ;;  %v8888_v50 = vld [vmem:[#allocation90_spill] sm:$0xff] }
 0x33e   : > { %8874 = vst [vmem:[#allocation64_spill] sm:$0xff] %v7822_v54  ;;  %8875 = vst [vmem:[#allocation23_spill] sm:$0xff] %v7826_v32  ;;  %v7840_v9 = vadd.f32 %v3672_v43, %v7577_v61  ;;  %v7845_v6 = vmul.f32 %v7768_v40, %v8880_v26  ;;  %v7848_v20 = vadd.f32 %v3676_v58, %v7579_v45  ;;  %v8882_v61 = vld [vmem:[#allocation60_spill] sm:$0xff] }
 0x33f   : > { %8876 = vst [vmem:[#allocation43_spill] sm:$0xff] %v7832_v31  ;;  %8877 = vst [vmem:[#allocation22_spill] sm:$0xff] %v7834_v22  ;;  %v3283_v27 = vpop.permute.xlu1 %3282  ;;  %v3680_v42 = vmul.f32 %v7803_v12, %v7630_v33  ;;  %v7853_v59 = vmul.f32 %v3360_v41, %v7326_v16  ;;  %v7858_v2 = vmul.f32 %v7768_v40, %v8882_v61  ;;  %v8884_v41 = vld [vmem:[#allocation19_spill] sm:$0xff]  ;;  %v8886_v61 = vld [vmem:[#allocation84_spill] sm:$0xff] }
 0x340   : > { %8878 = vst [vmem:[#allocation37_spill] sm:$0xff] %v7837_v47  ;;  %v3362_v18 = vmul.f32 %v7707_v51, %v3283_v27  ;;  %v3590_v43 = vmul.f32 %v7793_v30, %v7661_v34  ;;  %v3393_v52 = vadd.f32 %v3361_v55, %v8883_v36  ;;  %v3425_v45 = vsub.f32 %v8883_v36, %v3361_v55  ;;  %v3294_v16 = vpop.permute.xlu0 %3293  ;;  %v8885_v27 = vld [vmem:[#allocation81_spill] sm:$0xff]  ;;  %v8889_v31 = vld [vmem:[#allocation79_spill] sm:$0xff] }
 0x341   : > { %8881 = vst [vmem:[#allocation36_spill] sm:$0xff] %v7853_v59  ;;  %v3582_v58 = vmul.f32 %v7793_v30, %v7554_v37  ;;  %v7867_v33 = vadd.f32 %v3680_v42, %v7587_v39  ;;  %v3664_v26 = vmul.f32 %v7803_v12, %v8885_v27  ;;  %v3668_v54 = vmul.f32 %v7803_v12, %v8886_v61  ;;  %v8887_v37 = vld [vmem:[#allocation86_spill] sm:$0xff] }
 0x342   : > { %v3394_v51 = vadd.f32 %v3362_v18, %v8884_v41  ;;  %v7875_v34 = vadd.f32 %v3590_v43, %v7682_v14  ;;  %v3546_v3 = vmul.f32 %v7667_v8, %v3393_v52  ;;  %v3602_v59 = vmul.f32 %v7793_v30, %v3425_v45  ;;  %v8890_v14 = vld [vmem:[#allocation24_spill] sm:$0xff] }
 0x343   : > { %v3364_v47 = vmul.f32 %v8887_v37, %v3294_v16  ;;  %v3426_v39 = vsub.f32 %v8884_v41, %v3362_v18  ;;  %v7881_v42 = vpop.permute.xlu1 %3654  ;;  %v3578_v27 = vmul.f32 %v7793_v30, %v8888_v50  ;;  %v3531_v61 = vmul.f32 %v7768_v40, %v8889_v31  ;;  %v8893_v16 = vld [vmem:[#allocation16_spill] sm:$0xff] }
 0x344   : > { %v3547_v22 = vmul.f32 %v7768_v40, %v3394_v51  ;;  %v3586_v43 = vmul.f32 %v7793_v30, %v8890_v14  ;;  %v7890_v52 = vmul.f32 %v3424_v35, %v3424_v35  ;;  %v7892_v24 = vadd.f32 %v3602_v59, %v3546_v3  ;;  %v7896_v32 = vpop.permute.xlu0 %3570 }
 0x345   : > { %v3396_v37 = vadd.f32 %v3364_v47, %v8893_v16  ;;  %v3428_v17 = vsub.f32 %v8893_v16, %v3364_v47  ;;  %v7899_v51 = vadd.f32 %v3664_v26, %v7728_v4  ;;  %v7902_v50 = vadd.f32 %v3668_v54, %v7735_v25 }
 0x346   : > { %8891 = vst [vmem:[#allocation39_spill] sm:$0xff] %v7890_v52  ;;  %8892 = vst [vmem:[#allocation38_spill] sm:$0xff] %v7892_v24  ;;  %v3614_v31 = vadd.f32 %v3582_v58, %v3526_v10  ;;  %v3670_v14 = vmul.f32 %v7881_v42, %v8894_v13  ;;  %v3603_v59 = vmul.f32 %v7896_v32, %v3426_v39  ;;  %v8895_v52 = vld [vmem:[#allocation50_spill] sm:$0xff] }
 0x347   : > { %v3549_v35 = vmul.f32 %v7655_v19, %v3396_v37  ;;  %v3605_v3 = vmul.f32 %v7684_v23, %v3428_v17  ;;  %v7909_v24 = vpop.permute.xlu1 %3658  ;;  %v3666_v53 = vmul.f32 %v7881_v42, %v8895_v52  ;;  %v3610_v4 = vadd.f32 %v3578_v27, %v3522_v29  ;;  %v8907_v52 = vld [vmem:[#allocation66_spill] sm:$0xff] }
 0x348   : > { %v3618_v26 = vadd.f32 %v3586_v43, %v3530_v11  ;;  %v3684_v25 = vmul.f32 %v7803_v12, %v7714_v62  ;;  %v7917_v10 = vmul.f32 %v7793_v30, %v7702_v63  ;;  %v7920_v19 = vmul.f32 %v3361_v55, %v8883_v36  ;;  %v7936_v11 = vpop.permute.xlu0 %3650  ;;  %v8903_v36 = vld [vmem:[#allocation83_spill] sm:$0xff]  ;;  %v8906_v43 = vld [vmem:[#allocation20_spill] sm:$0xff]  ;;  %v8908_v37 = vld [vmem:[#allocation82_spill] sm:$0xff] }
 0x349   : > { %v7922_v23 = vadd.f32 %v3605_v3, %v3549_v35  ;;  %v7925_v13 = vmul.f32 %v3362_v18, %v8884_v41  ;;  %v7927_v54 = vadd.f32 %v3603_v59, %v3547_v22  ;;  %v7929_v58 = vmul.f32 %v3425_v45, %v3425_v45  ;;  %v8904_v22 = vld [vmem:[#allocation58_spill] sm:$0xff]  ;;  %v8905_v41 = vld [vmem:[#allocation28_spill] sm:$0xff]  ;;  %v8910_v3 = vld [vmem:[#allocation57_spill] sm:$0xff] }
 0x34a   : > { %8896 = vst [vmem:[#allocation41_spill] sm:$0xff] %v7920_v19  ;;  %v7932_v29 = vmul.f32 %v3364_v47, %v8893_v16  ;;  %v7934_v62 = vmul.f32 %v3426_v39, %v3426_v39  ;;  %v7938_v63 = vadd.f32 %v3670_v14, %v3614_v31  ;;  %v3665_v27 = vmul.f32 %v7936_v11, %v8903_v36 }
 0x34b   : > { %8897 = vst [vmem:[#allocation48_spill] sm:$0xff] %v7922_v23  ;;  %8898 = vst [vmem:[#allocation40_spill] sm:$0xff] %v7925_v13  ;;  %v7940_v55 = vpop.permute.xlu1 %3738  ;;  %v7944_v18 = vadd.f32 %v3666_v53, %v3610_v4  ;;  %v3583_v45 = vmul.f32 %v7896_v32, %v8904_v22  ;;  %v3674_v47 = vmul.f32 %v7881_v42, %v8905_v41  ;;  %v8911_v4 = vld [vmem:[#allocation68_spill] sm:$0xff]  ;;  %v8912_v41 = vld [vmem:[#allocation11_spill] sm:$0xff] }
 0x34c   : > { %8899 = vst [vmem:[#allocation47_spill] sm:$0xff] %v7927_v54  ;;  %8900 = vst [vmem:[#allocation46_spill] sm:$0xff] %v7929_v58  ;;  %v3753_v39 = vmul.f32 %v7940_v55, %v8906_v43  ;;  %v3669_v16 = vmul.f32 %v7936_v11, %v8907_v52  ;;  %v3579_v31 = vmul.f32 %v7896_v32, %v8908_v37  ;;  %v3298_v22 = vpop.permute.xlu0 %3297  ;;  %v8913_v52 = vld [vmem:[#allocation85_spill] sm:$0xff] }
 0x34d   : > { %8901 = vst [vmem:[#allocation42_spill] sm:$0xff] %v7932_v29  ;;  %8902 = vst [vmem:[#allocation51_spill] sm:$0xff] %v7934_v62  ;;  %v3678_v14 = vmul.f32 %v7881_v42, %v7722_v1  ;;  %v7958_v53 = vmul.f32 %v3428_v17, %v3428_v17  ;;  %v3697_v35 = vadd.f32 %v3665_v27, %v7805_v44  ;;  %v8914_v17 = vld [vmem:[#allocation62_spill] sm:$0xff]  ;;  %v8915_v44 = vld [vmem:[#allocation80_spill] sm:$0xff] }
 0x34e   : > { %v3671_v59 = vmul.f32 %v7909_v24, %v8910_v3  ;;  %v3587_v36 = vmul.f32 %v7896_v32, %v8911_v4  ;;  %v3757_v43 = vmul.f32 %v7940_v55, %v8912_v41  ;;  %v3667_v37 = vmul.f32 %v7909_v24, %v8913_v52  ;;  %v8917_v41 = vld [vmem:[#allocation72_spill] sm:$0xff]  ;;  %v8918_v54 = vld [vmem:[#allocation13_spill] sm:$0xff] }
 0x34f   : > { %8909 = vst [vmem:[#allocation91_spill] sm:$0xff] %v7958_v53  ;;  %v3677_v1 = vmul.f32 %v7936_v11, %v7693_v5  ;;  %v3765_v23 = vmul.f32 %v7940_v55, %v8914_v17  ;;  %v3365_v27 = vmul.f32 %v8915_v44, %v3298_v22  ;;  %v3785_v29 = vadd.f32 %v3753_v39, %v3697_v35  ;;  %v8916_v53 = vld [vmem:[#allocation89_spill] sm:$0xff] }
 0x350   : > { %v3615_v3 = vadd.f32 %v3583_v45, %v7845_v6  ;;  %v3675_v4 = vmul.f32 %v7909_v24, %v8916_v53  ;;  %v3701_v19 = vadd.f32 %v3669_v16, %v7807_v48  ;;  %v3673_v58 = vmul.f32 %v7936_v11, %v8917_v41  ;;  %v8919_v13 = vld [vmem:[#allocation17_spill] sm:$0xff]  ;;  %v3302_v6 = vpop.permute.xlu0 %3301  ;;  %v8920_v53 = vld [vmem:[#allocation26_spill] sm:$0xff] }
 0x351   : > { %v3611_v52 = vadd.f32 %v3579_v31, %v7858_v2  ;;  %v3709_v5 = vadd.f32 %v3677_v1, %v8918_v54  ;;  %v3397_v62 = vadd.f32 %v3365_v27, %v8919_v13  ;;  %v3429_v17 = vsub.f32 %v8919_v13, %v3365_v27  ;;  %3852 = vperm.xlu1 %4334, %v3785_v29   ;;  %v7993_v1 = vpop.permute.xlu1 %3746  ;;  %v8921_v29 = vld [vmem:[#allocation88_spill] sm:$0xff] }
 0x352   : > { %v3619_v39 = vadd.f32 %v3587_v36, %v3531_v61  ;;  %v7984_v35 = vadd.f32 %v3674_v47, %v3618_v26  ;;  %v3789_v45 = vadd.f32 %v3757_v43, %v3701_v19  ;;  %v3761_v48 = vmul.f32 %v7940_v55, %v8920_v53  ;;  %v8923_v43 = vld [vmem:[#allocation59_spill] sm:$0xff] }
 0x353   : > { %v3703_v16 = vadd.f32 %v3671_v59, %v3615_v3  ;;  %v7988_v22 = vadd.f32 %v3765_v23, %v3709_v5  ;;  %v3461_v44 = vmul.f32 %v3429_v17, %v3429_v17  ;;  %v3550_v2 = vmul.f32 %v7667_v8, %v3397_v62  ;;  %v8922_v59 = vld [vmem:[#allocation14_spill] sm:$0xff] }
 0x354   : > { %v3606_v54 = vmul.f32 %v7793_v30, %v3429_v17  ;;  %v3366_v31 = vmul.f32 %v7751_v56, %v3302_v6  ;;  %v3705_v61 = vadd.f32 %v3673_v58, %v7815_v49  ;;  %v3699_v26 = vadd.f32 %v3667_v37, %v3611_v52  ;;  %v8005_v56 = vpop.permute.xlu0 %3734  ;;  %v8924_v58 = vld [vmem:[#allocation44_spill] sm:$0xff]  ;;  %v8925_v52 = vld [vmem:[#allocation45_spill] sm:$0xff]  ;;  %v8926_v17 = vld [vmem:[#allocation10_spill] sm:$0xff] }
 0x355   : > { %v3710_v19 = vadd.f32 %v3678_v14, %v7875_v34  ;;  %v3716_v47 = vadd.f32 %v3684_v25, %v8921_v29  ;;  %v8001_v23 = vmul.f32 %v7881_v42, %v3461_v44  ;;  %3864 = vperm.xlu1 %4334, %v3789_v45   ;;  %v3759_v49 = vmul.f32 %v7993_v1, %v8923_v43  ;;  %v8927_v45 = vld [vmem:[#allocation15_spill] sm:$0xff] }
 0x356   : > { %v7998_v36 = vadd.f32 %v3606_v54, %v3550_v2  ;;  %v3398_v8 = vadd.f32 %v3366_v31, %v8922_v59  ;;  %v3430_v62 = vsub.f32 %v8922_v59, %v3366_v31  ;;  %v3755_v34 = vmul.f32 %v7993_v1, %v8924_v58  ;;  %v8928_v44 = vld [vmem:[#allocation87_spill] sm:$0xff] }
 0x357   : > { %v8011_v14 = vadd.f32 %v3675_v4, %v3619_v39  ;;  %v3681_v25 = vmul.f32 %v7936_v11, %v7732_v28  ;;  %v3752_v5 = vmul.f32 %v8005_v56, %v8925_v52  ;;  %v3756_v6 = vmul.f32 %v8005_v56, %v8926_v17  ;;  %v8929_v39 = vld [vmem:[#allocation73_spill] sm:$0xff] }
 0x358   : > { %v3462_v37 = vmul.f32 %v3430_v62, %v3430_v62  ;;  %v3551_v3 = vmul.f32 %v7768_v40, %v3398_v8  ;;  %v3607_v41 = vmul.f32 %v7896_v32, %v3430_v62  ;;  %v3760_v53 = vmul.f32 %v8005_v56, %v8927_v45  ;;  %v8930_v8 = vld [vmem:[#allocation63_spill] sm:$0xff]  ;;  %v8035_v43 = vpop.permute.xlu0 %3742 }
 0x359   : > { %v3764_v4 = vmul.f32 %v8005_v56, %v8928_v44  ;;  %v3768_v28 = vmul.f32 %v8005_v56, %v8929_v39  ;;  %v3784_v29 = vadd.f32 %v3752_v5, %v7899_v51  ;;  %v3772_v62 = vmul.f32 %v8005_v56, %v8930_v8  ;;  %v8932_v5 = vld [vmem:[#allocation70_spill] sm:$0xff]  ;;  %v8933_v44 = vld [vmem:[#allocation27_spill] sm:$0xff] }
 0x35a   : > { %v8027_v2 = vadd.f32 %v3607_v41, %v3551_v3  ;;  %v8030_v54 = vmul.f32 %v7909_v24, %v3462_v37  ;;  %v3792_v58 = vadd.f32 %v3760_v53, %v7840_v9  ;;  %v3769_v3 = vmul.f32 %v7940_v55, %v7726_v21  ;;  %v8931_v37 = vld [vmem:[#allocation67_spill] sm:$0xff] }
 0x35b   : > { %v8039_v52 = vadd.f32 %v3764_v4, %v7848_v20  ;;  %v8042_v17 = vadd.f32 %v3768_v28, %v7867_v33  ;;  %3849 = vperm.xlu0 %4333, %v3784_v29   ;;  %v3758_v51 = vmul.f32 %v8035_v43, %v8931_v37  ;;  %v3793_v41 = vadd.f32 %v3761_v48, %v3705_v61  ;;  %v8934_v33 = vld [vmem:[#allocation18_spill] sm:$0xff] }
 0x35c   : > { %v8050_v45 = vmul.f32 %v7993_v1, %v8932_v5  ;;  %v3766_v9 = vmul.f32 %v8035_v43, %v8933_v44  ;;  %v8055_v20 = vmul.f32 %v3365_v27, %v8919_v13  ;;  %v3754_v53 = vmul.f32 %v8035_v43, %v8934_v33  ;;  %v8935_v13 = vld [vmem:[#allocation12_spill] sm:$0xff]  ;;  %v8936_v5 = vld [vmem:[#allocation49_spill] sm:$0xff]  ;;  %v8944_v33 = vld [vmem:[#allocation74_spill] sm:$0xff] }
 0x35d   : > { %v8059_v4 = vadd.f32 %v3772_v62, %v3716_v47  ;;  %v3713_v21 = vadd.f32 %v3681_v25, %v7730_v38  ;;  %v3788_v39 = vadd.f32 %v3756_v6, %v7902_v50  ;;  %v3790_v48 = vadd.f32 %v3758_v51, %v7938_v63  ;;  %v8937_v47 = vld [vmem:[#allocation34_spill] sm:$0xff]  ;;  %v8941_v25 = vld [vmem:[#allocation32_spill] sm:$0xff]  ;;  %v8942_v6 = vld [vmem:[#allocation23_spill] sm:$0xff] }
 0x35e   : > { %v3791_v61 = vadd.f32 %v3759_v49, %v3703_v16  ;;  %v8064_v28 = vadd.f32 %v3766_v9, %v3710_v19  ;;  %v3494_v29 = vmul.f32 %v3366_v31, %v8922_v59  ;;  %v3787_v8 = vadd.f32 %v3755_v34, %v3699_v26  ;;  %v8938_v59 = vld [vmem:[#allocation75_spill] sm:$0xff]  ;;  %v8940_v34 = vld [vmem:[#allocation29_spill] sm:$0xff] }
 0x35f   : > { %v8067_v37 = vadd.f32 %v3769_v3, %v3713_v21  ;;  %v3626_v27 = vadd.f32 %v7917_v10, %v8935_v13  ;;  %4589 = vpow2.f32 %v8936_v5  ;;  %3861 = vperm.xlu0 %4333, %v3788_v39   ;;  %3867 = vperm.xlu1 %4334, %v3790_v48   ;;  %v3682_v38 = vmul.f32 %v7881_v42, %v7741_v57  ;;  %v8939_v49 = vld [vmem:[#allocation35_spill] sm:$0xff]  ;;  %v8946_v48 = vld [vmem:[#allocation65_spill] sm:$0xff]  ;;  %v8947_v5 = vld [vmem:[#allocation22_spill] sm:$0xff] }
 0x360   : > { %v3770_v50 = vmul.f32 %v8035_v43, %v7745_v46  ;;  %v3688_v63 = vmul.f32 %v7803_v12, %v7777_v0  ;;  %v3786_v16 = vadd.f32 %v3754_v53, %v7944_v18  ;;  %v3776_v31 = vmul.f32 %v8005_v56, %v7756_v7  ;;  %v8943_v62 = vld [vmem:[#allocation31_spill] sm:$0xff] }
 0x361   : > { %v3685_v10 = vmul.f32 %v7936_v11, %v7753_v60  ;;  %v3773_v26 = vmul.f32 %v7940_v55, %v7748_v15  ;;  %v3714_v19 = vadd.f32 %v3682_v38, %v3626_v27  ;;  %v3543_v46 = vmul.f32 %v7768_v40, %v8938_v59  ;;  %v8945_v21 = vld [vmem:[#allocation43_spill] sm:$0xff]  ;;  %v8948_v38 = vld [vmem:[#allocation37_spill] sm:$0xff] }
 0x362   : > { %v3720_v57 = vadd.f32 %v3688_v63, %v8937_v47  ;;  %v3599_v0 = vmul.f32 %v7896_v32, %v8939_v49  ;;  %v3762_v18 = vmul.f32 %v8035_v43, %v8940_v34  ;;  %v3687_v60 = vmul.f32 %v7909_v24, %v8942_v6  ;;  %v8949_v63 = vld [vmem:[#allocation39_spill] sm:$0xff]  ;;  %v8957_v6 = vld [vmem:[#allocation46_spill] sm:$0xff] }
 0x363   : > { %v3717_v7 = vadd.f32 %v3685_v10, %v8941_v25  ;;  %v3775_v15 = vmul.f32 %v7993_v1, %v8943_v62  ;;  %3855 = vperm.xlu0 %4333, %v3786_v16   ;;  %3876 = vperm.xlu1 %4334, %v3793_v41   ;;  %v8097_v3 = vadd.f32 %v3770_v50, %v3714_v19  ;;  %v8952_v19 = vld [vmem:[#allocation51_spill] sm:$0xff]  ;;  %v8958_v62 = vld [vmem:[#allocation41_spill] sm:$0xff] }
 0x364   : > { %v8099_v51 = vadd.f32 %v3776_v31, %v3720_v57  ;;  %v3631_v44 = vadd.f32 %v3599_v0, %v3543_v46  ;;  %v3598_v53 = vmul.f32 %v7793_v30, %v8944_v33  ;;  %v3686_v39 = vmul.f32 %v7881_v42, %v8945_v21  ;;  %v8950_v31 = vld [vmem:[#allocation33_spill] sm:$0xff]  ;;  %v8953_v57 = vld [vmem:[#allocation40_spill] sm:$0xff]  ;;  %v8954_v46 = vld [vmem:[#allocation71_spill] sm:$0xff] }
 0x365   : > { %v8101_v9 = vadd.f32 %v3773_v26, %v3717_v7  ;;  %v3774_v13 = vmul.f32 %v8035_v43, %v8946_v48  ;;  %v3692_v41 = vmul.f32 %v7803_v12, %v8947_v5  ;;  %v3780_v50 = vmul.f32 %v8005_v56, %v8948_v38  ;;  %v8951_v26 = vld [vmem:[#allocation36_spill] sm:$0xff]  ;;  %v8956_v25 = vld [vmem:[#allocation47_spill] sm:$0xff]  ;;  %v8959_v48 = vld [vmem:[#allocation38_spill] sm:$0xff] }
 0x366   : > { %v3719_v27 = vadd.f32 %v3687_v60, %v3631_v44  ;;  %v3689_v16 = vmul.f32 %v7936_v11, %v8949_v63  ;;  %v3630_v10 = vadd.f32 %v3598_v53, %v8950_v31  ;;  %v3777_v30 = vmul.f32 %v7940_v55, %v8951_v26  ;;  %v8955_v56 = vld [vmem:[#allocation64_spill] sm:$0xff] }
 0x367   : > { %v3691_v47 = vmul.f32 %v7909_v24, %v8952_v19  ;;  %v3779_v59 = vmul.f32 %v7993_v1, %v8953_v57  ;;  %3873 = vperm.xlu0 %4333, %v3792_v58   ;;  %3870 = vperm.xlu1 %4334, %v3791_v61   ;;  %v3724_v49 = vadd.f32 %v3692_v41, %v8954_v46  ;;  %v8961_v41 = vld [vmem:[#allocation42_spill] sm:$0xff]  ;;  %v8967_v57 = vld [vmem:[#allocation69_spill] sm:$0xff] }
 0x368   : > { %v3807_v12 = vadd.f32 %v3775_v15, %v3719_v27  ;;  %v3721_v0 = vadd.f32 %v3689_v16, %v8955_v56  ;;  %v3718_v34 = vadd.f32 %v3686_v39, %v3630_v10  ;;  %v3690_v60 = vmul.f32 %v7881_v42, %v8957_v6  ;;  %v8960_v39 = vld [vmem:[#allocation91_spill] sm:$0xff]  ;;  %v8964_v16 = vld [vmem:[#allocation48_spill] sm:$0xff]  ;;  %v8965_v10 = vld [vmem:[#allocation77_spill] sm:$0xff] }
 0x369   : > { %v3723_v7 = vadd.f32 %v3691_v47, %v8956_v25  ;;  %v3778_v44 = vmul.f32 %v8035_v43, %v8958_v62  ;;  %v3812_v33 = vadd.f32 %v3780_v50, %v3724_v49  ;;  %v3727_v58 = vadd.f32 %v8030_v54, %v8027_v2  ;;  %v8962_v54 = vld [vmem:[#allocation52_spill] sm:$0xff] }
 0x36a   : > { %v3809_v53 = vadd.f32 %v3777_v30, %v3721_v0  ;;  %v3783_v61 = vmul.f32 %v7993_v1, %v3494_v29  ;;  %v3806_v15 = vadd.f32 %v3774_v13, %v3718_v34  ;;  %v3722_v27 = vadd.f32 %v3690_v60, %v8959_v48  ;;  %v8963_v29 = vld [vmem:[#allocation76_spill] sm:$0xff] }
 0x36b   : > { %v3811_v21 = vadd.f32 %v3779_v59, %v3723_v7  ;;  %v3693_v5 = vmul.f32 %v7936_v11, %v8960_v39  ;;  %3885 = vperm.xlu1 %4334, %v8039_v52   ;;  %3858 = vperm.xlu0 %4333, %v3787_v8   ;;  %v3781_v38 = vmul.f32 %v7940_v55, %v8961_v41 }
 0x36c   : > { %v3815_v42 = vadd.f32 %v3783_v61, %v3727_v58  ;;  %v3726_v50 = vadd.f32 %v8001_v23, %v7998_v36  ;;  %v4590_v2 = vpop.eup %4589  ;;  %v3382_v13 = vadd.f32 %v8963_v29, %v8962_v54  ;;  %v3810_v63 = vadd.f32 %v3778_v44, %v3722_v27  ;;  %v8966_v23 = vld [vmem:[#allocation30_spill] sm:$0xff] }
 0x36d   : > { %v3725_v31 = vadd.f32 %v3693_v5, %v8964_v16  ;;  %v3782_v11 = vmul.f32 %v8035_v43, %v8055_v20  ;;  %v3446_v52 = vmul.f32 %v8965_v10, %v8965_v10  ;;  %v3795_v8 = vadd.f32 %v8050_v45, %v8011_v14 }
 0x36e   : > { %v3794_v55 = vadd.f32 %v3762_v18, %v7984_v35  ;;  %v3591_v36 = vmul.f32 %v7896_v32, %v8965_v10  ;;  %v1874_v26 = vmul.f32 %v4590_v2, %v8966_v23  ;;  %v3478_v47 = vmul.f32 %v8963_v29, %v8962_v54 }
 0x36f   : > { %v3813_v30 = vadd.f32 %v3781_v38, %v3725_v31  ;;  %v3814_v19 = vadd.f32 %v3782_v11, %v3726_v50  ;;  %3882 = vperm.xlu1 %4334, %v3795_v8   ;;  %v3535_v43 = vmul.f32 %v7768_v40, %v3382_v13  ;;  %v3679_v20 = vmul.f32 %v7909_v24, %v3446_v52  ;;  %v8969_v50 = vld [vmem:[#allocation9_spill] sm:$0xff] }
 0x370   : > { %3879 = vperm.xlu0 %4333, %v3794_v55   ;;  %v3418_v14 = vsub.f32 %v1874_v26, %v8967_v57  ;;  %v3767_v35 = vmul.f32 %v7993_v1, %v3478_v47  ;;  %v3386_v59 = vadd.f32 %v8967_v57, %v1874_v26  ;;  %v3482_v0 = vmul.f32 %v8967_v57, %v1874_v26 }
 0x371   : > { %v3623_v45 = vadd.f32 %v3591_v36, %v3535_v43 }
 0x372   : > { %v3450_v46 = vmul.f32 %v3418_v14, %v3418_v14  ;;  %v3595_v56 = vmul.f32 %v7896_v32, %v3418_v14  ;;  %v3539_v34 = vmul.f32 %v7768_v40, %v3386_v59 }
 0x373   : > { %3897 = vperm.xlu1 %4334, %v8042_v17   ;;  %v3711_v18 = vadd.f32 %v3679_v20, %v3623_v45  ;;  %v3771_v17 = vmul.f32 %v7993_v1, %v3482_v0 }
 0x374   : > { %3888 = vperm.xlu0 %4333, %v7988_v22   ;;  %v3683_v25 = vmul.f32 %v7909_v24, %v3450_v46  ;;  %v3627_v7 = vadd.f32 %v3595_v56, %v3539_v34 }
 0x375   : > { %v3799_v49 = vadd.f32 %v3767_v35, %v3711_v18 }
 0x376   : > { %v3715_v22 = vadd.f32 %v3683_v25, %v3627_v7 }
 0x377   : > { %3894 = vperm.xlu1 %4334, %v3799_v49  }
 0x378   : > { %3891 = vperm.xlu0 %4333, %v8064_v28   ;;  %v3803_v6 = vadd.f32 %v3771_v17, %v3715_v22 }
 0x37b   : > { %3909 = vperm.xlu1 %4334, %v8059_v4  }
 0x37c   : > { %3900 = vperm.xlu0 %4333, %v8067_v37  }
 0x37f   : > { %3906 = vperm.xlu1 %4334, %v3803_v6  }
 0x380   : > { %3903 = vperm.xlu0 %4333, %v8097_v3  }
 0x383   : > { %3921 = vperm.xlu1 %4334, %v8099_v51  }
 0x384   : > { %3912 = vperm.xlu0 %4333, %v8101_v9  }
 0x387   : > { %3918 = vperm.xlu1 %4334, %v3807_v12  }
 0x388   : > { %3915 = vperm.xlu0 %4333, %v3806_v15  }
 0x38b   : > { %3933 = vperm.xlu1 %4334, %v3812_v33  }
 0x38c   : > { %3924 = vperm.xlu0 %4333, %v3809_v53  }
 0x38f   : > { %3930 = vperm.xlu1 %4334, %v3811_v21   ;;  %v8968_v21 = vlaneseq }
 0x390   : > { %3927 = vperm.xlu0 %4333, %v3810_v63  }
 0x391   : > { %v3945_v48 = vand.u32 127, %v8968_v21 }
 0x393   : > { %3942 = vperm.xlu1 %4334, %v3815_v42   ;;  %v3957_v5 = vadd.s32 4294967280, %v3945_v48  ;;  %v3950_v42 = vadd.s32 4294967288, %v3945_v48  ;;  %v8189_v2 = vsub.s32 %v3945_v48, %v8969_v50  ;;  %v3964_v29 = vadd.s32 4294967272, %v3945_v48 }
 0x394   : > { %3936 = vperm.xlu0 %4333, %v3813_v30  }
 0x395   : > { %v8192_v54 = vsub.s32 %v3957_v5, %v8969_v50  ;;  %v8195_v13 = vsub.s32 %v3950_v42, %v8969_v50  ;;  %v8205_v55 = vsub.s32 %v3964_v29, %v8969_v50 }
 0x398   : > { %3939 = vperm.xlu0 %4333, %v3814_v19  }
 0x3cc   : > { %v3853_v40 = vpop.permute.xlu1 %3852 }
 0x3cd   : > { %v3954_v36 = vrot.slane %v3853_v40, %v8195_v13 }
 0x3d0   : > { %v3865_v24 = vpop.permute.xlu1 %3864 }
 0x3d1   : > { %v3978_v10 = vrot.slane %v3865_v24, %v8195_v13 }
 0x3d6   : > { %v3850_v32 = vpop.permute.xlu0 %3849 }
 0x3d7   : > { %v3949_v11 = vrot.slane %v3850_v32, %v8189_v2 }
 0x3d9   : > { %v3956_v47 = vsel %vm3955_vm0, %v3954_v36, %v3949_v11 }
 0x3da   : > { %v3862_v1 = vpop.permute.xlu0 %3861  ;;  %v3868_v4 = vpop.permute.xlu1 %3867 }
 0x3db   : > { %v3974_v63 = vrot.slane %v3862_v1, %v8189_v2  ;;  %v3983_v52 = vrot.slane %v3868_v4, %v8192_v54 }
 0x3dd   : > { %v3979_v23 = vsel %vm3955_vm0, %v3978_v10, %v3974_v63 }
 0x3de   : > { %v3856_v28 = vpop.permute.xlu0 %3855  ;;  %v3877_v37 = vpop.permute.xlu1 %3876  ;;  %v3984_v57 = vsel %vm3962_vm1, %v3983_v52, %v3979_v23 }
 0x3df   : > { %v3961_v8 = vrot.slane %v3856_v28, %v8192_v54  ;;  %v3997_v43 = vrot.slane %v3877_v37, %v8195_v13 }
 0x3e1   : > { %v3963_v14 = vsel %vm3962_vm1, %v3961_v8, %v3956_v47 }
 0x3e2   : > { %v3874_v3 = vpop.permute.xlu0 %3873  ;;  %v8173_v51 = vpop.permute.xlu1 %3870 }
 0x3e3   : > { %v3993_v26 = vrot.slane %v3874_v3, %v8189_v2  ;;  %v3988_v45 = vrot.slane %v8173_v51, %v8205_v55 }
 0x3e5   : > { %v3998_v18 = vsel %vm3955_vm0, %v3997_v43, %v3993_v26  ;;  %v3989_v21 = vsel %vm3969_vm2, %v3988_v45, %v3984_v57 }
 0x3e6   : > { %v8175_v9 = vpop.permute.xlu0 %3858  ;;  %v3886_v12 = vpop.permute.xlu1 %3885 }
 0x3e7   : > { %v3968_v59 = vrot.slane %v8175_v9, %v8205_v55  ;;  %v4012_v56 = vrot.slane %v3886_v12, %v8189_v2 }
 0x3e9   : > { %v3970_v12 = vsel %vm3969_vm2, %v3968_v59, %v3963_v14 }
 0x3ea   : > { %v8177_v62 = vpop.permute.xlu1 %3882  ;;  %v4105_v5 = vsel %vm4104_vm3, %v3989_v21, %v3970_v12 }
 0x3eb   : > { %v3880_v60 = vpop.permute.xlu0 %3879  ;;  %v4007_v0 = vrot.slane %v8177_v62, %v8205_v55 }
 0x3ec   : > { %v4002_v20 = vrot.slane %v3880_v60, %v8192_v54 }
 0x3ee   : > { %v8179_v33 = vpop.permute.xlu1 %3897  ;;  %v4003_v17 = vsel %vm3962_vm1, %v4002_v20, %v3998_v18 }
 0x3ef   : > { %v3889_v44 = vpop.permute.xlu0 %3888  ;;  %v4031_v22 = vrot.slane %v8179_v33, %v8189_v2 }
 0x3f0   : > { %v4016_v35 = vrot.slane %v3889_v44, %v8195_v13 }
 0x3f2   : > { %v8181_v58 = vpop.permute.xlu1 %3894  ;;  %v4017_v32 = vsel %vm3955_vm0, %v4016_v35, %v4012_v56 }
 0x3f3   : > { %v3892_v53 = vpop.permute.xlu0 %3891  ;;  %v4026_v1 = vrot.slane %v8181_v58, %v8205_v55 }
 0x3f4   : > { %v4021_v46 = vrot.slane %v3892_v53, %v8192_v54  ;;  %v4008_v53 = vsel %vm3969_vm2, %v4007_v0, %v4003_v17 }
 0x3f6   : > { %v8183_v15 = vpop.permute.xlu1 %3909  ;;  %v4022_v37 = vsel %vm3962_vm1, %v4021_v46, %v4017_v32 }
 0x3f7   : > { %v3901_v61 = vpop.permute.xlu0 %3900  ;;  %v4050_v4 = vrot.slane %v8183_v15, %v8189_v2  ;;  %v4027_v48 = vsel %vm3969_vm2, %v4026_v1, %v4022_v37 }
 0x3f8   : > { %v4035_v49 = vrot.slane %v3901_v61, %v8195_v13 }
 0x3fa   : > { %v8186_v39 = vpop.permute.xlu1 %3906  ;;  %v4036_v3 = vsel %vm3955_vm0, %v4035_v49, %v4031_v22 }
 0x3fb   : > { %v3904_v27 = vpop.permute.xlu0 %3903  ;;  %v4045_v51 = vrot.slane %v8186_v39, %v8205_v55 }
 0x3fc   : > { %v4040_v34 = vrot.slane %v3904_v27, %v8192_v54 }
 0x3fe   : > { %v3922_v38 = vpop.permute.xlu1 %3921  ;;  %v4041_v60 = vsel %vm3962_vm1, %v4040_v34, %v4036_v3 }
 0x3ff   : > { %v3913_v41 = vpop.permute.xlu0 %3912  ;;  %v4069_v9 = vrot.slane %v3922_v38, %v8189_v2  ;;  %v4046_v42 = vsel %vm3969_vm2, %v4045_v51, %v4041_v60  ;;  %v4107_v38 = vsel %vm4106_vm4, %v4008_v53, %v4105_v5 }
 0x400   : > { %v4054_v25 = vrot.slane %v3913_v41, %v8195_v13 }
 0x402   : > { %v8198_v31 = vpop.permute.xlu1 %3918  ;;  %v4055_v62 = vsel %vm3955_vm0, %v4054_v25, %v4050_v4 }
 0x403   : > { %v3916_v16 = vpop.permute.xlu0 %3915  ;;  %v4064_v44 = vrot.slane %v8198_v31, %v8205_v55 }
 0x404   : > { %v4059_v6 = vrot.slane %v3916_v16, %v8192_v54  ;;  %v4109_v16 = vsel %vm4108_vm5, %v4027_v48, %v4107_v38 }
 0x405   : > { %v4111_v11 = vsel %vm4110_vm6, %v4046_v42, %v4109_v16 }
 0x406   : > { %v3934_v19 = vpop.permute.xlu1 %3933  ;;  %v4060_v58 = vsel %vm3962_vm1, %v4059_v6, %v4055_v62 }
 0x407   : > { %v3925_v30 = vpop.permute.xlu0 %3924  ;;  %v4065_v50 = vsel %vm3969_vm2, %v4064_v44, %v4060_v58  ;;  %v4088_v29 = vrot.slane %v3934_v19, %v8189_v2 }
 0x408   : > { %v4073_v40 = vrot.slane %v3925_v30, %v8195_v13  ;;  %v4113_v2 = vsel %vm4112_vm7, %v4065_v50, %v4111_v11 }
 0x40a   : > { %v3931_v24 = vpop.permute.xlu1 %3930  ;;  %v4074_v61 = vsel %vm3955_vm0, %v4073_v40, %v4069_v9 }
 0x40b   : > { %v3928_v7 = vpop.permute.xlu0 %3927  ;;  %v4083_v15 = vrot.slane %v3931_v24, %v8205_v55 }
 0x40c   : > { %v4078_v28 = vrot.slane %v3928_v7, %v8192_v54 }
 0x40e   : > { %v4079_v27 = vsel %vm3962_vm1, %v4078_v28, %v4074_v61  ;;  %v3943_v41 = vpop.permute.xlu1 %3942 }
 0x40f   : > { %v3937_v33 = vpop.permute.xlu0 %3936  ;;  %v4084_v31 = vsel %vm3969_vm2, %v4083_v15, %v4079_v27  ;;  %v4102_v52 = vrot.slane %v3943_v41, %v8205_v55 }
 0x410   : > { %v4092_v39 = vrot.slane %v3937_v33, %v8195_v13  ;;  %v4115_v23 = vsel %vm4114_vm8, %v4084_v31, %v4113_v2 }
 0x412   : > { %v4093_v10 = vsel %vm3955_vm0, %v4092_v39, %v4088_v29 }
 0x413   : > { %v3940_v63 = vpop.permute.xlu0 %3939 }
 0x414   : > { %v4097_v13 = vrot.slane %v3940_v63, %v8192_v54  ;;  %v4267_v54 = vld [vmem:[#allocation2] ss:$0 sm:$0xff] }
 0x416   : > { %v4098_v8 = vsel %vm3962_vm1, %v4097_v13, %v4093_v10 }
 0x417   : > { %v4103_v36 = vsel %vm3969_vm2, %v4102_v52, %v4098_v8 }
 0x418   : > { %v4117_v26 = vsel %vm4116_vm9, %v4103_v36, %v4115_v23 }
 0x419   : > { %v4120_v30 = vsel %vm4119_vm10, %v4117_v26, 0.0 }
 0x41a   : > { %4121 = vadd.xlane.f32.xlu0 %v4120_v30 }
 0x4a3   : > { %v4122_v19 = vpop.xlane.xlu0 %4121 }
 0x4a4   : > { %v4130_v47 = vadd.f32 %v4267_v54, %v4122_v19 }
 0x4a6   : > { %4131 = vxpose.xlu1.b32.start.end [1/1] (short) (narrow) %v4130_v47, 8 }
 0x522   : > { %v4147_v55 = vpop.trf.xlu1 }
 0x523   : > { %4164 = vst.msk [vmem:[%s287_s18] sm:$0x1] %vm4163_vm11, %v4147_v55 }
 0x524   : > { %4642 = shalt.err (!%p4639_p0)
}
 0x525   : > { %s4643_s12 = scalar_lea.hbm %s8274_s17, 16  ;;  %s4647_s14 = scalar_lea.hbm %s8317_s6, 32 }
 0x526   : > { %p4644_p2 = scmp.ne.s32.totalorder %s8274_s17, %s4643_s12  ;;  %p4648_p3 = scmp.lt.s32.totalorder %s8274_s17, %s8317_s6 }
 0x527   : > { %p4649_p6 = scmp.lt.s32.totalorder %s4647_s14, %s4643_s12 }
 0x528   : > { %p4645_p9 = pnand %p4644_p2, %p8970_p13 }
 0x529   : > { %p4650_p11 = por %p4649_p6, %p4648_p3 }
 0x52a   : > { %p4646_p1 = pneg %p4645_p9 }
 0x52c   : > { %p4651_p12 = pnand %p4650_p11, %p4646_p1 }
 0x52e   : > { %4654 = shalt.err (!%p4651_p12)
}
 0x52f   : > { %4275 = dma.vmem_to_hbm [thread:$0]  (%p8970_p13), %s4179_s22, 16, %s8274_s17, %s4166_s19  }
 0x530 PF: > { %s4190_s16 = sand.u32 1, %s4681_s23   ;;  %p8971_p4 = scmp.ne.s32.totalorder %s8476_s11, 0 }
 0x531   : > { %p8972_p5 = scmp.ge.s32.totalorder %s4693_s26, 2  ;;  %s4191_s18 = scalar_lea.sflag [#allocation5], %s4190_s16 }
 0x533   : > { %p4282_p7 = pnand %p8972_p5, %p8971_p4 }
 0x535   : > { %p4283_p8 = pneg %p4282_p7 }
 0x537   : > { %4676 = dma.done.wait (%p4283_p8), %s4191_s18, 16  }
 0x538   : > { %4678 = vsyncadd (%p4283_p8), %s4191_s18, 4294967280  ;;  %p21_p10 = scmp.ge.s32.totalorder %s4766_s28, 4   ;;  %s8973_s23 = smov %s4685_s24 }
 0x539   : > { %s8974_s24 = smov %s4689_s25  ;;  %s8975_s25 = smov %s4778_s7 }
 0x53a   : > { %s8976_s26 = smov %s4766_s28  ;;  %23 = sbr.rel (!%p21_p10) target bundleno = 8 (0x8), region = 92 }
 0x53f   :  { %4195 = vsyncpa [#allocation4], 1 }
 0x540   :  { %4197 = vsyncpa [#allocation4 + $0x1], 1 }
 0x541   :  { %4198 = vsyncpa [#allocation5], 1 }
 0x542   :  { %4200 = vsyncpa [#allocation5 + $0x1], 1 }

</bundles_post_ra>
